<compile_context>
chip_gen: v7x
topology: tpu7x:2x2x1
jax: 0.10.0
libtpu: 0.0.40
codegen_flags: <defaults>
</compile_context>

<pallas_src>
import functools

import jax
import jax.numpy as jnp
from jax.experimental import pallas as pl
from jax.experimental.pallas import tpu as pltpu

NUM_HEADS = 2
FFN_DIM = 32
LN_EPS = 1e-5


def encoder_layer_kernel(x_ref, wqkv_ref, bqkv_ref, wo_ref, bo_ref,
                         g1_ref, be1_ref, w1_ref, bb1_ref, w2_ref, bb2_ref,
                         g2_ref, be2_ref, o_ref, *, seq_len):
    R, E = x_ref.shape                   # R = nb * seq_len, batch-major rows
    L = seq_len
    nb = R // L
    H = NUM_HEADS
    Dh = E // H
    scale = 1.0 / (Dh ** 0.5)

    # Input block is already batch-major (rows ordered (batch, seq)); no
    # in-kernel reorder of any kind.
    xf = x_ref[...]                                                 # (R, E)

    # ---- fused QKV projection over the whole slab (one MXU matmul) ---------
    qkv = jnp.dot(xf, wqkv_ref[...], preferred_element_type=jnp.float32)
    qkv = qkv + bqkv_ref[...]                                       # (R, 3E)
    wo = wo_ref[...]                                                # (E, E)

    # ---- multi-head attention, batched over the nb batch elements ----------
    # H == 2: static unroll; the out-projection is accumulated per head so the
    # first head's matmul initialises the accumulator (no add-to-zeros).
    attn = None
    for h in range(H):
        qh = (qkv[:, h * Dh:(h + 1) * Dh] * scale).reshape(nb, L, Dh)
        kh = qkv[:, E + h * Dh:E + (h + 1) * Dh].reshape(nb, L, Dh)
        vh = qkv[:, 2 * E + h * Dh:2 * E + (h + 1) * Dh].reshape(nb, L, Dh)
        s = jnp.einsum('bqd,bkd->bqk', qh, kh,
                       preferred_element_type=jnp.float32)          # (nb, L, L)
        s = s - jnp.max(s, axis=-1, keepdims=True)
        p = jnp.exp(s)
        p = p * pl.reciprocal(jnp.sum(p, axis=-1, keepdims=True), approx=True)
        oh = jnp.einsum('bqk,bkd->bqd', p, vh,
                        preferred_element_type=jnp.float32)         # (nb, L, Dh)
        contrib = jnp.dot(oh.reshape(R, Dh), wo[h * Dh:(h + 1) * Dh, :],
                          preferred_element_type=jnp.float32)
        attn = contrib if attn is None else attn + contrib
    attn = attn + bo_ref[...]

    # ---- residual + layernorm 1 ---------------------------------------------
    y = xf + attn
    mu = jnp.mean(y, axis=-1, keepdims=True)
    yc = y - mu
    var = jnp.mean(yc * yc, axis=-1, keepdims=True)
    y = yc * jax.lax.rsqrt(var + LN_EPS) * g1_ref[...] + be1_ref[...]

    # ---- feed-forward (relu); dropout is eval-mode identity ------------------
    hdn = jnp.maximum(
        jnp.dot(y, w1_ref[...], preferred_element_type=jnp.float32) + bb1_ref[...],
        0.0)
    ff = jnp.dot(hdn, w2_ref[...], preferred_element_type=jnp.float32) + bb2_ref[...]

    # ---- residual + layernorm 2 ---------------------------------------------
    z = y + ff
    mu2 = jnp.mean(z, axis=-1, keepdims=True)
    zc = z - mu2
    var2 = jnp.mean(zc * zc, axis=-1, keepdims=True)
    z = zc * jax.lax.rsqrt(var2 + LN_EPS) * g2_ref[...] + be2_ref[...]

    # ---- single full-block store (batch-major; wrapper undoes the layout) ---
    o_ref[...] = z


def _num_tensorcores_per_chip():
    """Best-effort TC count; 2 only on v7x-class parts, else 1."""
    try:
        info = pltpu.get_tpu_info()
        for attr in ("num_cores", "num_tensorcores", "tensorcores_per_chip",
                     "cores_per_chip"):
            v = getattr(info, attr, None)
            if v:
                return int(v)
    except Exception:
        pass
    try:
        kind = jax.devices()[0].device_kind.lower()
        if "v7" in kind:
            return 2
    except Exception:
        pass
    return 1


def transformer_encoder_layer(x_lne, params):
    """x_lne: (L, N, E) -> (L, N, E), full post-LN encoder layer (eval mode)."""
    L, N, E = x_lne.shape
    assert E % NUM_HEADS == 0, "embed_dim must be divisible by num_heads"

    # One tiny wrapper-side transpose gives the kernel a batch-major slab, so
    # no in-kernel gather / scatter exists at all.
    x_bm = jnp.transpose(x_lne, (1, 0, 2)).reshape(N * L, E)        # (N*L, E)

    # Grid: a second step only pays off where there are 2 TensorCores (v7x);
    # on v5e/v6e it is a pure serial-overhead step, so use a single block.
    batch_blocks = 1
    if (_num_tensorcores_per_chip() >= 2 and N % 2 == 0
            and ((N // 2) * L) % 8 == 0):
        batch_blocks = 2
    rows = (N // batch_blocks) * L                                  # block rows

    def full_spec(shape):
        nd = len(shape)
        return pl.BlockSpec(shape, lambda i, nd=nd: (0,) * nd)

    # Advisory cost estimate (helps XLA schedule neighbouring ops).
    R = N * L
    flops = int(2 * R * E * 3 * E                       # QKV
                + 2 * 2 * N * NUM_HEADS * L * L * (E // NUM_HEADS)  # scores + PV
                + 2 * R * E * E                         # out-proj
                + 2 * 2 * R * E * FFN_DIM)              # FFN
    transcendentals = int(N * NUM_HEADS * L * L + 4 * R)
    bytes_accessed = int(2 * R * E * 4 + sum(int(p.size) * 4 for p in params))

    out_bm = pl.pallas_call(
        functools.partial(encoder_layer_kernel, seq_len=L),
        out_shape=jax.ShapeDtypeStruct((N * L, E), jnp.float32),
        grid=(batch_blocks,),
        in_specs=[pl.BlockSpec((rows, E), lambda i: (i, 0))]
                 + [full_spec(p.shape) for p in params],
        out_specs=pl.BlockSpec((rows, E), lambda i: (i, 0)),
        compiler_params=pltpu.CompilerParams(
            dimension_semantics=("parallel",)),
        cost_estimate=pl.CostEstimate(flops=flops,
                                      transcendentals=transcendentals,
                                      bytes_accessed=bytes_accessed),
    )(x_bm, *params)

    # Undo the batch-major layout (tiny XLA transpose, fused by XLA).
    return jnp.transpose(out_bm.reshape(N, L, E), (1, 0, 2))


def self_attention_forward(x, params, need_weights=False):
    x_shape = x.shape
    x3 = x.reshape(-1, x_shape[-2], x_shape[-1])    # (L, N, E), batch_first=False
    out = transformer_encoder_layer(x3, params)
    if not need_weights:
        out = out.reshape(x_shape)
    return out


def init_params(key, embed_dim, ffn_dim=FFN_DIM):
    E, F = embed_dim, ffn_dim
    ks = jax.random.split(key, 8)
    s = 0.1
    w_qkv = jax.random.normal(ks[0], (E, 3 * E), jnp.float32) * s  # in_proj_weight.T
    b_qkv = jax.random.normal(ks[1], (1, 3 * E), jnp.float32) * s
    w_o   = jax.random.normal(ks[2], (E, E), jnp.float32) * s      # out_proj.weight.T
    b_o   = jax.random.normal(ks[3], (1, E), jnp.float32) * s
    g1    = jnp.ones((1, E), jnp.float32)
    be1   = jnp.zeros((1, E), jnp.float32)
    w1    = jax.random.normal(ks[4], (E, F), jnp.float32) * s      # linear1.weight.T
    bb1   = jax.random.normal(ks[5], (1, F), jnp.float32) * s
    w2    = jax.random.normal(ks[6], (F, E), jnp.float32) * s      # linear2.weight.T
    bb2   = jax.random.normal(ks[7], (1, E), jnp.float32) * s
    g2    = jnp.ones((1, E), jnp.float32)
    be2   = jnp.zeros((1, E), jnp.float32)
    return (w_qkv, b_qkv, w_o, b_o, g1, be1, w1, bb1, w2, bb2, g2, be2)


def encoder_layer_ref(x_lne, params):
    """Pure-JAX reference of the same math (eval-mode TransformerEncoderLayer)."""
    (w_qkv, b_qkv, w_o, b_o, g1, be1, w1, bb1, w2, bb2, g2, be2) = params
    L, N, E = x_lne.shape
    H, Dh = NUM_HEADS, E // NUM_HEADS
    qkv = x_lne @ w_qkv + b_qkv[0]                        # (L, N, 3E)
    q, k, v = qkv[..., :E], qkv[..., E:2 * E], qkv[..., 2 * E:]
    qh = q.reshape(L, N, H, Dh)
    kh = k.reshape(L, N, H, Dh)
    vh = v.reshape(L, N, H, Dh)
    s = jnp.einsum('lnhd,mnhd->nhlm', qh, kh) / (Dh ** 0.5)
    p = jax.nn.softmax(s, axis=-1)
    o = jnp.einsum('nhlm,mnhd->lnhd', p, vh).reshape(L, N, E)
    y = x_lne + (o @ w_o + b_o[0])
    mu = y.mean(-1, keepdims=True)
    y = (y - mu) / jnp.sqrt(((y - mu) ** 2).mean(-1, keepdims=True) + LN_EPS) * g1[0] + be1[0]
    ff = jnp.maximum(y @ w1 + bb1[0], 0.0) @ w2 + bb2[0]
    z = y + ff
    mu2 = z.mean(-1, keepdims=True)
    z = (z - mu2) / jnp.sqrt(((z - mu2) ** 2).mean(-1, keepdims=True) + LN_EPS) * g2[0] + be2[0]
    return z


if __name__ == "__main__":
    key = jax.random.PRNGKey(0)
    kx, kp = jax.random.split(key)

    # x: (2, 4, 16, 16) -> the module reshapes it to (L=8, N=16, E=16)
    x = jax.random.normal(kx, (2, 4, 16, 16), jnp.float32)
    params = init_params(kp, x.shape[-1])

    fwd = jax.jit(self_attention_forward)
    out = jax.block_until_ready(fwd(x, params))

    # sanity-check against the pure-JAX reference
    x3 = x.reshape(-1, x.shape[-2], x.shape[-1])
    ref = encoder_layer_ref(x3, params).reshape(x.shape)
    assert out.shape == x.shape
    err = float(jnp.max(jnp.abs(out - ref)))
    assert jnp.allclose(out, ref, rtol=3e-3, atol=3e-3), err
    print("KERNEL_OK")
</pallas_src>

<mosaic_0001>
module attributes {stable_mosaic.version = 11 : i64} {
  func.func @encoder_layer_kernel(%arg0: i32, %arg1: memref<128x16xf32, #tpu.memory_space<vmem>>, %arg2: memref<16x48xf32, #tpu.memory_space<vmem>>, %arg3: memref<1x48xf32, #tpu.memory_space<vmem>>, %arg4: memref<16x16xf32, #tpu.memory_space<vmem>>, %arg5: memref<1x16xf32, #tpu.memory_space<vmem>>, %arg6: memref<1x16xf32, #tpu.memory_space<vmem>>, %arg7: memref<1x16xf32, #tpu.memory_space<vmem>>, %arg8: memref<16x32xf32, #tpu.memory_space<vmem>>, %arg9: memref<1x32xf32, #tpu.memory_space<vmem>>, %arg10: memref<32x16xf32, #tpu.memory_space<vmem>>, %arg11: memref<1x16xf32, #tpu.memory_space<vmem>>, %arg12: memref<1x16xf32, #tpu.memory_space<vmem>>, %arg13: memref<1x16xf32, #tpu.memory_space<vmem>>, %arg14: memref<128x16xf32, #tpu.memory_space<vmem>>) attributes {dimension_semantics = [#tpu.dimension_semantics<parallel>], iteration_bounds = array<i64: 1>, scalar_prefetch = 0 : i64, scratch_operands = 0 : i64, tpu.core_type = #tpu.core_type<tc>, window_params = [{transform_indices = @transform_0, window_bounds = array<i64: 128, 16>}, {pipeline_mode = #tpu.pipeline_mode<synchronous>, transform_indices = @transform_1, window_bounds = array<i64: 16, 48>}, {pipeline_mode = #tpu.pipeline_mode<synchronous>, transform_indices = @transform_2, window_bounds = array<i64: 1, 48>}, {pipeline_mode = #tpu.pipeline_mode<synchronous>, transform_indices = @transform_3, window_bounds = array<i64: 16, 16>}, {pipeline_mode = #tpu.pipeline_mode<synchronous>, transform_indices = @transform_4, window_bounds = array<i64: 1, 16>}, {pipeline_mode = #tpu.pipeline_mode<synchronous>, transform_indices = @transform_5, window_bounds = array<i64: 1, 16>}, {pipeline_mode = #tpu.pipeline_mode<synchronous>, transform_indices = @transform_6, window_bounds = array<i64: 1, 16>}, {pipeline_mode = #tpu.pipeline_mode<synchronous>, transform_indices = @transform_7, window_bounds = array<i64: 16, 32>}, {pipeline_mode = #tpu.pipeline_mode<synchronous>, transform_indices = @transform_8, window_bounds = array<i64: 1, 32>}, {pipeline_mode = #tpu.pipeline_mode<synchronous>, transform_indices = @transform_9, window_bounds = array<i64: 32, 16>}, {pipeline_mode = #tpu.pipeline_mode<synchronous>, transform_indices = @transform_10, window_bounds = array<i64: 1, 16>}, {pipeline_mode = #tpu.pipeline_mode<synchronous>, transform_indices = @transform_11, window_bounds = array<i64: 1, 16>}, {pipeline_mode = #tpu.pipeline_mode<synchronous>, transform_indices = @transform_12, window_bounds = array<i64: 1, 16>}, {transform_indices = @transform_13, window_bounds = array<i64: 128, 16>}]} {
    %c0 = arith.constant 0 : index
    %c0_0 = arith.constant 0 : index
    %0 = vector.load %arg1[%c0, %c0_0] : memref<128x16xf32, #tpu.memory_space<vmem>>, vector<128x16xf32>
    %c0_1 = arith.constant 0 : index
    %c0_2 = arith.constant 0 : index
    %1 = vector.load %arg2[%c0_1, %c0_2] : memref<16x48xf32, #tpu.memory_space<vmem>>, vector<16x48xf32>
    %cst = arith.constant dense<0.000000e+00> : vector<128x48xf32>
    %2 = tpu.matmul %0, %1, %cst {dimension_numbers = #tpu.dot_dimension_numbers<[1], [0], [0], [1], [0, 0, 1, 1], [], []>} : vector<128x16xf32>, vector<16x48xf32>, vector<128x48xf32> -> vector<128x48xf32>
    %c0_3 = arith.constant 0 : index
    %c0_4 = arith.constant 0 : index
    %3 = vector.load %arg3[%c0_3, %c0_4] : memref<1x48xf32, #tpu.memory_space<vmem>>, vector<1x48xf32>
    %4 = vector.broadcast %3 : vector<1x48xf32> to vector<128x48xf32>
    %5 = arith.addf %2, %4 : vector<128x48xf32>
    %c0_5 = arith.constant 0 : index
    %c0_6 = arith.constant 0 : index
    %6 = vector.load %arg4[%c0_5, %c0_6] : memref<16x16xf32, #tpu.memory_space<vmem>>, vector<16x16xf32>
    %7 = vector.extract_strided_slice %5 {offsets = [0, 0], sizes = [128, 8], strides = [1, 1]} : vector<128x48xf32> to vector<128x8xf32>
    %cst_7 = arith.constant 0.353553385 : f32
    %8 = vector.broadcast %cst_7 : f32 to vector<128x8xf32>
    %9 = arith.mulf %7, %8 : vector<128x8xf32>
    %10 = vector.shape_cast %9 : vector<128x8xf32> to vector<16x8x8xf32>
    %11 = vector.extract_strided_slice %5 {offsets = [0, 16], sizes = [128, 8], strides = [1, 1]} : vector<128x48xf32> to vector<128x8xf32>
    %12 = vector.shape_cast %11 : vector<128x8xf32> to vector<16x8x8xf32>
    %13 = vector.extract_strided_slice %5 {offsets = [0, 32], sizes = [128, 8], strides = [1, 1]} : vector<128x48xf32> to vector<128x8xf32>
    %14 = vector.shape_cast %13 : vector<128x8xf32> to vector<16x8x8xf32>
    "tpu.trace_start"() <{level = 10 : i32, message = "bqd,bkd->bqk"}> : () -> ()
    %cst_8 = arith.constant dense<0.000000e+00> : vector<16x8x8xf32>
    %15 = tpu.matmul %10, %12, %cst_8 {dimension_numbers = #tpu.dot_dimension_numbers<[2], [2], [1], [1], [0, 0, 0, 1, 1, 1], [0], [0]>} : vector<16x8x8xf32>, vector<16x8x8xf32>, vector<16x8x8xf32> -> vector<16x8x8xf32>
    "tpu.trace_stop"() : () -> ()
    %cst_9 = arith.constant dense<0xFF800000> : vector<16x8xf32>
    %16 = vector.multi_reduction <maximumf>, %15, %cst_9 [2] : vector<16x8x8xf32> to vector<16x8xf32>
    %17 = vector.shape_cast %16 : vector<16x8xf32> to vector<16x8x1xf32>
    %18 = vector.broadcast %17 : vector<16x8x1xf32> to vector<16x8x8xf32>
    %19 = arith.subf %15, %18 : vector<16x8x8xf32>
    %20 = math.exp %19 : vector<16x8x8xf32>
    %cst_10 = arith.constant dense<0.000000e+00> : vector<16x8xf32>
    %21 = vector.multi_reduction <add>, %20, %cst_10 [2] : vector<16x8x8xf32> to vector<16x8xf32>
    %22 = vector.shape_cast %21 : vector<16x8xf32> to vector<16x8x1xf32>
    %23 = tpu.reciprocal %22 {approx = true} : vector<16x8x1xf32> -> vector<16x8x1xf32>
    %24 = vector.broadcast %23 : vector<16x8x1xf32> to vector<16x8x8xf32>
    %25 = arith.mulf %20, %24 : vector<16x8x8xf32>
    "tpu.trace_start"() <{level = 10 : i32, message = "bqk,bkd->bqd"}> : () -> ()
    %cst_11 = arith.constant dense<0.000000e+00> : vector<16x8x8xf32>
    %26 = tpu.matmul %25, %14, %cst_11 {dimension_numbers = #tpu.dot_dimension_numbers<[2], [1], [1], [2], [0, 0, 0, 1, 1, 2], [0], [0]>} : vector<16x8x8xf32>, vector<16x8x8xf32>, vector<16x8x8xf32> -> vector<16x8x8xf32>
    "tpu.trace_stop"() : () -> ()
    %27 = vector.shape_cast %26 : vector<16x8x8xf32> to vector<128x8xf32>
    %28 = vector.extract_strided_slice %6 {offsets = [0, 0], sizes = [8, 16], strides = [1, 1]} : vector<16x16xf32> to vector<8x16xf32>
    %cst_12 = arith.constant dense<0.000000e+00> : vector<128x16xf32>
    %29 = tpu.matmul %27, %28, %cst_12 {dimension_numbers = #tpu.dot_dimension_numbers<[1], [0], [0], [1], [0, 0, 1, 1], [], []>} : vector<128x8xf32>, vector<8x16xf32>, vector<128x16xf32> -> vector<128x16xf32>
    %30 = vector.extract_strided_slice %5 {offsets = [0, 8], sizes = [128, 8], strides = [1, 1]} : vector<128x48xf32> to vector<128x8xf32>
    %cst_13 = arith.constant 0.353553385 : f32
    %31 = vector.broadcast %cst_13 : f32 to vector<128x8xf32>
    %32 = arith.mulf %30, %31 : vector<128x8xf32>
    %33 = vector.shape_cast %32 : vector<128x8xf32> to vector<16x8x8xf32>
    %34 = vector.extract_strided_slice %5 {offsets = [0, 24], sizes = [128, 8], strides = [1, 1]} : vector<128x48xf32> to vector<128x8xf32>
    %35 = vector.shape_cast %34 : vector<128x8xf32> to vector<16x8x8xf32>
    %36 = vector.extract_strided_slice %5 {offsets = [0, 40], sizes = [128, 8], strides = [1, 1]} : vector<128x48xf32> to vector<128x8xf32>
    %37 = vector.shape_cast %36 : vector<128x8xf32> to vector<16x8x8xf32>
    "tpu.trace_start"() <{level = 10 : i32, message = "bqd,bkd->bqk"}> : () -> ()
    %cst_14 = arith.constant dense<0.000000e+00> : vector<16x8x8xf32>
    %38 = tpu.matmul %33, %35, %cst_14 {dimension_numbers = #tpu.dot_dimension_numbers<[2], [2], [1], [1], [0, 0, 0, 1, 1, 1], [0], [0]>} : vector<16x8x8xf32>, vector<16x8x8xf32>, vector<16x8x8xf32> -> vector<16x8x8xf32>
    "tpu.trace_stop"() : () -> ()
    %cst_15 = arith.constant dense<0xFF800000> : vector<16x8xf32>
    %39 = vector.multi_reduction <maximumf>, %38, %cst_15 [2] : vector<16x8x8xf32> to vector<16x8xf32>
    %40 = vector.shape_cast %39 : vector<16x8xf32> to vector<16x8x1xf32>
    %41 = vector.broadcast %40 : vector<16x8x1xf32> to vector<16x8x8xf32>
    %42 = arith.subf %38, %41 : vector<16x8x8xf32>
    %43 = math.exp %42 : vector<16x8x8xf32>
    %cst_16 = arith.constant dense<0.000000e+00> : vector<16x8xf32>
    %44 = vector.multi_reduction <add>, %43, %cst_16 [2] : vector<16x8x8xf32> to vector<16x8xf32>
    %45 = vector.shape_cast %44 : vector<16x8xf32> to vector<16x8x1xf32>
    %46 = tpu.reciprocal %45 {approx = true} : vector<16x8x1xf32> -> vector<16x8x1xf32>
    %47 = vector.broadcast %46 : vector<16x8x1xf32> to vector<16x8x8xf32>
    %48 = arith.mulf %43, %47 : vector<16x8x8xf32>
    "tpu.trace_start"() <{level = 10 : i32, message = "bqk,bkd->bqd"}> : () -> ()
    %cst_17 = arith.constant dense<0.000000e+00> : vector<16x8x8xf32>
    %49 = tpu.matmul %48, %37, %cst_17 {dimension_numbers = #tpu.dot_dimension_numbers<[2], [1], [1], [2], [0, 0, 0, 1, 1, 2], [0], [0]>} : vector<16x8x8xf32>, vector<16x8x8xf32>, vector<16x8x8xf32> -> vector<16x8x8xf32>
    "tpu.trace_stop"() : () -> ()
    %50 = vector.shape_cast %49 : vector<16x8x8xf32> to vector<128x8xf32>
    %51 = vector.extract_strided_slice %6 {offsets = [8, 0], sizes = [8, 16], strides = [1, 1]} : vector<16x16xf32> to vector<8x16xf32>
    %cst_18 = arith.constant dense<0.000000e+00> : vector<128x16xf32>
    %52 = tpu.matmul %50, %51, %cst_18 {dimension_numbers = #tpu.dot_dimension_numbers<[1], [0], [0], [1], [0, 0, 1, 1], [], []>} : vector<128x8xf32>, vector<8x16xf32>, vector<128x16xf32> -> vector<128x16xf32>
    %53 = arith.addf %29, %52 : vector<128x16xf32>
    %c0_19 = arith.constant 0 : index
    %c0_20 = arith.constant 0 : index
    %54 = vector.load %arg5[%c0_19, %c0_20] : memref<1x16xf32, #tpu.memory_space<vmem>>, vector<1x16xf32>
    %55 = vector.broadcast %54 : vector<1x16xf32> to vector<128x16xf32>
    %56 = arith.addf %53, %55 : vector<128x16xf32>
    %57 = arith.addf %0, %56 : vector<128x16xf32>
    %cst_21 = arith.constant dense<0.000000e+00> : vector<128xf32>
    %58 = vector.multi_reduction <add>, %57, %cst_21 [1] : vector<128x16xf32> to vector<128xf32>
    %59 = vector.shape_cast %58 : vector<128xf32> to vector<128x1xf32>
    %cst_22 = arith.constant 1.600000e+01 : f32
    %60 = vector.broadcast %cst_22 : f32 to vector<128x1xf32>
    %61 = arith.divf %59, %60 : vector<128x1xf32>
    %62 = vector.broadcast %61 : vector<128x1xf32> to vector<128x16xf32>
    %63 = arith.subf %57, %62 : vector<128x16xf32>
    %64 = arith.mulf %63, %63 : vector<128x16xf32>
    %cst_23 = arith.constant dense<0.000000e+00> : vector<128xf32>
    %65 = vector.multi_reduction <add>, %64, %cst_23 [1] : vector<128x16xf32> to vector<128xf32>
    %66 = vector.shape_cast %65 : vector<128xf32> to vector<128x1xf32>
    %cst_24 = arith.constant 1.600000e+01 : f32
    %67 = vector.broadcast %cst_24 : f32 to vector<128x1xf32>
    %68 = arith.divf %66, %67 : vector<128x1xf32>
    %cst_25 = arith.constant 9.99999974E-6 : f32
    %69 = vector.broadcast %cst_25 : f32 to vector<128x1xf32>
    %70 = arith.addf %68, %69 : vector<128x1xf32>
    %71 = math.rsqrt %70 : vector<128x1xf32>
    %72 = vector.broadcast %71 : vector<128x1xf32> to vector<128x16xf32>
    %73 = arith.mulf %63, %72 : vector<128x16xf32>
    %c0_26 = arith.constant 0 : index
    %c0_27 = arith.constant 0 : index
    %74 = vector.load %arg6[%c0_26, %c0_27] : memref<1x16xf32, #tpu.memory_space<vmem>>, vector<1x16xf32>
    %75 = vector.broadcast %74 : vector<1x16xf32> to vector<128x16xf32>
    %76 = arith.mulf %73, %75 : vector<128x16xf32>
    %c0_28 = arith.constant 0 : index
    %c0_29 = arith.constant 0 : index
    %77 = vector.load %arg7[%c0_28, %c0_29] : memref<1x16xf32, #tpu.memory_space<vmem>>, vector<1x16xf32>
    %78 = vector.broadcast %77 : vector<1x16xf32> to vector<128x16xf32>
    %79 = arith.addf %76, %78 : vector<128x16xf32>
    %c0_30 = arith.constant 0 : index
    %c0_31 = arith.constant 0 : index
    %80 = vector.load %arg8[%c0_30, %c0_31] : memref<16x32xf32, #tpu.memory_space<vmem>>, vector<16x32xf32>
    %cst_32 = arith.constant dense<0.000000e+00> : vector<128x32xf32>
    %81 = tpu.matmul %79, %80, %cst_32 {dimension_numbers = #tpu.dot_dimension_numbers<[1], [0], [0], [1], [0, 0, 1, 1], [], []>} : vector<128x16xf32>, vector<16x32xf32>, vector<128x32xf32> -> vector<128x32xf32>
    %c0_33 = arith.constant 0 : index
    %c0_34 = arith.constant 0 : index
    %82 = vector.load %arg9[%c0_33, %c0_34] : memref<1x32xf32, #tpu.memory_space<vmem>>, vector<1x32xf32>
    %83 = vector.broadcast %82 : vector<1x32xf32> to vector<128x32xf32>
    %84 = arith.addf %81, %83 : vector<128x32xf32>
    %cst_35 = arith.constant 0.000000e+00 : f32
    %85 = vector.broadcast %cst_35 : f32 to vector<128x32xf32>
    %86 = arith.maximumf %84, %85 : vector<128x32xf32>
    %c0_36 = arith.constant 0 : index
    %c0_37 = arith.constant 0 : index
    %87 = vector.load %arg10[%c0_36, %c0_37] : memref<32x16xf32, #tpu.memory_space<vmem>>, vector<32x16xf32>
    %cst_38 = arith.constant dense<0.000000e+00> : vector<128x16xf32>
    %88 = tpu.matmul %86, %87, %cst_38 {dimension_numbers = #tpu.dot_dimension_numbers<[1], [0], [0], [1], [0, 0, 1, 1], [], []>} : vector<128x32xf32>, vector<32x16xf32>, vector<128x16xf32> -> vector<128x16xf32>
    %c0_39 = arith.constant 0 : index
    %c0_40 = arith.constant 0 : index
    %89 = vector.load %arg11[%c0_39, %c0_40] : memref<1x16xf32, #tpu.memory_space<vmem>>, vector<1x16xf32>
    %90 = vector.broadcast %89 : vector<1x16xf32> to vector<128x16xf32>
    %91 = arith.addf %88, %90 : vector<128x16xf32>
    %92 = arith.addf %79, %91 : vector<128x16xf32>
    %cst_41 = arith.constant dense<0.000000e+00> : vector<128xf32>
    %93 = vector.multi_reduction <add>, %92, %cst_41 [1] : vector<128x16xf32> to vector<128xf32>
    %94 = vector.shape_cast %93 : vector<128xf32> to vector<128x1xf32>
    %cst_42 = arith.constant 1.600000e+01 : f32
    %95 = vector.broadcast %cst_42 : f32 to vector<128x1xf32>
    %96 = arith.divf %94, %95 : vector<128x1xf32>
    %97 = vector.broadcast %96 : vector<128x1xf32> to vector<128x16xf32>
    %98 = arith.subf %92, %97 : vector<128x16xf32>
    %99 = arith.mulf %98, %98 : vector<128x16xf32>
    %cst_43 = arith.constant dense<0.000000e+00> : vector<128xf32>
    %100 = vector.multi_reduction <add>, %99, %cst_43 [1] : vector<128x16xf32> to vector<128xf32>
    %101 = vector.shape_cast %100 : vector<128xf32> to vector<128x1xf32>
    %cst_44 = arith.constant 1.600000e+01 : f32
    %102 = vector.broadcast %cst_44 : f32 to vector<128x1xf32>
    %103 = arith.divf %101, %102 : vector<128x1xf32>
    %cst_45 = arith.constant 9.99999974E-6 : f32
    %104 = vector.broadcast %cst_45 : f32 to vector<128x1xf32>
    %105 = arith.addf %103, %104 : vector<128x1xf32>
    %106 = math.rsqrt %105 : vector<128x1xf32>
    %107 = vector.broadcast %106 : vector<128x1xf32> to vector<128x16xf32>
    %108 = arith.mulf %98, %107 : vector<128x16xf32>
    %c0_46 = arith.constant 0 : index
    %c0_47 = arith.constant 0 : index
    %109 = vector.load %arg12[%c0_46, %c0_47] : memref<1x16xf32, #tpu.memory_space<vmem>>, vector<1x16xf32>
    %110 = vector.broadcast %109 : vector<1x16xf32> to vector<128x16xf32>
    %111 = arith.mulf %108, %110 : vector<128x16xf32>
    %c0_48 = arith.constant 0 : index
    %c0_49 = arith.constant 0 : index
    %112 = vector.load %arg13[%c0_48, %c0_49] : memref<1x16xf32, #tpu.memory_space<vmem>>, vector<1x16xf32>
    %113 = vector.broadcast %112 : vector<1x16xf32> to vector<128x16xf32>
    %114 = arith.addf %111, %113 : vector<128x16xf32>
    %c0_50 = arith.constant 0 : index
    %c0_51 = arith.constant 0 : index
    %115 = vector.load %arg14[%c0_50, %c0_51] : memref<128x16xf32, #tpu.memory_space<vmem>>, vector<128x16xf32>
    tpu.vector_store %arg14[%c0_50, %c0_51], %114 {strides = array<i32>} : memref<128x16xf32, #tpu.memory_space<vmem>>, vector<128x16xf32>,
    return
  }
  func.func @transform_0(%arg0: i32) -> (i32, i32) {
    %c0_i32 = arith.constant 0 : i32
    %c0_i32_0 = arith.constant 0 : i32
    return %arg0, %c0_i32 : i32, i32
  }
  func.func @transform_1(%arg0: i32) -> (i32, i32) {
    %c0_i32 = arith.constant 0 : i32
    %c0_i32_0 = arith.constant 0 : i32
    %c0_i32_1 = arith.constant 0 : i32
    return %c0_i32, %c0_i32_0 : i32, i32
  }
  func.func @transform_2(%arg0: i32) -> (i32, i32) {
    %c0_i32 = arith.constant 0 : i32
    %c0_i32_0 = arith.constant 0 : i32
    %c0_i32_1 = arith.constant 0 : i32
    return %c0_i32, %c0_i32_0 : i32, i32
  }
  func.func @transform_3(%arg0: i32) -> (i32, i32) {
    %c0_i32 = arith.constant 0 : i32
    %c0_i32_0 = arith.constant 0 : i32
    %c0_i32_1 = arith.constant 0 : i32
    return %c0_i32, %c0_i32_0 : i32, i32
  }
  func.func @transform_4(%arg0: i32) -> (i32, i32) {
    %c0_i32 = arith.constant 0 : i32
    %c0_i32_0 = arith.constant 0 : i32
    %c0_i32_1 = arith.constant 0 : i32
    return %c0_i32, %c0_i32_0 : i32, i32
  }
  func.func @transform_5(%arg0: i32) -> (i32, i32) {
    %c0_i32 = arith.constant 0 : i32
    %c0_i32_0 = arith.constant 0 : i32
    %c0_i32_1 = arith.constant 0 : i32
    return %c0_i32, %c0_i32_0 : i32, i32
  }
  func.func @transform_6(%arg0: i32) -> (i32, i32) {
    %c0_i32 = arith.constant 0 : i32
    %c0_i32_0 = arith.constant 0 : i32
    %c0_i32_1 = arith.constant 0 : i32
    return %c0_i32, %c0_i32_0 : i32, i32
  }
  func.func @transform_7(%arg0: i32) -> (i32, i32) {
    %c0_i32 = arith.constant 0 : i32
    %c0_i32_0 = arith.constant 0 : i32
    %c0_i32_1 = arith.constant 0 : i32
    return %c0_i32, %c0_i32_0 : i32, i32
  }
  func.func @transform_8(%arg0: i32) -> (i32, i32) {
    %c0_i32 = arith.constant 0 : i32
    %c0_i32_0 = arith.constant 0 : i32
    %c0_i32_1 = arith.constant 0 : i32
    return %c0_i32, %c0_i32_0 : i32, i32
  }
  func.func @transform_9(%arg0: i32) -> (i32, i32) {
    %c0_i32 = arith.constant 0 : i32
    %c0_i32_0 = arith.constant 0 : i32
    %c0_i32_1 = arith.constant 0 : i32
    return %c0_i32, %c0_i32_0 : i32, i32
  }
  func.func @transform_10(%arg0: i32) -> (i32, i32) {
    %c0_i32 = arith.constant 0 : i32
    %c0_i32_0 = arith.constant 0 : i32
    %c0_i32_1 = arith.constant 0 : i32
    return %c0_i32, %c0_i32_0 : i32, i32
  }
  func.func @transform_11(%arg0: i32) -> (i32, i32) {
    %c0_i32 = arith.constant 0 : i32
    %c0_i32_0 = arith.constant 0 : i32
    %c0_i32_1 = arith.constant 0 : i32
    return %c0_i32, %c0_i32_0 : i32, i32
  }
  func.func @transform_12(%arg0: i32) -> (i32, i32) {
    %c0_i32 = arith.constant 0 : i32
    %c0_i32_0 = arith.constant 0 : i32
    %c0_i32_1 = arith.constant 0 : i32
    return %c0_i32, %c0_i32_0 : i32, i32
  }
  func.func @transform_13(%arg0: i32) -> (i32, i32) {
    %c0_i32 = arith.constant 0 : i32
    %c0_i32_0 = arith.constant 0 : i32
    return %arg0, %c0_i32 : i32, i32
  }
}

</mosaic_0001>

<bundles_post_ra>
// kernel: self_attention_forward.1
= control target key start
LH: loop header
LB: loop body
LE: loop exit
PB: predicated region body
PF: predicated region fallthrough
CT: control target
= control target key end

     0   :  { %vm69_vm0 = vcmask 130048   ;;  %v9998_v19 = vmov 0.0   ;;  %vm8065_vm1 = vmmov 0   ;;  %s8066_s27 = smov 112   ;;  %s8068_s28 = smov 104   ;;  %vm284_vm2 = vcmask 64512   ;;  %s9984_s1 = inlined_call_operand.vmem [shape: f32[16,48], index: 1, kind: input, shape index: {}]   ;;  %s9985_s0 = inlined_call_operand.vmem [shape: f32[128,16], index: 0, kind: input, shape index: {}]   ;;  %s9986_s2 = inlined_call_operand.vmem [shape: f32[1,48], index: 2, kind: input, shape index: {}]   ;;  %s9987_s3 = inlined_call_operand.vmem [shape: f32[16,16], index: 3, kind: input, shape index: {}]   ;;  %s9988_s4 = inlined_call_operand.vmem [shape: f32[1,16], index: 4, kind: input, shape index: {}]   ;;  %s9989_s7 = inlined_call_operand.vmem [shape: f32[16,32], index: 7, kind: input, shape index: {}]   ;;  %s9990_s9 = inlined_call_operand.vmem [shape: f32[32,16], index: 9, kind: input, shape index: {}]   ;;  %s9991_s5 = inlined_call_operand.vmem [shape: f32[1,16], index: 5, kind: input, shape index: {}]   ;;  %s9992_s6 = inlined_call_operand.vmem [shape: f32[1,16], index: 6, kind: input, shape index: {}]   ;;  %s9993_s8 = inlined_call_operand.vmem [shape: f32[1,32], index: 8, kind: input, shape index: {}]   ;;  %s9994_s10 = inlined_call_operand.vmem [shape: f32[1,16], index: 10, kind: input, shape index: {}]   ;;  %s9995_s11 = inlined_call_operand.vmem [shape: f32[1,16], index: 11, kind: input, shape index: {}]   ;;  %s9996_s12 = inlined_call_operand.vmem [shape: f32[1,16], index: 12, kind: input, shape index: {}]   ;;  %s9997_s13 = inlined_call_operand.vmem [shape: f32[128,16], index: 13, kind: output, shape index: {}]  }
   0x1   :  { %v60_v0 = vld [vmem:[%s9984_s1] sm:$0xff]  ;;  %v61_v1 = vld [vmem:[%s9984_s1 + $0x8] sm:$0xff]  ;;  %v46_v5 = vld [vmem:[%s9985_s0 + $0x10] sm:$0xff]  ;;  %7385 = vmatprep.subr.mxu1 %v9998_v19  ;;  %7387 = vmatprep.mubr.msk.f32.mxu1 %vm8065_vm1, %v9998_v19  ;;  %s8069_s29 = smov 120   ;;  %s8070_s30 = smov 88   ;;  %vm6471_vm3 = vcmask 261120  }
   0x2   :  { %v44_v2 = vld [vmem:[%s9985_s0] sm:$0xff]  ;;  %v7817_v3 = vpack.c.bf16 %v61_v1, %v60_v0  ;;  %v45_v4 = vld [vmem:[%s9985_s0 + $0x8] sm:$0xff]  ;;  %v47_v6 = vld [vmem:[%s9985_s0 + $0x18] sm:$0xff] }
   0x3   :  { %7361 = vmatprep.mubr.msk.f32.mxu0 %vm69_vm0, %v44_v2  ;;  %v48_v7 = vld [vmem:[%s9985_s0 + $0x20] sm:$0xff]  ;;  %v49_v8 = vld [vmem:[%s9985_s0 + $0x28] sm:$0xff]  ;;  %v50_v9 = vld [vmem:[%s9985_s0 + $0x30] sm:$0xff] }
   0x4   :  { %7818 = vmatprep.subr.bf16.mxu0 %v7817_v3  ;;  %v51_v10 = vld [vmem:[%s9985_s0 + $0x38] sm:$0xff]  ;;  %v52_v11 = vld [vmem:[%s9985_s0 + $0x40] sm:$0xff]  ;;  %v53_v12 = vld [vmem:[%s9985_s0 + $0x48] sm:$0xff] }
   0x5   :  { %7820 = vmatpush3.bf16.msra.mxu0 %v7817_v3  ;;  %v54_v13 = vld [vmem:[%s9985_s0 + $0x50] sm:$0xff]  ;;  %v55_v14 = vld [vmem:[%s9985_s0 + $0x58] sm:$0xff]  ;;  %v56_v15 = vld [vmem:[%s9985_s0 + $0x60] sm:$0xff] }
   0x6   :  { %v57_v16 = vld [vmem:[%s9985_s0 + $0x68] sm:$0xff]  ;;  %v58_v17 = vld [vmem:[%s9985_s0 + $0x70] sm:$0xff]  ;;  %v59_v18 = vld [vmem:[%s9985_s0 + $0x78] sm:$0xff]  ;;  %7425 = vmatprep.subr.mxu0 %v9998_v19 }
   0x7   :  { %v6955_v20 = vld [vmem:[%s9986_s2] ss:$0 sm:$0xff]  ;;  %s8067_s2 = smov 96  }
   0x8   :  { %7362 = vmatmul.mubr.msk.f32.vlgmr.msra.gmra.mrb[0].mxu0 %vm69_vm0, %v45_v4 }
   0x9   :  { %7364 = vmatprep.mubr.msk.f32.mxu0 %vm69_vm0, %v46_v5 }
   0xc   :  { %7365 = vmatmul.mubr.msk.f32.gmra.mrb[2].mxu0 %vm69_vm0, %v47_v6 }
   0xd   :  { %7367 = vmatprep.mubr.msk.f32.mxu0 %vm69_vm0, %v48_v7 }
  0x10   :  { %7368 = vmatmul.mubr.msk.f32.gmra.mrb[4].mxu0 %vm69_vm0, %v49_v8 }
  0x11   :  { %7370 = vmatprep.mubr.msk.f32.mxu0 %vm69_vm0, %v50_v9 }
  0x14   :  { %7371 = vmatmul.mubr.msk.f32.gmra.mrb[6].mxu0 %vm69_vm0, %v51_v10 }
  0x15   :  { %7373 = vmatprep.mubr.msk.f32.mxu0 %vm69_vm0, %v52_v11 }
  0x18   :  { %7374 = vmatmul.mubr.msk.f32.gmra.mrb[8].mxu0 %vm69_vm0, %v53_v12 }
  0x19   :  { %7376 = vmatprep.mubr.msk.f32.mxu0 %vm69_vm0, %v54_v13 }
  0x1c   :  { %7377 = vmatmul.mubr.msk.f32.gmra.mrb[10].mxu0 %vm69_vm0, %v55_v14 }
  0x1d   :  { %7379 = vmatprep.mubr.msk.f32.mxu0 %vm69_vm0, %v56_v15 }
  0x20   :  { %7380 = vmatmul.mubr.msk.f32.gmra.mrb[12].mxu0 %vm69_vm0, %v57_v16 }
  0x21   :  { %7382 = vmatprep.mubr.msk.f32.mxu0 %vm69_vm0, %v58_v17 }
  0x24   :  { %7383 = vmatmul.mubr.msk.f32.gmra.mrb[14].mxu0 %vm69_vm0, %v59_v18 }
  0x25   :  { %7427 = vmatprep.mubr.msk.f32.mxu0 %vm8065_vm1, %v9998_v19 }
  0xdb   :  { %v7363_v21 = vpop.f32.mrb[0].mxu0 }
  0xdc   :  { %v184_v22 = vpop.f32.mrb[1].mxu0  ;;  %v8224_v26 = vadd.f32 %v7363_v21, %v6955_v20 }
  0xdd   :  { %v8220_v23 = vadd.f32 %v6955_v20, %v184_v22 }
  0xde   :  { %v266_v55 = vmul.f32 0.35355338, %v8224_v26 }
  0xdf   :  { %v7366_v24 = vpop.f32.mrb[2].mxu0  ;;  %282 = vrot.lane.b32.xlu0 %v8220_v23, %s8066_s27  ;;  %v265_v53 = vmul.f32 0.35355338, %v8220_v23 }
  0xe0   :  { %v194_v25 = vpop.f32.mrb[3].mxu0  ;;  %v8228_v28 = vadd.f32 %v7366_v24, %v6955_v20 }
  0xe1   :  { %v8226_v27 = vadd.f32 %v6955_v20, %v194_v25 }
  0xe2   :  { %v268_v57 = vmul.f32 0.35355338, %v8228_v28 }
  0xe3   :  { %v7369_v29 = vpop.f32.mrb[4].mxu0  ;;  %439 = vrot.lane.b32.xlu1 %v8226_v27, %s8066_s27  ;;  %361 = vrot.lane.b32.xlu0 %v8224_v26, %s8066_s27  ;;  %v267_v54 = vmul.f32 0.35355338, %v8226_v27 }
  0xe4   :  { %v204_v30 = vpop.f32.mrb[5].mxu0  ;;  %v8236_v32 = vadd.f32 %v7369_v29, %v6955_v20 }
  0xe5   :  { %v8234_v31 = vadd.f32 %v6955_v20, %v204_v30 }
  0xe6   :  { %v8378_v7 = vmul.f32 0.35355338, %v8236_v32 }
  0xe7   :  { %v7372_v33 = vpop.f32.mrb[6].mxu0  ;;  %517 = vrot.lane.b32.xlu1 %v8228_v28, %s8066_s27  ;;  %595 = vrot.lane.b32.xlu0 %v8234_v31, %s8066_s27  ;;  %v269_v56 = vmul.f32 0.35355338, %v8234_v31 }
  0xe8   :  { %v214_v34 = vpop.f32.mrb[7].mxu0  ;;  %v8244_v36 = vadd.f32 %v7372_v33, %v6955_v20 }
  0xe9   :  { %v8242_v35 = vadd.f32 %v6955_v20, %v214_v34 }
  0xea   :  { %v8414_v15 = vmul.f32 0.35355338, %v8244_v36 }
  0xeb   :  { %v7375_v37 = vpop.f32.mrb[8].mxu0  ;;  %673 = vrot.lane.b32.xlu1 %v8236_v32, %s8066_s27  ;;  %751 = vrot.lane.b32.xlu0 %v8242_v35, %s8066_s27  ;;  %v8396_v11 = vmul.f32 0.35355338, %v8242_v35 }
  0xec   :  { %v224_v38 = vpop.f32.mrb[9].mxu0  ;;  %v8252_v40 = vadd.f32 %v7375_v37, %v6955_v20 }
  0xed   :  { %v8250_v39 = vadd.f32 %v6955_v20, %v224_v38 }
  0xee   :  { %v8426_v17 = vmul.f32 0.35355338, %v8252_v40 }
  0xef   :  { %v7378_v41 = vpop.f32.mrb[10].mxu0  ;;  %829 = vrot.lane.b32.xlu1 %v8244_v36, %s8066_s27  ;;  %907 = vrot.lane.b32.xlu0 %v8250_v39, %s8066_s27  ;;  %v8359_v3 = vmul.f32 0.35355338, %v8250_v39 }
  0xf0   :  { %v234_v42 = vpop.f32.mrb[11].mxu0  ;;  %v8260_v44 = vadd.f32 %v7378_v41, %v6955_v20 }
  0xf1   :  { %v8258_v43 = vadd.f32 %v6955_v20, %v234_v42 }
  0xf3   :  { %v7381_v45 = vpop.f32.mrb[12].mxu0  ;;  %985 = vrot.lane.b32.xlu1 %v8252_v40, %s8066_s27  ;;  %1063 = vrot.lane.b32.xlu0 %v8258_v43, %s8066_s27  ;;  %v8375_v6 = vmul.f32 0.35355338, %v8258_v43 }
  0xf4   :  { %v244_v46 = vpop.f32.mrb[13].mxu0  ;;  %v8268_v48 = vadd.f32 %v7381_v45, %v6955_v20 }
  0xf5   :  { %v8266_v47 = vadd.f32 %v6955_v20, %v244_v46 }
  0xf6   :  { %v8447_v21 = vmul.f32 0.35355338, %v8268_v48 }
  0xf7   :  { %v7384_v49 = vpop.f32.mrb[14].mxu0  ;;  %1141 = vrot.lane.b32.xlu1 %v8260_v44, %s8066_s27  ;;  %1219 = vrot.lane.b32.xlu0 %v8266_v47, %s8066_s27  ;;  %v8393_v10 = vmul.f32 0.35355338, %v8266_v47 }
  0xf8   :  { %v254_v50 = vpop.f32.mrb[15].mxu0  ;;  %v8276_v52 = vadd.f32 %v7384_v49, %v6955_v20 }
  0xf9   :  { %v8274_v51 = vadd.f32 %v6955_v20, %v254_v50  ;;  %v8437_v20 = vmul.f32 0.35355338, %v8260_v44 }
  0xfa   :  { %v8456_v22 = vmul.f32 0.35355338, %v8276_v52 }
  0xfb   :  { %1297 = vrot.lane.b32.xlu1 %v8268_v48, %s8066_s27  ;;  %1375 = vrot.lane.b32.xlu0 %v8274_v51, %s8066_s27  ;;  %v8411_v14 = vmul.f32 0.35355338, %v8274_v51 }
  0xff   :  { %1453 = vrot.lane.b32.xlu1 %v8276_v52, %s8066_s27  ;;  %1782 = vrot.lane.b32.xlu0 %v8224_v26, %s8067_s2 }
 0x103   :  { %1706 = vrot.lane.b32.xlu1 %v8220_v23, %s8067_s2  ;;  %1858 = vrot.lane.b32.xlu0 %v8226_v27, %s8067_s2 }
 0x107   :  { %1934 = vrot.lane.b32.xlu1 %v8228_v28, %s8067_s2  ;;  %2010 = vrot.lane.b32.xlu0 %v8234_v31, %s8067_s2 }
 0x10b   :  { %2086 = vrot.lane.b32.xlu1 %v8236_v32, %s8067_s2  ;;  %2314 = vrot.lane.b32.xlu0 %v8250_v39, %s8067_s2 }
 0x10f   :  { %2162 = vrot.lane.b32.xlu1 %v8242_v35, %s8067_s2  ;;  %2466 = vrot.lane.b32.xlu0 %v8258_v43, %s8067_s2 }
 0x113   :  { %2238 = vrot.lane.b32.xlu1 %v8244_v36, %s8067_s2  ;;  %2618 = vrot.lane.b32.xlu0 %v8266_v47, %s8067_s2 }
 0x117   :  { %2390 = vrot.lane.b32.xlu1 %v8252_v40, %s8067_s2  ;;  %2924 = vrot.lane.b32.xlu0 %v8220_v23, %s8068_s28 }
 0x11b   :  { %2542 = vrot.lane.b32.xlu1 %v8260_v44, %s8067_s2  ;;  %2922 = vrot.lane.b32.xlu0 %v265_v53, %s8069_s29 }
 0x11f   :  { %2694 = vrot.lane.b32.xlu1 %v8268_v48, %s8067_s2  ;;  %3080 = vrot.lane.b32.xlu0 %v8226_v27, %s8068_s28 }
 0x123   :  { %2846 = vrot.lane.b32.xlu1 %v8276_v52, %s8067_s2  ;;  %3078 = vrot.lane.b32.xlu0 %v267_v54, %s8069_s29 }
 0x127   :  { %3002 = vrot.lane.b32.xlu1 %v8224_v26, %s8068_s28  ;;  %3236 = vrot.lane.b32.xlu0 %v8234_v31, %s8068_s28 }
 0x12b   :  { %3000 = vrot.lane.b32.xlu1 %v266_v55, %s8069_s29  ;;  %3234 = vrot.lane.b32.xlu0 %v269_v56, %s8069_s29 }
 0x12f   :  { %3158 = vrot.lane.b32.xlu1 %v8228_v28, %s8068_s28  ;;  %2770 = vrot.lane.b32.xlu0 %v8274_v51, %s8067_s2 }
 0x133   :  { %3156 = vrot.lane.b32.xlu1 %v268_v57, %s8069_s29 }
 0x137   :  { %3314 = vrot.lane.b32.xlu1 %v8236_v32, %s8068_s28 }
 0x151   :  { %v283_v58 = vpop.permute.xlu0 %282 }
 0x152   :  { %7386 = vmatpush3.xpose.msk.msra.mxu1 %vm284_vm2, %v283_v58 }
 0x153   :  { %7390 = vmatprep.subr.mxu1 %v9998_v19 }
 0x155   :  { %v440_v59 = vpop.permute.xlu1 %439  ;;  %v362_v60 = vpop.permute.xlu0 %361  ;;  %7388 = vmatmul.mubr.msk.f32.vlgmr.msra.gmra.mrb[0].mxu1 %vm284_vm2, %v265_v53 }
 0x156   :  { %7391 = vmatpush3.xpose.msk.msra.mxu1 %vm284_vm2, %v362_v60  ;;  %7392 = vmatprep.mubr.msk.f32.mxu1 %vm8065_vm1, %v9998_v19 }
 0x157   :  { %7395 = vmatprep.subr.mxu1 %v9998_v19 }
 0x159   :  { %v518_v61 = vpop.permute.xlu1 %517  ;;  %v596_v62 = vpop.permute.xlu0 %595  ;;  %7393 = vmatmul.mubr.msk.f32.vlgmr.msra.gmra.mrb[2].mxu1 %vm284_vm2, %v266_v55 }
 0x15a   :  { %7396 = vmatpush3.xpose.msk.msra.mxu1 %vm284_vm2, %v440_v59  ;;  %7397 = vmatprep.mubr.msk.f32.mxu1 %vm8065_vm1, %v9998_v19 }
 0x15b   :  { %7400 = vmatprep.subr.mxu1 %v9998_v19 }
 0x15d   :  { %v674_v63 = vpop.permute.xlu1 %673  ;;  %v752_v0 = vpop.permute.xlu0 %751  ;;  %7398 = vmatmul.mubr.msk.f32.vlgmr.msra.gmra.mrb[4].mxu1 %vm284_vm2, %v267_v54 }
 0x15e   :  { %7401 = vmatpush3.xpose.msk.msra.mxu1 %vm284_vm2, %v518_v61  ;;  %7402 = vmatprep.mubr.msk.f32.mxu1 %vm8065_vm1, %v9998_v19 }
 0x15f   :  { %7405 = vmatprep.subr.mxu1 %v9998_v19 }
 0x161   :  { %v830_v1 = vpop.permute.xlu1 %829  ;;  %v908_v2 = vpop.permute.xlu0 %907  ;;  %7403 = vmatmul.mubr.msk.f32.vlgmr.msra.gmra.mrb[6].mxu1 %vm284_vm2, %v268_v57 }
 0x162   :  { %7406 = vmatpush3.xpose.msk.msra.mxu1 %vm284_vm2, %v596_v62  ;;  %7426 = vmatpush3.xpose.msk.msra.mxu0 %vm284_vm2, %v908_v2 }
 0x163   :  { %7407 = vmatprep.mubr.msk.f32.mxu1 %vm8065_vm1, %v9998_v19  ;;  %7435 = vmatprep.subr.mxu0 %v9998_v19 }
 0x164   :  { %7410 = vmatprep.subr.mxu1 %v9998_v19 }
 0x165   :  { %v986_v4 = vpop.permute.xlu1 %985  ;;  %7428 = vmatmul.mubr.msk.f32.vlgmr.msra.gmra.mrb[16].mxu0 %vm284_vm2, %v8359_v3  ;;  %v1064_v5 = vpop.permute.xlu0 %1063  ;;  %7408 = vmatmul.mubr.msk.f32.vlgmr.msra.gmra.mrb[8].mxu1 %vm284_vm2, %v269_v56 }
 0x166   :  { %7411 = vmatpush3.xpose.msk.msra.mxu1 %vm284_vm2, %v674_v63  ;;  %7436 = vmatpush3.xpose.msk.msra.mxu0 %vm284_vm2, %v1064_v5 }
 0x167   :  { %7412 = vmatprep.mubr.msk.f32.mxu1 %vm8065_vm1, %v9998_v19  ;;  %7437 = vmatprep.mubr.msk.f32.mxu0 %vm8065_vm1, %v9998_v19 }
 0x168   :  { %7445 = vmatprep.subr.mxu0 %v9998_v19  ;;  %7415 = vmatprep.subr.mxu1 %v9998_v19 }
 0x169   :  { %v1142_v8 = vpop.permute.xlu1 %1141  ;;  %7438 = vmatmul.mubr.msk.f32.vlgmr.msra.gmra.mrb[18].mxu0 %vm284_vm2, %v8375_v6  ;;  %v1220_v9 = vpop.permute.xlu0 %1219  ;;  %7413 = vmatmul.mubr.msk.f32.vlgmr.msra.gmra.mrb[10].mxu1 %vm284_vm2, %v8378_v7 }
 0x16a   :  { %7416 = vmatpush3.xpose.msk.msra.mxu1 %vm284_vm2, %v752_v0  ;;  %7446 = vmatpush3.xpose.msk.msra.mxu0 %vm284_vm2, %v1220_v9 }
 0x16b   :  { %7417 = vmatprep.mubr.msk.f32.mxu1 %vm8065_vm1, %v9998_v19  ;;  %7447 = vmatprep.mubr.msk.f32.mxu0 %vm8065_vm1, %v9998_v19 }
 0x16c   :  { %7455 = vmatprep.subr.mxu0 %v9998_v19  ;;  %7420 = vmatprep.subr.mxu1 %v9998_v19 }
 0x16d   :  { %v1298_v12 = vpop.permute.xlu1 %1297  ;;  %7448 = vmatmul.mubr.msk.f32.vlgmr.msra.gmra.mrb[20].mxu0 %vm284_vm2, %v8393_v10  ;;  %v1376_v13 = vpop.permute.xlu0 %1375  ;;  %7418 = vmatmul.mubr.msk.f32.vlgmr.msra.gmra.mrb[12].mxu1 %vm284_vm2, %v8396_v11 }
 0x16e   :  { %7421 = vmatpush3.xpose.msk.msra.mxu1 %vm284_vm2, %v830_v1  ;;  %7456 = vmatpush3.xpose.msk.msra.mxu0 %vm284_vm2, %v1376_v13 }
 0x16f   :  { %7422 = vmatprep.mubr.msk.f32.mxu1 %vm8065_vm1, %v9998_v19  ;;  %7457 = vmatprep.mubr.msk.f32.mxu0 %vm8065_vm1, %v9998_v19 }
 0x170   :  { %7430 = vmatprep.subr.mxu1 %v9998_v19  ;;  %7465 = vmatprep.subr.mxu0 %v9998_v19 }
 0x171   :  { %v1454_v16 = vpop.permute.xlu1 %1453  ;;  %7458 = vmatmul.mubr.msk.f32.vlgmr.msra.gmra.mrb[22].mxu0 %vm284_vm2, %v8411_v14  ;;  %7423 = vmatmul.mubr.msk.f32.vlgmr.msra.gmra.mrb[14].mxu1 %vm284_vm2, %v8414_v15  ;;  %v1783_v24 = vpop.permute.xlu0 %1782 }
 0x172   :  { %7431 = vmatpush3.xpose.msk.msra.mxu1 %vm284_vm2, %v986_v4  ;;  %7432 = vmatprep.mubr.msk.f32.mxu1 %vm8065_vm1, %v9998_v19 }
 0x173   :  { %7440 = vmatprep.subr.mxu1 %v9998_v19  ;;  %7467 = vmatprep.mubr.msk.f32.mxu0 %vm8065_vm1, %v9998_v19 }
 0x175   :  { %v1707_v18 = vpop.permute.xlu1 %1706  ;;  %7433 = vmatmul.mubr.msk.f32.vlgmr.msra.gmra.mrb[16].mxu1 %vm284_vm2, %v8426_v17 }
 0x176   :  { %7441 = vmatpush3.xpose.msk.msra.mxu1 %vm284_vm2, %v1142_v8  ;;  %7466 = vmatpush3.msra.mxu0 %v1707_v18 }
 0x177   :  { %7442 = vmatprep.mubr.msk.f32.mxu1 %vm8065_vm1, %v9998_v19  ;;  %7450 = vmatprep.subr.mxu1 %v9998_v19 }
 0x178   :  { %7475 = vmatprep.subr.mxu0 %v9998_v19 }
 0x179   :  { %7443 = vmatmul.mubr.msk.f32.vlgmr.msra.gmra.mrb[18].mxu1 %vm284_vm2, %v8437_v20 }
 0x17a   :  { %7451 = vmatpush3.xpose.msk.msra.mxu1 %vm284_vm2, %v1298_v12  ;;  %7452 = vmatprep.mubr.msk.f32.mxu1 %vm8065_vm1, %v9998_v19 }
 0x17b   :  { %7460 = vmatprep.subr.mxu1 %v9998_v19 }
 0x17d   :  { %7453 = vmatmul.mubr.msk.f32.vlgmr.msra.gmra.mrb[20].mxu1 %vm284_vm2, %v8447_v21 }
 0x17e   :  { %7461 = vmatpush3.xpose.msk.msra.mxu1 %vm284_vm2, %v1454_v16  ;;  %7462 = vmatprep.mubr.msk.f32.mxu1 %vm8065_vm1, %v9998_v19 }
 0x17f   :  { %7470 = vmatprep.subr.mxu1 %v9998_v19 }
 0x181   :  { %7463 = vmatmul.mubr.msk.f32.vlgmr.msra.gmra.mrb[22].mxu1 %vm284_vm2, %v8456_v22 }
 0x182   :  { %7471 = vmatpush3.msra.mxu1 %v1783_v24  ;;  %7472 = vmatprep.mubr.msk.f32.mxu1 %vm8065_vm1, %v9998_v19 }
 0x183   :  { %7480 = vmatprep.subr.mxu1 %v9998_v19 }
 0x228   :  { %v8464_v25 = vpop.f32.mrb[0].mxu1 }
 0x229   :  { %v7389_v29 = vpop.f32.mrb[1].mxu1  ;;  %v1530_v30 = vsel %vm284_vm2, %v8464_v25, -inf }
 0x22a   :  { %1531 = vmax.xlane.f32.xlu0 %v1530_v30 }
 0x22c   :  { %v8468_v33 = vpop.f32.mrb[2].mxu1 }
 0x22d   :  { %v7394_v34 = vpop.f32.mrb[3].mxu1  ;;  %v1533_v37 = vsel %vm284_vm2, %v8468_v33, -inf }
 0x22e   :  { %1534 = vmax.xlane.f32.xlu1 %v1533_v37 }
 0x230   :  { %v8472_v38 = vpop.f32.mrb[4].mxu1 }
 0x231   :  { %v7399_v41 = vpop.f32.mrb[5].mxu1  ;;  %v1536_v42 = vsel %vm284_vm2, %v8472_v38, -inf }
 0x232   :  { %1537 = vmax.xlane.f32.xlu0 %v1536_v42 }
 0x234   :  { %v8476_v45 = vpop.f32.mrb[6].mxu1 }
 0x235   :  { %v7404_v46 = vpop.f32.mrb[7].mxu1  ;;  %v1539_v49 = vsel %vm284_vm2, %v8476_v45, -inf }
 0x236   :  { %1540 = vmax.xlane.f32.xlu0 %v1539_v49 }
 0x238   :  { %v8480_v50 = vpop.f32.mrb[8].mxu1  ;;  %v8482_v53 = vpop.f32.mrb[16].mxu0 }
 0x239   :  { %v7409_v54 = vpop.f32.mrb[9].mxu1  ;;  %v7429_v55 = vpop.f32.mrb[17].mxu0  ;;  %v1542_v56 = vsel %vm284_vm2, %v8480_v50, -inf  ;;  %v1554_v61 = vsel %vm284_vm2, %v8482_v53, -inf }
 0x23a   :  { %1543 = vmax.xlane.f32.xlu1 %v1542_v56 }
 0x23c   :  { %v8486_v57 = vpop.f32.mrb[10].mxu1  ;;  %v8488_v58 = vpop.f32.mrb[18].mxu0 }
 0x23d   :  { %v7414_v59 = vpop.f32.mrb[11].mxu1  ;;  %v7439_v60 = vpop.f32.mrb[19].mxu0  ;;  %v1545_v62 = vsel %vm284_vm2, %v8486_v57, -inf  ;;  %v1560_v4 = vsel %vm284_vm2, %v8488_v58, -inf }
 0x23e   :  { %1555 = vmax.xlane.f32.xlu1 %v1554_v61  ;;  %1546 = vmax.xlane.f32.xlu0 %v1545_v62  ;;  %v8530_v59 = vpop.permute.xlu1 %1934  ;;  %v8532_v60 = vpop.permute.xlu0 %1858 }
 0x240   :  { %v8494_v63 = vpop.f32.mrb[12].mxu1  ;;  %v8496_v0 = vpop.f32.mrb[20].mxu0 }
 0x241   :  { %v7419_v1 = vpop.f32.mrb[13].mxu1  ;;  %v7449_v2 = vpop.f32.mrb[21].mxu0  ;;  %v1548_v13 = vsel %vm284_vm2, %v8494_v63, -inf  ;;  %v1566_v29 = vsel %vm284_vm2, %v8496_v0, -inf }
 0x242   :  { %1561 = vmax.xlane.f32.xlu1 %v1560_v4  ;;  %v8534_v61 = vpop.permute.xlu1 %2086  ;;  %v8536_v62 = vpop.permute.xlu0 %2010 }
 0x244   :  { %v8500_v5 = vpop.f32.mrb[14].mxu1  ;;  %v8502_v8 = vpop.f32.mrb[22].mxu0 }
 0x245   :  { %v7424_v9 = vpop.f32.mrb[15].mxu1  ;;  %v7459_v12 = vpop.f32.mrb[23].mxu0  ;;  %v1551_v16 = vsel %vm284_vm2, %v8500_v5, -inf  ;;  %v1572_v2 = vsel %vm284_vm2, %v8502_v8, -inf }
 0x246   :  { %1549 = vmax.xlane.f32.xlu1 %v1548_v13  ;;  %1552 = vmax.xlane.f32.xlu0 %v1551_v16  ;;  %v8538_v1 = vpop.permute.xlu1 %2162  ;;  %v8542_v4 = vpop.permute.xlu0 %2314 }
 0x248   :  { %v8508_v18 = vpop.f32.mrb[16].mxu1 }
 0x249   :  { %v7434_v24 = vpop.f32.mrb[17].mxu1  ;;  %v1557_v30 = vsel %vm284_vm2, %v8508_v18, -inf }
 0x24a   :  { %1567 = vmax.xlane.f32.xlu1 %v1566_v29  ;;  %1558 = vmax.xlane.f32.xlu0 %v1557_v30  ;;  %v8546_v9 = vpop.permute.xlu0 %2466 }
 0x24b   :  { %10000 = vst [vmem:[#allocation2_spill] sm:$0xff] %v8546_v9 }
 0x24c   :  { %v8514_v34 = vpop.f32.mrb[18].mxu1 }
 0x24d   :  { %v7444_v37 = vpop.f32.mrb[19].mxu1  ;;  %v1563_v41 = vsel %vm284_vm2, %v8514_v34, -inf }
 0x24e   :  { %1564 = vmax.xlane.f32.xlu0 %v1563_v41  ;;  %v8550_v13 = vpop.permute.xlu0 %2618 }
 0x24f   :  { %10001 = vst [vmem:[#allocation3_spill] sm:$0xff] %v8550_v13 }
 0x250   :  { %v8518_v42 = vpop.f32.mrb[20].mxu1 }
 0x251   :  { %v7454_v46 = vpop.f32.mrb[21].mxu1  ;;  %v1569_v49 = vsel %vm284_vm2, %v8518_v42, -inf }
 0x252   :  { %1570 = vmax.xlane.f32.xlu0 %v1569_v49  ;;  %v8554_v24 = vpop.permute.xlu0 %2924 }
 0x253   :  { %10003 = vst [vmem:[#allocation5_spill] sm:$0xff] %v8554_v24 }
 0x254   :  { %v8522_v54 = vpop.f32.mrb[22].mxu1 }
 0x255   :  { %v7464_v55 = vpop.f32.mrb[23].mxu1  ;;  %v1575_v56 = vsel %vm284_vm2, %v8522_v54, -inf }
 0x256   :  { %1576 = vmax.xlane.f32.xlu0 %v1575_v56  ;;  %v8558_v30 = vpop.permute.xlu0 %2922 }
 0x257   :  { %10005 = vst [vmem:[#allocation7_spill] sm:$0xff] %v8558_v30 }
 0x25a   :  { %v8562_v41 = vpop.permute.xlu0 %3080 }
 0x25b   :  { %3312 = vrot.lane.b32.xlu1 %v8378_v7, %s8069_s29  ;;  %v8544_v7 = vpop.permute.xlu1 %2238  ;;  %10007 = vst [vmem:[#allocation9_spill] sm:$0xff] %v8562_v41 }
 0x25e   :  { %v8566_v49 = vpop.permute.xlu0 %3078 }
 0x25f   :  { %v8548_v12 = vpop.permute.xlu1 %2390  ;;  %10009 = vst [vmem:[#allocation11_spill] sm:$0xff] %v8566_v49 }
 0x262   :  { %v8570_v56 = vpop.permute.xlu0 %3236 }
 0x263   :  { %v8552_v16 = vpop.permute.xlu1 %2542  ;;  %10011 = vst [vmem:[#allocation13_spill] sm:$0xff] %v8570_v56 }
 0x264   :  { %10002 = vst [vmem:[#allocation4_spill] sm:$0xff] %v8552_v16 }
 0x266   :  { %v8574_v19 = vpop.permute.xlu0 %3234 }
 0x267   :  { %v8556_v29 = vpop.permute.xlu1 %2694  ;;  %10013 = vst [vmem:[#allocation15_spill] sm:$0xff] %v8574_v19 }
 0x268   :  { %10004 = vst [vmem:[#allocation6_spill] sm:$0xff] %v8556_v29 }
 0x26a   :  { %v8578_v29 = vpop.permute.xlu0 %2770 }
 0x26b   :  { %v8560_v37 = vpop.permute.xlu1 %2846  ;;  %10015 = vst [vmem:[#allocation17_spill] sm:$0xff] %v8578_v29 }
 0x26c   :  { %3392 = vrot.lane.b32.xlu0 %v8242_v35, %s8068_s28  ;;  %10006 = vst [vmem:[#allocation8_spill] sm:$0xff] %v8560_v37 }
 0x26f   :  { %v8564_v46 = vpop.permute.xlu1 %3002 }
 0x270   :  { %10008 = vst [vmem:[#allocation10_spill] sm:$0xff] %v8564_v46 }
 0x273   :  { %v8568_v55 = vpop.permute.xlu1 %3000 }
 0x274   :  { %10010 = vst [vmem:[#allocation12_spill] sm:$0xff] %v8568_v55 }
 0x27f   :  { %1573 = vmax.xlane.f32.xlu1 %v1572_v2  ;;  %v8572_v2 = vpop.permute.xlu1 %3158 }
 0x280   :  { %10012 = vst [vmem:[#allocation14_spill] sm:$0xff] %v8572_v2 }
 0x283   :  { %v8576_v24 = vpop.permute.xlu1 %3156 }
 0x284   :  { %10014 = vst [vmem:[#allocation16_spill] sm:$0xff] %v8576_v24 }
 0x287   :  { %v8580_v30 = vpop.permute.xlu1 %3314 }
 0x288   :  { %10016 = vst [vmem:[#allocation18_spill] sm:$0xff] %v8580_v30 }
 0x2b7   :  { %v1532_v37 = vpop.xlane.xlu0 %1531 }
 0x2b8   :  { %v1578_v41 = vsub.f32 %v8464_v25, %v1532_v37 }
 0x2ba   :  { %v1594_v46 = vmul.f32 1.442695, %v1578_v41 }
 0x2bb   :  { %v1535_v13 = vpop.xlane.xlu1 %1534 }
 0x2bc   :  { %7856 = vpow2.f32 %v1594_v46  ;;  %v1579_v55 = vsub.f32 %v8468_v33, %v1535_v13 }
 0x2be   :  { %v1596_v49 = vmul.f32 1.442695, %v1579_v55 }
 0x2bf   :  { %v1538_v56 = vpop.xlane.xlu0 %1537 }
 0x2c0   :  { %7858 = vpow2.f32 %v1596_v49  ;;  %v1580_v2 = vsub.f32 %v8472_v38, %v1538_v56 }
 0x2c2   :  { %v1598_v19 = vmul.f32 1.442695, %v1580_v2 }
 0x2c3   :  { %v1541_v16 = vpop.xlane.xlu0 %1540 }
 0x2c4   :  { %7860 = vpow2.f32 %v1598_v19  ;;  %v1581_v24 = vsub.f32 %v8476_v45, %v1541_v16 }
 0x2c6   :  { %v8586_v29 = vpop.eup %7856  ;;  %v1600_v30 = vmul.f32 1.442695, %v1581_v24 }
 0x2c7   :  { %v1544_v9 = vpop.xlane.xlu1 %1543  ;;  %v1626_v25 = vsel %vm284_vm2, %v8586_v29, 0.0 }
 0x2c8   :  { %7862 = vpow2.f32 %v1600_v30  ;;  %v1582_v33 = vsub.f32 %v8480_v50, %v1544_v9  ;;  %1627 = vadd.xlane.f32.xlu1 %v1626_v25 }
 0x2ca   :  { %v8591_v13 = vpop.eup %7858  ;;  %v1602_v37 = vmul.f32 1.442695, %v1582_v33 }
 0x2cb   :  { %v1556_v38 = vpop.xlane.xlu1 %1555  ;;  %v1547_v41 = vpop.xlane.xlu0 %1546  ;;  %v1629_v19 = vsel %vm284_vm2, %v8591_v13, 0.0 }
 0x2cc   :  { %7864 = vpow2.f32 %v1602_v37  ;;  %v1586_v45 = vsub.f32 %v8482_v53, %v1556_v38  ;;  %v1583_v16 = vsub.f32 %v8486_v57, %v1547_v41  ;;  %1630 = vadd.xlane.f32.xlu0 %v1629_v19 }
 0x2ce   :  { %v8597_v24 = vpop.eup %7860  ;;  %v1610_v30 = vmul.f32 1.442695, %v1586_v45  ;;  %v1604_v46 = vmul.f32 1.442695, %v1583_v16 }
 0x2cf   :  { %v1562_v50 = vpop.xlane.xlu1 %1561  ;;  %v1632_v9 = vsel %vm284_vm2, %v8597_v24, 0.0 }
 0x2d0   :  { %7866 = vpow2.f32 %v1610_v30  ;;  %v1588_v49 = vsub.f32 %v8488_v58, %v1562_v50  ;;  %1633 = vadd.xlane.f32.xlu1 %v1632_v9 }
 0x2d1   :  { %7868 = vpow2.f32 %v1604_v46 }
 0x2d2   :  { %v8602_v55 = vpop.eup %7862  ;;  %v1614_v56 = vmul.f32 1.442695, %v1588_v49 }
 0x2d3   :  { %v1550_v53 = vpop.xlane.xlu1 %1549  ;;  %v1553_v2 = vpop.xlane.xlu0 %1552  ;;  %v1635_v57 = vsel %vm284_vm2, %v8602_v55, 0.0 }
 0x2d4   :  { %7870 = vpow2.f32 %v1614_v56  ;;  %v1584_v25 = vsub.f32 %v8494_v63, %v1550_v53  ;;  %v1585_v33 = vsub.f32 %v8500_v5, %v1553_v2  ;;  %1636 = vadd.xlane.f32.xlu0 %v1635_v57 }
 0x2d6   :  { %v8608_v37 = vpop.eup %7864  ;;  %v1606_v38 = vmul.f32 1.442695, %v1584_v25  ;;  %v1608_v58 = vmul.f32 1.442695, %v1585_v33 }
 0x2d7   :  { %v1559_v41 = vpop.xlane.xlu0 %1558  ;;  %v1638_v19 = vsel %vm284_vm2, %v8608_v37, 0.0 }
 0x2d8   :  { %7872 = vpow2.f32 %v1606_v38  ;;  %v1587_v45 = vsub.f32 %v8508_v18, %v1559_v41  ;;  %1639 = vadd.xlane.f32.xlu1 %v1638_v19 }
 0x2d9   :  { %7874 = vpow2.f32 %v1608_v58 }
 0x2da   :  { %v8613_v16 = vpop.eup %7866  ;;  %v1612_v30 = vmul.f32 1.442695, %v1587_v45 }
 0x2db   :  { %v8615_v63 = vpop.eup %7868  ;;  %v1565_v5 = vpop.xlane.xlu0 %1564  ;;  %v1650_v46 = vsel %vm284_vm2, %v8613_v16, 0.0 }
 0x2dc   :  { %v1589_v50 = vsub.f32 %v8514_v34, %v1565_v5  ;;  %1651 = vadd.xlane.f32.xlu1 %v1650_v46  ;;  %v1641_v9 = vsel %vm284_vm2, %v8615_v63, 0.0  ;;  %7876 = vpow2.f32 %v1612_v30  ;;  %v1568_v5 = vpop.xlane.xlu1 %1567 }
 0x2dd   :  { %1642 = vadd.xlane.f32.xlu0 %v1641_v9  ;;  %v1590_v46 = vsub.f32 %v8496_v0, %v1568_v5 }
 0x2de   :  { %v8622_v18 = vpop.eup %7870  ;;  %v1616_v49 = vmul.f32 1.442695, %v1589_v50 }
 0x2df   :  { %v1571_v56 = vpop.xlane.xlu0 %1570  ;;  %v1656_v53 = vsel %vm284_vm2, %v8622_v18, 0.0  ;;  %v1618_v50 = vmul.f32 1.442695, %v1590_v46  ;;  %v10019_v46 = vld [vmem:[#allocation4_spill] sm:$0xff] }
 0x2e0   :  { %7878 = vpow2.f32 %v1616_v49  ;;  %v1591_v2 = vsub.f32 %v8518_v42, %v1571_v56  ;;  %1657 = vadd.xlane.f32.xlu1 %v1656_v53  ;;  %v8652_v9 = vpop.permute.xlu1 %3312 }
 0x2e2   :  { %v8627_v57 = vpop.eup %7872  ;;  %v1620_v34 = vmul.f32 1.442695, %v1591_v2 }
 0x2e3   :  { %v8629_v25 = vpop.eup %7874  ;;  %v1644_v33 = vsel %vm284_vm2, %v8627_v57, 0.0  ;;  %v1577_v56 = vpop.xlane.xlu0 %1576 }
 0x2e4   :  { %7880 = vpow2.f32 %v1620_v34  ;;  %1645 = vadd.xlane.f32.xlu1 %v1644_v33  ;;  %v1647_v38 = vsel %vm284_vm2, %v8629_v25, 0.0  ;;  %v1593_v34 = vsub.f32 %v8522_v54, %v1577_v56  ;;  %v10021_v56 = vld [vmem:[#allocation6_spill] sm:$0xff] }
 0x2e5   :  { %1648 = vadd.xlane.f32.xlu0 %v1647_v38  ;;  %7882 = vpow2.f32 %v1618_v50  ;;  %v10020_v50 = vld [vmem:[#allocation3_spill] sm:$0xff] }
 0x2e6   :  { %v8635_v58 = vpop.eup %7876  ;;  %v1624_v33 = vmul.f32 1.442695, %v1593_v34 }
 0x2e7   :  { %v1653_v42 = vsel %vm284_vm2, %v8635_v58, 0.0 }
 0x2e9   :  { %1654 = vadd.xlane.f32.xlu0 %v1653_v42 }
 0x2ea   :  { %v8639_v41 = vpop.eup %7878 }
 0x2eb   :  { %v1659_v19 = vsel %vm284_vm2, %v8639_v41, 0.0 }
 0x2ed   :  { %1660 = vadd.xlane.f32.xlu0 %v1659_v19 }
 0x2ee   :  { %v8643_v45 = vpop.eup %7880 }
 0x2ef   :  { %v1665_v30 = vsel %vm284_vm2, %v8643_v45, 0.0  ;;  %v8656_v38 = vpop.eup %7882 }
 0x2f0   :  { %v1662_v0 = vsel %vm284_vm2, %v8656_v38, 0.0 }
 0x2f1   :  { %1666 = vadd.xlane.f32.xlu0 %v1665_v30 }
 0x2f5   :  { %3470 = vrot.lane.b32.xlu1 %v8244_v36, %s8068_s28 }
 0x307   :  { %3390 = vrot.lane.b32.xlu0 %v8396_v11, %s8069_s29 }
 0x30c   :  { %v1574_v49 = vpop.xlane.xlu1 %1573 }
 0x30d   :  { %v1592_v53 = vsub.f32 %v8502_v8, %v1574_v49 }
 0x30f   :  { %v1622_v2 = vmul.f32 1.442695, %v1592_v53 }
 0x311   :  { %7884 = vpow2.f32 %v1622_v2 }
 0x312   :  { %7886 = vpow2.f32 %v1624_v33 }
 0x319   :  { %1663 = vadd.xlane.f32.xlu1 %v1662_v0 }
 0x31b   :  { %v8660_v11 = vpop.eup %7884 }
 0x31c   :  { %v1668_v42 = vsel %vm284_vm2, %v8660_v11, 0.0  ;;  %v8664_v19 = vpop.eup %7886 }
 0x31d   :  { %1669 = vadd.xlane.f32.xlu1 %v1668_v42  ;;  %v1671_v8 = vsel %vm284_vm2, %v8664_v19, 0.0 }
 0x326   :  { %1672 = vadd.xlane.f32.xlu0 %v1671_v8 }
 0x32e   :  { %3468 = vrot.lane.b32.xlu1 %v8414_v15, %s8069_s29 }
 0x332   :  { %3626 = vrot.lane.b32.xlu1 %v8252_v40, %s8068_s28 }
 0x336   :  { %3624 = vrot.lane.b32.xlu1 %v8426_v17, %s8069_s29  ;;  %v10017_v17 = vmov 0.0  }
 0x33a   :  { %3782 = vrot.lane.b32.xlu1 %v8260_v44, %s8068_s28 }
 0x33c   :  { %3548 = vrot.lane.b32.xlu0 %v8250_v39, %s8068_s28 }
 0x33e   :  { %3780 = vrot.lane.b32.xlu1 %v8437_v20, %s8069_s29 }
 0x340   :  { %3546 = vrot.lane.b32.xlu0 %v8359_v3, %s8069_s29  ;;  %v8702_v3 = vpop.permute.xlu0 %3392 }
 0x342   :  { %3938 = vrot.lane.b32.xlu1 %v8268_v48, %s8068_s28 }
 0x344   :  { %3704 = vrot.lane.b32.xlu0 %v8258_v43, %s8068_s28 }
 0x346   :  { %3936 = vrot.lane.b32.xlu1 %v8447_v21, %s8069_s29 }
 0x348   :  { %3702 = vrot.lane.b32.xlu0 %v8375_v6, %s8069_s29 }
 0x34a   :  { %4094 = vrot.lane.b32.xlu1 %v8276_v52, %s8068_s28 }
 0x34c   :  { %3860 = vrot.lane.b32.xlu0 %v8266_v47, %s8068_s28 }
 0x34e   :  { %4092 = vrot.lane.b32.xlu1 %v8456_v22, %s8069_s29 }
 0x350   :  { %3858 = vrot.lane.b32.xlu0 %v8393_v10, %s8069_s29 }
 0x352   :  { %4346 = vrot.lane.b32.xlu1 %v8220_v23, %s8070_s30 }
 0x354   :  { %4016 = vrot.lane.b32.xlu0 %v8274_v51, %s8068_s28 }
 0x355   :  { %v1628_v6 = vpop.xlane.xlu1 %1627 }
 0x356   :  { %7888 = vrcp.f32 %v1628_v6  ;;  %4498 = vrot.lane.b32.xlu1 %v8226_v27, %s8070_s30 }
 0x358   :  { %4014 = vrot.lane.b32.xlu0 %v8411_v14, %s8069_s29 }
 0x359   :  { %v1631_v15 = vpop.xlane.xlu0 %1630 }
 0x35a   :  { %7890 = vrcp.f32 %v1631_v15  ;;  %4650 = vrot.lane.b32.xlu1 %v8234_v31, %s8070_s30 }
 0x35c   :  { %4422 = vrot.lane.b32.xlu0 %v8224_v26, %s8070_s30 }
 0x35d   :  { %v1634_v23 = vpop.xlane.xlu1 %1633 }
 0x35e   :  { %7892 = vrcp.f32 %v1634_v23  ;;  %4726 = vrot.lane.b32.xlu1 %v8236_v32, %s8070_s30  ;;  %v10023_v23 = vld [vmem:[#allocation17_spill] sm:$0xff] }
 0x360   :  { %v7889_v10 = vpop.eup %7888  ;;  %4574 = vrot.lane.b32.xlu0 %v8228_v28, %s8070_s30 }
 0x361   :  { %v1637_v27 = vpop.xlane.xlu0 %1636  ;;  %v1690_v14 = vmul.f32 %v7889_v10, %v8586_v29 }
 0x362   :  { %7894 = vrcp.f32 %v1637_v27  ;;  %4878 = vrot.lane.b32.xlu1 %v8244_v36, %s8070_s30 }
 0x363   :  { %7468 = vmatmul.mubr.msk.f32.vlgmr.msra.gmra.mrb[24].mxu0 %vm284_vm2, %v1690_v14 }
 0x364   :  { %v7891_v31 = vpop.eup %7890  ;;  %7476 = vmatpush3.msra.mxu0 %v8532_v60  ;;  %4802 = vrot.lane.b32.xlu0 %v8242_v35, %s8070_s30 }
 0x365   :  { %v1640_v26 = vpop.xlane.xlu1 %1639  ;;  %v1691_v32 = vmul.f32 %v7891_v31, %v8591_v13  ;;  %7477 = vmatprep.mubr.msk.f32.mxu0 %vm8065_vm1, %v10017_v17  ;;  %7485 = vmatprep.subr.mxu0 %v10017_v17 }
 0x366   :  { %7896 = vrcp.f32 %v1640_v26  ;;  %5030 = vrot.lane.b32.xlu1 %v8252_v40, %s8070_s30  ;;  %v10024_v26 = vld [vmem:[#allocation5_spill] sm:$0xff] }
 0x367   :  { %7473 = vmatmul.mubr.msk.f32.vlgmr.msra.gmra.mrb[24].mxu1 %vm284_vm2, %v1691_v32 }
 0x368   :  { %v7893_v28 = vpop.eup %7892  ;;  %4954 = vrot.lane.b32.xlu0 %v8250_v39, %s8070_s30  ;;  %7481 = vmatpush3.msra.mxu1 %v8530_v59 }
 0x369   :  { %v1652_v35 = vpop.xlane.xlu1 %1651  ;;  %v1692_v36 = vmul.f32 %v7893_v28, %v8597_v24  ;;  %7482 = vmatprep.mubr.msk.f32.mxu1 %vm8065_vm1, %v10017_v17  ;;  %7490 = vmatprep.subr.mxu1 %v10017_v17 }
 0x36a   :  { %v1643_v20 = vpop.xlane.xlu0 %1642 }
 0x36b   :  { %7898 = vrcp.f32 %v1643_v20  ;;  %7478 = vmatmul.mubr.msk.f32.vlgmr.msra.gmra.mrb[26].mxu0 %vm284_vm2, %v1692_v36  ;;  %v10026_v20 = vld [vmem:[#allocation9_spill] sm:$0xff] }
 0x36c   :  { %v7895_v40 = vpop.eup %7894  ;;  %7486 = vmatpush3.msra.mxu0 %v8536_v62  ;;  %7487 = vmatprep.mubr.msk.f32.mxu0 %vm8065_vm1, %v10017_v17 }
 0x36d   :  { %v1658_v39 = vpop.xlane.xlu1 %1657  ;;  %v1693_v21 = vmul.f32 %v7895_v40, %v8602_v55  ;;  %7495 = vmatprep.subr.mxu0 %v10017_v17  ;;  %v10027_v40 = vld [vmem:[#allocation10_spill] sm:$0xff] }
 0x36f   :  { %7483 = vmatmul.mubr.msk.f32.vlgmr.msra.gmra.mrb[26].mxu1 %vm284_vm2, %v1693_v21 }
 0x370   :  { %v7897_v22 = vpop.eup %7896  ;;  %7491 = vmatpush3.msra.mxu1 %v8534_v61  ;;  %7492 = vmatprep.mubr.msk.f32.mxu1 %vm8065_vm1, %v10017_v17 }
 0x371   :  { %v1646_v54 = vpop.xlane.xlu1 %1645  ;;  %v1694_v59 = vmul.f32 %v7897_v22, %v8608_v37  ;;  %7500 = vmatprep.subr.mxu1 %v10017_v17  ;;  %v10029_v22 = vld [vmem:[#allocation13_spill] sm:$0xff] }
 0x372   :  { %7900 = vrcp.f32 %v1646_v54  ;;  %v1649_v60 = vpop.xlane.xlu0 %1648  ;;  %v10030_v54 = vld [vmem:[#allocation12_spill] sm:$0xff] }
 0x373   :  { %7902 = vrcp.f32 %v1649_v60  ;;  %7488 = vmatmul.mubr.msk.f32.vlgmr.msra.gmra.mrb[28].mxu0 %vm284_vm2, %v1694_v59  ;;  %v10031_v59 = vld [vmem:[#allocation14_spill] sm:$0xff]  ;;  %v10032_v60 = vld [vmem:[#allocation15_spill] sm:$0xff] }
 0x374   :  { %7904 = vrcp.f32 %v1652_v35  ;;  %7496 = vmatpush3.msra.mxu0 %v8538_v1  ;;  %7497 = vmatprep.mubr.msk.f32.mxu0 %vm8065_vm1, %v10017_v17  ;;  %v10025_v35 = vld [vmem:[#allocation7_spill] sm:$0xff] }
 0x375   :  { %v7899_v61 = vpop.eup %7898  ;;  %7505 = vmatprep.subr.mxu0 %v10017_v17  ;;  %v8802_v53 = vpop.permute.xlu1 %3470 }
 0x376   :  { %v1655_v62 = vpop.xlane.xlu0 %1654  ;;  %v1695_v29 = vmul.f32 %v7899_v61, %v8615_v63 }
 0x377   :  { %7906 = vrcp.f32 %v1655_v62 }
 0x378   :  { %7908 = vrcp.f32 %v1658_v39  ;;  %7493 = vmatmul.mubr.msk.f32.vlgmr.msra.gmra.mrb[28].mxu1 %vm284_vm2, %v1695_v29  ;;  %v10028_v39 = vld [vmem:[#allocation11_spill] sm:$0xff]  ;;  %v10033_v29 = vld [vmem:[#allocation16_spill] sm:$0xff] }
 0x379   :  { %7501 = vmatpush3.msra.mxu1 %v8544_v7  ;;  %7502 = vmatprep.mubr.msk.f32.mxu1 %vm8065_vm1, %v10017_v17 }
 0x37a   :  { %v1661_v13 = vpop.xlane.xlu0 %1660  ;;  %7510 = vmatprep.subr.mxu1 %v10017_v17 }
 0x37b   :  { %7910 = vrcp.f32 %v1661_v13  ;;  %v10034_v13 = vld [vmem:[#allocation18_spill] sm:$0xff] }
 0x37c   :  { %v7901_v1 = vpop.eup %7900 }
 0x37d   :  { %v7903_v24 = vpop.eup %7902  ;;  %v1696_v55 = vmul.f32 %v7901_v1, %v8627_v57 }
 0x37e   :  { %v7905_v37 = vpop.eup %7904  ;;  %v1667_v30 = vpop.xlane.xlu0 %1666  ;;  %v1697_v63 = vmul.f32 %v7903_v24, %v8629_v25 }
 0x37f   :  { %7912 = vrcp.f32 %v1667_v30  ;;  %7498 = vmatmul.mubr.msk.f32.vlgmr.msra.gmra.mrb[30].mxu0 %vm284_vm2, %v1696_v55  ;;  %v1698_v5 = vmul.f32 %v7905_v37, %v8613_v16 }
 0x380   :  { %7503 = vmatmul.mubr.msk.f32.vlgmr.msra.gmra.mrb[30].mxu1 %vm284_vm2, %v1697_v63  ;;  %7506 = vmatpush3.msra.mxu0 %v8542_v4  ;;  %v10018_v4 = vld [vmem:[#allocation2_spill] sm:$0xff] }
 0x381   :  { %v7907_v7 = vpop.eup %7906  ;;  %7511 = vmatpush3.msra.mxu1 %v8548_v12  ;;  %7507 = vmatprep.mubr.msk.f32.mxu0 %vm8065_vm1, %v10017_v17 }
 0x382   :  { %v7909_v57 = vpop.eup %7908  ;;  %7512 = vmatprep.mubr.msk.f32.mxu1 %vm8065_vm1, %v10017_v17  ;;  %7515 = vmatprep.subr.mxu0 %v10017_v17  ;;  %v1699_v25 = vmul.f32 %v7907_v7, %v8635_v58  ;;  %v3391_v33 = vpop.permute.xlu0 %3390 }
 0x383   :  { %7520 = vmatprep.subr.mxu1 %v10017_v17  ;;  %7508 = vmatmul.mubr.msk.f32.vlgmr.msra.gmra.mrb[32].mxu0 %vm284_vm2, %v1698_v5  ;;  %v1700_v16 = vmul.f32 %v7909_v57, %v8622_v18 }
 0x384   :  { %7513 = vmatmul.mubr.msk.f32.vlgmr.msra.gmra.mrb[32].mxu1 %vm284_vm2, %v1699_v25  ;;  %7516 = vmatpush3.msra.mxu0 %v10018_v4 }
 0x385   :  { %v7911_v12 = vpop.eup %7910  ;;  %7521 = vmatpush3.msra.mxu1 %v10019_v46  ;;  %7517 = vmatprep.mubr.msk.f32.mxu0 %vm8065_vm1, %v10017_v17 }
 0x386   :  { %7522 = vmatprep.mubr.msk.f32.mxu1 %vm8065_vm1, %v10017_v17  ;;  %7525 = vmatprep.subr.mxu0 %v10017_v17  ;;  %v1701_v58 = vmul.f32 %v7911_v12, %v8639_v41  ;;  %v10022_v41 = vld [vmem:[#allocation8_spill] sm:$0xff] }
 0x387   :  { %7530 = vmatprep.subr.mxu1 %v10017_v17  ;;  %7518 = vmatmul.mubr.msk.f32.vlgmr.msra.gmra.mrb[34].mxu0 %vm284_vm2, %v1700_v16 }
 0x388   :  { %7523 = vmatmul.mubr.msk.f32.vlgmr.msra.gmra.mrb[34].mxu1 %vm284_vm2, %v1701_v58  ;;  %7526 = vmatpush3.msra.mxu0 %v10020_v50 }
 0x389   :  { %v7913_v49 = vpop.eup %7912  ;;  %7531 = vmatpush3.msra.mxu1 %v10021_v56  ;;  %7532 = vmatprep.mubr.msk.f32.mxu1 %vm8065_vm1, %v10017_v17 }
 0x38a   :  { %7540 = vmatprep.subr.mxu1 %v10017_v17  ;;  %v1703_v18 = vmul.f32 %v7913_v49, %v8643_v45  ;;  %7527 = vmatprep.mubr.msk.f32.mxu0 %vm8065_vm1, %v10017_v17 }
 0x38b   :  { %7535 = vmatprep.subr.mxu0 %v10017_v17 }
 0x38c   :  { %7533 = vmatmul.mubr.msk.f32.vlgmr.msra.gmra.mrb[36].mxu1 %vm284_vm2, %v1703_v18 }
 0x38d   :  { %7541 = vmatpush3.msra.mxu1 %v10022_v41  ;;  %7542 = vmatprep.mubr.msk.f32.mxu1 %vm8065_vm1, %v10017_v17 }
 0x38e   :  { %7550 = vmatprep.subr.mxu1 %v10017_v17 }
 0x3a6   :  { %v1664_v2 = vpop.xlane.xlu1 %1663 }
 0x3a7   :  { %7914 = vrcp.f32 %v1664_v2 }
 0x3aa   :  { %v1670_v34 = vpop.xlane.xlu1 %1669 }
 0x3ab   :  { %7916 = vrcp.f32 %v1670_v34 }
 0x3ae   :  { %v8804_v45 = vpop.permute.xlu1 %3468 }
 0x3b1   :  { %v7915_v0 = vpop.eup %7914 }
 0x3b2   :  { %v8806_v42 = vpop.permute.xlu1 %3626  ;;  %v1702_v8 = vmul.f32 %v7915_v0, %v8656_v38 }
 0x3b3   :  { %v1673_v6 = vpop.xlane.xlu0 %1672 }
 0x3b4   :  { %7918 = vrcp.f32 %v1673_v6  ;;  %7528 = vmatmul.mubr.msk.f32.vlgmr.msra.gmra.mrb[36].mxu0 %vm284_vm2, %v1702_v8 }
 0x3b5   :  { %v7917_v15 = vpop.eup %7916  ;;  %7536 = vmatpush3.msra.mxu0 %v10023_v23  ;;  %7537 = vmatprep.mubr.msk.f32.mxu0 %vm8065_vm1, %v10017_v17 }
 0x3b6   :  { %v8813_v10 = vpop.permute.xlu1 %3624  ;;  %v1704_v27 = vmul.f32 %v7917_v15, %v8660_v11  ;;  %7545 = vmatprep.subr.mxu0 %v10017_v17 }
 0x3b7   :  { %v3549_v14 = vpop.permute.xlu0 %3548 }
 0x3b8   :  { %7538 = vmatmul.mubr.msk.f32.vlgmr.msra.gmra.mrb[38].mxu0 %vm284_vm2, %v1704_v27 }
 0x3b9   :  { %7547 = vmatprep.mubr.msk.f32.mxu0 %vm8065_vm1, %v10017_v17 }
 0x3ba   :  { %v3783_v38 = vpop.permute.xlu1 %3782 }
 0x3bb   :  { %v3547_v31 = vpop.permute.xlu0 %3546 }
 0x3bc   :  { %7546 = vmatpush3.xpose.msk.msra.mxu0 %vm284_vm2, %v10024_v26 }
 0x3bd   :  { %7555 = vmatprep.subr.mxu0 %v10017_v17 }
 0x3be   :  { %v7919_v32 = vpop.eup %7918  ;;  %v3781_v28 = vpop.permute.xlu1 %3780 }
 0x3bf   :  { %7548 = vmatmul.mubr.msk.f32.vlgmr.msra.gmra.mrb[40].mxu0 %vm284_vm2, %v10025_v35  ;;  %v3705_v11 = vpop.permute.xlu0 %3704  ;;  %v1705_v36 = vmul.f32 %v7919_v32, %v8664_v19 }
 0x3c0   :  { %7556 = vmatpush3.xpose.msk.msra.mxu0 %vm284_vm2, %v10026_v20  ;;  %7557 = vmatprep.mubr.msk.f32.mxu0 %vm8065_vm1, %v10017_v17 }
 0x3c1   :  { %7543 = vmatmul.mubr.msk.f32.vlgmr.msra.gmra.mrb[38].mxu1 %vm284_vm2, %v1705_v36  ;;  %7565 = vmatprep.subr.mxu0 %v10017_v17 }
 0x3c2   :  { %7551 = vmatpush3.xpose.msk.msra.mxu1 %vm284_vm2, %v10027_v40  ;;  %7552 = vmatprep.mubr.msk.f32.mxu1 %vm8065_vm1, %v10017_v17  ;;  %v3939_v19 = vpop.permute.xlu1 %3938 }
 0x3c3   :  { %7558 = vmatmul.mubr.msk.f32.vlgmr.msra.gmra.mrb[42].mxu0 %vm284_vm2, %v10028_v39  ;;  %v3703_v21 = vpop.permute.xlu0 %3702  ;;  %7560 = vmatprep.subr.mxu1 %v10017_v17 }
 0x3c4   :  { %7566 = vmatpush3.xpose.msk.msra.mxu0 %vm284_vm2, %v10029_v22  ;;  %7567 = vmatprep.mubr.msk.f32.mxu0 %vm8065_vm1, %v10017_v17 }
 0x3c5   :  { %7553 = vmatmul.mubr.msk.f32.vlgmr.msra.gmra.mrb[40].mxu1 %vm284_vm2, %v10030_v54  ;;  %7575 = vmatprep.subr.mxu0 %v10017_v17 }
 0x3c6   :  { %7561 = vmatpush3.xpose.msk.msra.mxu1 %vm284_vm2, %v10031_v59  ;;  %7562 = vmatprep.mubr.msk.f32.mxu1 %vm8065_vm1, %v10017_v17  ;;  %v3937_v62 = vpop.permute.xlu1 %3936 }
 0x3c7   :  { %7568 = vmatmul.mubr.msk.f32.vlgmr.msra.gmra.mrb[44].mxu0 %vm284_vm2, %v10032_v60  ;;  %7570 = vmatprep.subr.mxu1 %v10017_v17  ;;  %v3861_v61 = vpop.permute.xlu0 %3860 }
 0x3c8   :  { %7576 = vmatpush3.xpose.msk.msra.mxu0 %vm284_vm2, %v8702_v3  ;;  %7577 = vmatprep.mubr.msk.f32.mxu0 %vm8065_vm1, %v10017_v17 }
 0x3c9   :  { %7563 = vmatmul.mubr.msk.f32.vlgmr.msra.gmra.mrb[42].mxu1 %vm284_vm2, %v10033_v29  ;;  %7585 = vmatprep.subr.mxu0 %v10017_v17 }
 0x3ca   :  { %7571 = vmatpush3.xpose.msk.msra.mxu1 %vm284_vm2, %v10034_v13  ;;  %7572 = vmatprep.mubr.msk.f32.mxu1 %vm8065_vm1, %v10017_v17  ;;  %v4095_v1 = vpop.permute.xlu1 %4094 }
 0x3cb   :  { %7578 = vmatmul.mubr.msk.f32.vlgmr.msra.gmra.mrb[46].mxu0 %vm284_vm2, %v3391_v33  ;;  %7580 = vmatprep.subr.mxu1 %v10017_v17  ;;  %v3859_v3 = vpop.permute.xlu0 %3858 }
 0x3cc   :  { %7586 = vmatpush3.xpose.msk.msra.mxu0 %vm284_vm2, %v3549_v14  ;;  %7587 = vmatprep.mubr.msk.f32.mxu0 %vm8065_vm1, %v10017_v17 }
 0x3cd   :  { %7573 = vmatmul.mubr.msk.f32.vlgmr.msra.gmra.mrb[44].mxu1 %vm284_vm2, %v8652_v9  ;;  %7595 = vmatprep.subr.mxu0 %v10017_v17 }
 0x3ce   :  { %7581 = vmatpush3.xpose.msk.msra.mxu1 %vm284_vm2, %v8802_v53  ;;  %7582 = vmatprep.mubr.msk.f32.mxu1 %vm8065_vm1, %v10017_v17  ;;  %v4093_v24 = vpop.permute.xlu1 %4092 }
 0x3cf   :  { %7588 = vmatmul.mubr.msk.f32.vlgmr.msra.gmra.mrb[48].mxu0 %vm284_vm2, %v3547_v31  ;;  %7590 = vmatprep.subr.mxu1 %v10017_v17  ;;  %v4017_v9 = vpop.permute.xlu0 %4016 }
 0x3d0   :  { %7596 = vmatpush3.xpose.msk.msra.mxu0 %vm284_vm2, %v3705_v11  ;;  %7597 = vmatprep.mubr.msk.f32.mxu0 %vm8065_vm1, %v10017_v17 }
 0x3d1   :  { %7583 = vmatmul.mubr.msk.f32.vlgmr.msra.gmra.mrb[46].mxu1 %vm284_vm2, %v8804_v45  ;;  %7605 = vmatprep.subr.mxu0 %v10017_v17 }
 0x3d2   :  { %7591 = vmatpush3.xpose.msk.msra.mxu1 %vm284_vm2, %v8806_v42  ;;  %7592 = vmatprep.mubr.msk.f32.mxu1 %vm8065_vm1, %v10017_v17  ;;  %v4347_v37 = vpop.permute.xlu1 %4346 }
 0x3d3   :  { %7598 = vmatmul.mubr.msk.f32.vlgmr.msra.gmra.mrb[50].mxu0 %vm284_vm2, %v3703_v21  ;;  %7600 = vmatprep.subr.mxu1 %v10017_v17  ;;  %v4015_v55 = vpop.permute.xlu0 %4014 }
 0x3d4   :  { %7606 = vmatpush3.xpose.msk.msra.mxu0 %vm284_vm2, %v3861_v61  ;;  %7607 = vmatprep.mubr.msk.f32.mxu0 %vm8065_vm1, %v10017_v17 }
 0x3d5   :  { %7593 = vmatmul.mubr.msk.f32.vlgmr.msra.gmra.mrb[48].mxu1 %vm284_vm2, %v8813_v10  ;;  %7615 = vmatprep.subr.mxu0 %v10017_v17 }
 0x3d6   :  { %7601 = vmatpush3.xpose.msk.msra.mxu1 %vm284_vm2, %v3783_v38  ;;  %7602 = vmatprep.mubr.msk.f32.mxu1 %vm8065_vm1, %v10017_v17 }
 0x3d7   :  { %7608 = vmatmul.mubr.msk.f32.vlgmr.msra.gmra.mrb[52].mxu0 %vm284_vm2, %v3859_v3  ;;  %7610 = vmatprep.subr.mxu1 %v10017_v17  ;;  %v4423_v30 = vpop.permute.xlu0 %4422 }
 0x3d8   :  { %7616 = vmatpush3.xpose.msk.msra.mxu0 %vm284_vm2, %v4017_v9  ;;  %7617 = vmatprep.mubr.msk.f32.mxu0 %vm8065_vm1, %v10017_v17 }
 0x3d9   :  { %7603 = vmatmul.mubr.msk.f32.vlgmr.msra.gmra.mrb[50].mxu1 %vm284_vm2, %v3781_v28  ;;  %7625 = vmatprep.subr.mxu0 %v10017_v17 }
 0x3da   :  { %7611 = vmatpush3.xpose.msk.msra.mxu1 %vm284_vm2, %v3939_v19  ;;  %7612 = vmatprep.mubr.msk.f32.mxu1 %vm8065_vm1, %v10017_v17 }
 0x3db   :  { %7618 = vmatmul.mubr.msk.f32.vlgmr.msra.gmra.mrb[54].mxu0 %vm284_vm2, %v4015_v55  ;;  %7620 = vmatprep.subr.mxu1 %v10017_v17 }
 0x3dc   :  { %7626 = vmatpush3.msra.mxu0 %v4347_v37  ;;  %7627 = vmatprep.mubr.msk.f32.mxu0 %vm8065_vm1, %v10017_v17 }
 0x3dd   :  { %7613 = vmatmul.mubr.msk.f32.vlgmr.msra.gmra.mrb[52].mxu1 %vm284_vm2, %v3937_v62  ;;  %7635 = vmatprep.subr.mxu0 %v10017_v17 }
 0x3de   :  { %7621 = vmatpush3.xpose.msk.msra.mxu1 %vm284_vm2, %v4095_v1  ;;  %7622 = vmatprep.mubr.msk.f32.mxu1 %vm8065_vm1, %v10017_v17 }
 0x3df   :  { %7630 = vmatprep.subr.mxu1 %v10017_v17 }
 0x3e1   :  { %7623 = vmatmul.mubr.msk.f32.vlgmr.msra.gmra.mrb[54].mxu1 %vm284_vm2, %v4093_v24 }
 0x3e2   :  { %7631 = vmatpush3.msra.mxu1 %v4423_v30  ;;  %7632 = vmatprep.mubr.msk.f32.mxu1 %vm8065_vm1, %v10017_v17 }
 0x3e3   :  { %7640 = vmatprep.subr.mxu1 %v10017_v17 }
 0x436   :  { %v8923_v63 = vpop.f32.mrb[24].mxu0 }
 0x437   :  { %v7469_v7 = vpop.f32.mrb[25].mxu0 }
 0x43a   :  { %v8925_v5 = vpop.f32.mrb[24].mxu1 }
 0x43b   :  { %v7474_v57 = vpop.f32.mrb[25].mxu1 }
 0x43e   :  { %v8927_v25 = vpop.f32.mrb[26].mxu0 }
 0x43f   :  { %v7479_v4 = vpop.f32.mrb[27].mxu0 }
 0x442   :  { %v8929_v12 = vpop.f32.mrb[26].mxu1 }
 0x443   :  { %v7484_v46 = vpop.f32.mrb[27].mxu1 }
 0x446   :  { %v8931_v16 = vpop.f32.mrb[28].mxu0 }
 0x447   :  { %v7489_v58 = vpop.f32.mrb[29].mxu0 }
 0x44b   :  { %v8933_v50 = vpop.f32.mrb[28].mxu1 }
 0x44c   :  { %v7494_v49 = vpop.f32.mrb[29].mxu1 }
 0x452   :  { %v8935_v56 = vpop.f32.mrb[30].mxu0 }
 0x453   :  { %v8937_v18 = vpop.f32.mrb[30].mxu1  ;;  %v7499_v41 = vpop.f32.mrb[31].mxu0 }
 0x454   :  { %v7504_v53 = vpop.f32.mrb[31].mxu1 }
 0x456   :  { %v8939_v2 = vpop.f32.mrb[32].mxu0 }
 0x457   :  { %v8941_v34 = vpop.f32.mrb[32].mxu1  ;;  %v7509_v45 = vpop.f32.mrb[33].mxu0 }
 0x458   :  { %v7514_v33 = vpop.f32.mrb[33].mxu1 }
 0x45a   :  { %v8943_v0 = vpop.f32.mrb[34].mxu0 }
 0x45b   :  { %v8945_v42 = vpop.f32.mrb[34].mxu1  ;;  %v7519_v8 = vpop.f32.mrb[35].mxu0 }
 0x45c   :  { %v7524_v6 = vpop.f32.mrb[35].mxu1 }
 0x45f   :  { %v8947_v15 = vpop.f32.mrb[36].mxu1 }
 0x460   :  { %v7534_v23 = vpop.f32.mrb[37].mxu1 }
 0x487   :  { %v8949_v10 = vpop.f32.mrb[36].mxu0 }
 0x488   :  { %v7529_v27 = vpop.f32.mrb[37].mxu0 }
 0x48b   :  { %v8951_v14 = vpop.f32.mrb[38].mxu0 }
 0x48c   :  { %v7539_v38 = vpop.f32.mrb[39].mxu0 }
 0x492   :  { %v8953_v31 = vpop.f32.mrb[40].mxu0 }
 0x493   :  { %v7549_v26 = vpop.f32.mrb[41].mxu0  ;;  %v4170_v32 = vsel %vm284_vm2, %v8953_v31, -inf }
 0x494   :  { %4171 = vmax.xlane.f32.xlu0 %v4170_v32  ;;  %v8957_v28 = vpop.f32.mrb[38].mxu1 }
 0x495   :  { %v7544_v35 = vpop.f32.mrb[39].mxu1 }
 0x496   :  { %v8959_v11 = vpop.f32.mrb[42].mxu0 }
 0x497   :  { %v7559_v36 = vpop.f32.mrb[43].mxu0  ;;  %v4176_v20 = vsel %vm284_vm2, %v8959_v11, -inf }
 0x498   :  { %4177 = vmax.xlane.f32.xlu0 %v4176_v20  ;;  %v8963_v40 = vpop.f32.mrb[40].mxu1 }
 0x499   :  { %v7554_v39 = vpop.f32.mrb[41].mxu1  ;;  %v4173_v19 = vsel %vm284_vm2, %v8963_v40, -inf }
 0x49a   :  { %v8967_v21 = vpop.f32.mrb[44].mxu0  ;;  %4174 = vmax.xlane.f32.xlu1 %v4173_v19 }
 0x49b   :  { %v7569_v22 = vpop.f32.mrb[45].mxu0  ;;  %v4182_v60 = vsel %vm284_vm2, %v8967_v21, -inf }
 0x49c   :  { %v8969_v54 = vpop.f32.mrb[42].mxu1 }
 0x49d   :  { %v7564_v59 = vpop.f32.mrb[43].mxu1  ;;  %v4179_v61 = vsel %vm284_vm2, %v8969_v54, -inf }
 0x49e   :  { %v8975_v62 = vpop.f32.mrb[46].mxu0  ;;  %4183 = vmax.xlane.f32.xlu1 %v4182_v60  ;;  %4180 = vmax.xlane.f32.xlu0 %v4179_v61  ;;  %v9027_v59 = vpop.permute.xlu1 %4498 }
 0x49f   :  { %v7579_v29 = vpop.f32.mrb[47].mxu0  ;;  %v4188_v1 = vsel %vm284_vm2, %v8975_v62, -inf  ;;  %v9031_v61 = vpop.permute.xlu0 %4574 }
 0x4a0   :  { %v8977_v13 = vpop.f32.mrb[44].mxu1 }
 0x4a1   :  { %v7574_v3 = vpop.f32.mrb[45].mxu1  ;;  %v4185_v9 = vsel %vm284_vm2, %v8977_v13, -inf }
 0x4a2   :  { %v8983_v24 = vpop.f32.mrb[48].mxu0  ;;  %4189 = vmax.xlane.f32.xlu1 %v4188_v1  ;;  %4186 = vmax.xlane.f32.xlu0 %v4185_v9  ;;  %v9029_v60 = vpop.permute.xlu1 %4650 }
 0x4a3   :  { %v7589_v55 = vpop.f32.mrb[49].mxu0  ;;  %v4194_v7 = vsel %vm284_vm2, %v8983_v24, -inf  ;;  %v9035_v3 = vpop.permute.xlu0 %4802 }
 0x4a4   :  { %v8985_v37 = vpop.f32.mrb[46].mxu1 }
 0x4a5   :  { %v7584_v30 = vpop.f32.mrb[47].mxu1  ;;  %v4191_v57 = vsel %vm284_vm2, %v8985_v37, -inf }
 0x4a6   :  { %v8991_v4 = vpop.f32.mrb[50].mxu0  ;;  %4195 = vmax.xlane.f32.xlu1 %v4194_v7  ;;  %4192 = vmax.xlane.f32.xlu0 %v4191_v57  ;;  %v9033_v29 = vpop.permute.xlu1 %4726 }
 0x4a7   :  { %v7599_v46 = vpop.f32.mrb[51].mxu0  ;;  %v4200_v41 = vsel %vm284_vm2, %v8991_v4, -inf  ;;  %v9039_v1 = vpop.permute.xlu0 %4954 }
 0x4a8   :  { %v8993_v58 = vpop.f32.mrb[48].mxu1 }
 0x4a9   :  { %v7594_v49 = vpop.f32.mrb[49].mxu1  ;;  %v4197_v53 = vsel %vm284_vm2, %v8993_v58, -inf }
 0x4aa   :  { %v8999_v45 = vpop.f32.mrb[52].mxu0  ;;  %4201 = vmax.xlane.f32.xlu1 %v4200_v41  ;;  %4198 = vmax.xlane.f32.xlu0 %v4197_v53 }
 0x4ab   :  { %v7609_v33 = vpop.f32.mrb[53].mxu0  ;;  %v4206_v23 = vsel %vm284_vm2, %v8999_v45, -inf }
 0x4ac   :  { %v9001_v8 = vpop.f32.mrb[50].mxu1 }
 0x4ad   :  { %v7604_v6 = vpop.f32.mrb[51].mxu1  ;;  %v4203_v27 = vsel %vm284_vm2, %v9001_v8, -inf }
 0x4ae   :  { %v9007_v38 = vpop.f32.mrb[54].mxu0  ;;  %4207 = vmax.xlane.f32.xlu1 %v4206_v23  ;;  %4204 = vmax.xlane.f32.xlu0 %v4203_v27 }
 0x4af   :  { %v7619_v26 = vpop.f32.mrb[55].mxu0  ;;  %v4212_v36 = vsel %vm284_vm2, %v9007_v38, -inf }
 0x4b0   :  { %v9009_v32 = vpop.f32.mrb[52].mxu1 }
 0x4b1   :  { %v7614_v35 = vpop.f32.mrb[53].mxu1  ;;  %v4209_v20 = vsel %vm284_vm2, %v9009_v32, -inf }
 0x4b2   :  { %4213 = vmax.xlane.f32.xlu1 %v4212_v36  ;;  %4210 = vmax.xlane.f32.xlu0 %v4209_v20 }
 0x4b4   :  { %v9015_v39 = vpop.f32.mrb[54].mxu1 }
 0x4b5   :  { %v7624_v19 = vpop.f32.mrb[55].mxu1  ;;  %v4215_v22 = vsel %vm284_vm2, %v9015_v39, -inf }
 0x4b6   :  { %4216 = vmax.xlane.f32.xlu0 %v4215_v22 }
 0x4c3   :  { %5182 = vrot.lane.b32.xlu1 %v8260_v44, %s8070_s30  ;;  %v9037_v44 = vpop.permute.xlu1 %4878 }
 0x4c7   :  { %5334 = vrot.lane.b32.xlu1 %v8268_v48, %s8070_s30  ;;  %v9042_v9 = vpop.permute.xlu1 %5030 }
 0x4cc   :  { %5106 = vrot.lane.b32.xlu0 %v8258_v43, %s8070_s30 }
 0x4d0   :  { %5258 = vrot.lane.b32.xlu0 %v8266_v47, %s8070_s30 }
 0x521   :  { %v4172_v48 = vpop.xlane.xlu0 %4171 }
 0x522   :  { %v4218_v43 = vsub.f32 %v8953_v31, %v4172_v48 }
 0x524   :  { %v4234_v47 = vmul.f32 1.442695, %v4218_v43 }
 0x525   :  { %v4178_v55 = vpop.xlane.xlu0 %4177 }
 0x526   :  { %7920 = vpow2.f32 %v4234_v47  ;;  %v4220_v30 = vsub.f32 %v8959_v11, %v4178_v55 }
 0x527   :  { %v4175_v7 = vpop.xlane.xlu1 %4174 }
 0x528   :  { %v4238_v57 = vmul.f32 1.442695, %v4220_v30  ;;  %v4219_v46 = vsub.f32 %v8963_v40, %v4175_v7 }
 0x52a   :  { %7922 = vpow2.f32 %v4238_v57  ;;  %v4236_v49 = vmul.f32 1.442695, %v4219_v46 }
 0x52b   :  { %v4184_v41 = vpop.xlane.xlu1 %4183  ;;  %v4181_v53 = vpop.xlane.xlu0 %4180 }
 0x52c   :  { %7924 = vpow2.f32 %v4236_v49  ;;  %v4222_v33 = vsub.f32 %v8967_v21, %v4184_v41  ;;  %v4221_v31 = vsub.f32 %v8969_v54, %v4181_v53 }
 0x52e   :  { %v4242_v6 = vmul.f32 1.442695, %v4222_v33  ;;  %v4240_v23 = vmul.f32 1.442695, %v4221_v31 }
 0x52f   :  { %v4190_v27 = vpop.xlane.xlu1 %4189  ;;  %v4187_v26 = vpop.xlane.xlu0 %4186 }
 0x530   :  { %v9048_v35 = vpop.eup %7920  ;;  %7926 = vpow2.f32 %v4242_v6  ;;  %v4224_v11 = vsub.f32 %v8975_v62, %v4190_v27  ;;  %v4223_v40 = vsub.f32 %v8977_v13, %v4187_v26 }
 0x531   :  { %7928 = vpow2.f32 %v4240_v23  ;;  %v4266_v36 = vsel %vm284_vm2, %v9048_v35, 0.0 }
 0x532   :  { %v4246_v20 = vmul.f32 1.442695, %v4224_v11  ;;  %v4244_v19 = vmul.f32 1.442695, %v4223_v40  ;;  %4267 = vadd.xlane.f32.xlu1 %v4266_v36 }
 0x533   :  { %v4196_v21 = vpop.xlane.xlu1 %4195  ;;  %v4193_v54 = vpop.xlane.xlu0 %4192 }
 0x534   :  { %v9054_v22 = vpop.eup %7922  ;;  %7930 = vpow2.f32 %v4246_v20  ;;  %v4226_v48 = vsub.f32 %v8983_v24, %v4196_v21  ;;  %v4225_v43 = vsub.f32 %v8985_v37, %v4193_v54 }
 0x535   :  { %7932 = vpow2.f32 %v4244_v19  ;;  %v4272_v62 = vsel %vm284_vm2, %v9054_v22, 0.0 }
 0x536   :  { %v9060_v13 = vpop.eup %7924  ;;  %v4250_v47 = vmul.f32 1.442695, %v4226_v48  ;;  %v4248_v55 = vmul.f32 1.442695, %v4225_v43  ;;  %4273 = vadd.xlane.f32.xlu1 %v4272_v62 }
 0x537   :  { %v4202_v30 = vpop.xlane.xlu1 %4201  ;;  %v4199_v7 = vpop.xlane.xlu0 %4198  ;;  %v4269_v57 = vsel %vm284_vm2, %v9060_v13, 0.0 }
 0x538   :  { %7934 = vpow2.f32 %v4250_v47  ;;  %v4228_v46 = vsub.f32 %v8991_v4, %v4202_v30  ;;  %v4227_v24 = vsub.f32 %v8993_v58, %v4199_v7  ;;  %4270 = vadd.xlane.f32.xlu0 %v4269_v57 }
 0x539   :  { %7936 = vpow2.f32 %v4248_v55 }
 0x53a   :  { %v9066_v37 = vpop.eup %7926  ;;  %v4254_v49 = vmul.f32 1.442695, %v4228_v46  ;;  %v4252_v41 = vmul.f32 1.442695, %v4227_v24 }
 0x53b   :  { %v9068_v53 = vpop.eup %7928  ;;  %v4208_v33 = vpop.xlane.xlu1 %4207  ;;  %v4278_v6 = vsel %vm284_vm2, %v9066_v37, 0.0 }
 0x53c   :  { %v4205_v31 = vpop.xlane.xlu0 %4204  ;;  %7938 = vpow2.f32 %v4254_v49  ;;  %v4230_v23 = vsub.f32 %v8999_v45, %v4208_v33  ;;  %4279 = vadd.xlane.f32.xlu1 %v4278_v6  ;;  %v4275_v58 = vsel %vm284_vm2, %v9068_v53, 0.0 }
 0x53d   :  { %v4229_v4 = vsub.f32 %v9001_v8, %v4205_v31  ;;  %7940 = vpow2.f32 %v4252_v41  ;;  %4276 = vadd.xlane.f32.xlu0 %v4275_v58 }
 0x53e   :  { %v9076_v27 = vpop.eup %7930  ;;  %v4258_v26 = vmul.f32 1.442695, %v4230_v23 }
 0x53f   :  { %v4256_v11 = vmul.f32 1.442695, %v4229_v4  ;;  %v9078_v40 = vpop.eup %7932  ;;  %v4214_v36 = vpop.xlane.xlu1 %4213  ;;  %v4284_v19 = vsel %vm284_vm2, %v9076_v27, 0.0 }
 0x540   :  { %v4211_v20 = vpop.xlane.xlu0 %4210  ;;  %7942 = vpow2.f32 %v4258_v26  ;;  %v4232_v45 = vsub.f32 %v9007_v38, %v4214_v36  ;;  %4285 = vadd.xlane.f32.xlu1 %v4284_v19  ;;  %v4281_v21 = vsel %vm284_vm2, %v9078_v40, 0.0 }
 0x541   :  { %v4231_v8 = vsub.f32 %v9009_v32, %v4211_v20  ;;  %7944 = vpow2.f32 %v4256_v11  ;;  %4282 = vadd.xlane.f32.xlu0 %v4281_v21 }
 0x542   :  { %v9086_v54 = vpop.eup %7934  ;;  %v4262_v48 = vmul.f32 1.442695, %v4232_v45 }
 0x543   :  { %v4260_v43 = vmul.f32 1.442695, %v4231_v8  ;;  %v9088_v62 = vpop.eup %7936  ;;  %v4290_v55 = vsel %vm284_vm2, %v9086_v54, 0.0  ;;  %v9127_v11 = vpop.permute.xlu1 %5182 }
 0x544   :  { %v4217_v47 = vpop.xlane.xlu0 %4216  ;;  %7946 = vpow2.f32 %v4262_v48  ;;  %4291 = vadd.xlane.f32.xlu1 %v4290_v55  ;;  %v4287_v32 = vsel %vm284_vm2, %v9088_v62, 0.0 }
 0x545   :  { %v4233_v38 = vsub.f32 %v9015_v39, %v4217_v47  ;;  %7948 = vpow2.f32 %v4260_v43  ;;  %4288 = vadd.xlane.f32.xlu0 %v4287_v32 }
 0x546   :  { %v9095_v30 = vpop.eup %7938 }
 0x547   :  { %v4264_v7 = vmul.f32 1.442695, %v4233_v38  ;;  %v9097_v57 = vpop.eup %7940  ;;  %v4296_v46 = vsel %vm284_vm2, %v9095_v30, 0.0  ;;  %v9129_v36 = vpop.permute.xlu1 %5334 }
 0x548   :  { %4297 = vadd.xlane.f32.xlu1 %v4296_v46  ;;  %v4293_v24 = vsel %vm284_vm2, %v9097_v57, 0.0  ;;  %v9131_v20 = vpop.permute.xlu0 %5106 }
 0x549   :  { %7950 = vpow2.f32 %v4264_v7  ;;  %4294 = vadd.xlane.f32.xlu0 %v4293_v24 }
 0x54a   :  { %v9103_v39 = vpop.eup %7942 }
 0x54b   :  { %v9105_v49 = vpop.eup %7944  ;;  %v4302_v41 = vsel %vm284_vm2, %v9103_v39, 0.0 }
 0x54c   :  { %4303 = vadd.xlane.f32.xlu1 %v4302_v41  ;;  %v4299_v33 = vsel %vm284_vm2, %v9105_v49, 0.0  ;;  %v9133_v45 = vpop.permute.xlu0 %5258 }
 0x54d   :  { %4300 = vadd.xlane.f32.xlu0 %v4299_v33 }
 0x54e   :  { %v9111_v31 = vpop.eup %7946 }
 0x54f   :  { %v9113_v6 = vpop.eup %7948  ;;  %v4308_v23 = vsel %vm284_vm2, %v9111_v31, 0.0 }
 0x550   :  { %4309 = vadd.xlane.f32.xlu1 %v4308_v23  ;;  %v4305_v4 = vsel %vm284_vm2, %v9113_v6, 0.0 }
 0x551   :  { %4306 = vadd.xlane.f32.xlu0 %v4305_v4 }
 0x553   :  { %v9119_v58 = vpop.eup %7950 }
 0x554   :  { %v4311_v26 = vsel %vm284_vm2, %v9119_v58, 0.0 }
 0x555   :  { %4312 = vadd.xlane.f32.xlu0 %v4311_v26 }
 0x561   :  { %5486 = vrot.lane.b32.xlu1 %v8276_v52, %s8070_s30 }
 0x56b   :  { %5410 = vrot.lane.b32.xlu0 %v8274_v51, %s8070_s30 }
 0x5bf   :  { %v4268_v19 = vpop.xlane.xlu1 %4267 }
 0x5c0   :  { %7952 = vrcp.f32 %v4268_v19 }
 0x5c3   :  { %v4274_v8 = vpop.xlane.xlu1 %4273 }
 0x5c4   :  { %7954 = vrcp.f32 %v4274_v8 }
 0x5c5   :  { %v4271_v21 = vpop.xlane.xlu0 %4270 }
 0x5c6   :  { %7956 = vrcp.f32 %v4271_v21 }
 0x5c9   :  { %v4280_v48 = vpop.xlane.xlu1 %4279 }
 0x5ca   :  { %v7953_v43 = vpop.eup %7952  ;;  %7958 = vrcp.f32 %v4280_v48  ;;  %v4277_v52 = vpop.xlane.xlu0 %4276 }
 0x5cb   :  { %v4330_v51 = vmul.f32 %v7953_v43, %v9048_v35  ;;  %7960 = vrcp.f32 %v4277_v52 }
 0x5cd   :  { %7628 = vmatmul.mubr.msk.f32.vlgmr.msra.gmra.mrb[56].mxu0 %vm284_vm2, %v4330_v51  ;;  %v4286_v47 = vpop.xlane.xlu1 %4285 }
 0x5ce   :  { %v7955_v55 = vpop.eup %7954  ;;  %7636 = vmatpush3.msra.mxu0 %v9027_v59  ;;  %7962 = vrcp.f32 %v4286_v47  ;;  %v4283_v38 = vpop.xlane.xlu0 %4282  ;;  %7637 = vmatprep.mubr.msk.f32.mxu0 %vm8065_vm1, %v10017_v17 }
 0x5cf   :  { %v4332_v32 = vmul.f32 %v7955_v55, %v9054_v22  ;;  %7964 = vrcp.f32 %v4283_v38  ;;  %7645 = vmatprep.subr.mxu0 %v10017_v17 }
 0x5d0   :  { %v7957_v7 = vpop.eup %7956 }
 0x5d1   :  { %v4331_v35 = vmul.f32 %v7957_v7, %v9060_v13  ;;  %7638 = vmatmul.mubr.msk.f32.vlgmr.msra.gmra.mrb[58].mxu0 %vm284_vm2, %v4332_v32  ;;  %v4292_v46 = vpop.xlane.xlu1 %4291 }
 0x5d2   :  { %7646 = vmatpush3.msra.mxu0 %v9029_v60  ;;  %7966 = vrcp.f32 %v4292_v46  ;;  %v4289_v59 = vpop.xlane.xlu0 %4288  ;;  %7647 = vmatprep.mubr.msk.f32.mxu0 %vm8065_vm1, %v10017_v17 }
 0x5d3   :  { %7968 = vrcp.f32 %v4289_v59  ;;  %7633 = vmatmul.mubr.msk.f32.vlgmr.msra.gmra.mrb[56].mxu1 %vm284_vm2, %v4331_v35  ;;  %7655 = vmatprep.subr.mxu0 %v10017_v17 }
 0x5d4   :  { %v7959_v22 = vpop.eup %7958  ;;  %7641 = vmatpush3.msra.mxu1 %v9031_v61  ;;  %7642 = vmatprep.mubr.msk.f32.mxu1 %vm8065_vm1, %v10017_v17 }
 0x5d5   :  { %v7961_v13 = vpop.eup %7960  ;;  %v4334_v24 = vmul.f32 %v7959_v22, %v9066_v37  ;;  %v4298_v60 = vpop.xlane.xlu1 %4297  ;;  %7650 = vmatprep.subr.mxu1 %v10017_v17 }
 0x5d6   :  { %v4333_v41 = vmul.f32 %v7961_v13, %v9068_v53  ;;  %7970 = vrcp.f32 %v4298_v60  ;;  %v4295_v33 = vpop.xlane.xlu0 %4294 }
 0x5d7   :  { %7972 = vrcp.f32 %v4295_v33  ;;  %7648 = vmatmul.mubr.msk.f32.vlgmr.msra.gmra.mrb[60].mxu0 %vm284_vm2, %v4334_v24 }
 0x5d8   :  { %v7963_v23 = vpop.eup %7962  ;;  %7643 = vmatmul.mubr.msk.f32.vlgmr.msra.gmra.mrb[58].mxu1 %vm284_vm2, %v4333_v41  ;;  %7656 = vmatpush3.msra.mxu0 %v9035_v3 }
 0x5d9   :  { %v7965_v61 = vpop.eup %7964  ;;  %v4336_v4 = vmul.f32 %v7963_v23, %v9076_v27  ;;  %7651 = vmatpush3.msra.mxu1 %v9033_v29  ;;  %v4304_v37 = vpop.xlane.xlu1 %4303  ;;  %7652 = vmatprep.mubr.msk.f32.mxu1 %vm8065_vm1, %v10017_v17 }
 0x5da   :  { %v4335_v53 = vmul.f32 %v7965_v61, %v9078_v40  ;;  %7974 = vrcp.f32 %v4304_v37  ;;  %v4301_v26 = vpop.xlane.xlu0 %4300  ;;  %7657 = vmatprep.mubr.msk.f32.mxu0 %vm8065_vm1, %v10017_v17  ;;  %7660 = vmatprep.subr.mxu1 %v10017_v17 }
 0x5db   :  { %7976 = vrcp.f32 %v4301_v26  ;;  %7665 = vmatprep.subr.mxu0 %v10017_v17  ;;  %7658 = vmatmul.mubr.msk.f32.vlgmr.msra.gmra.mrb[62].mxu0 %vm284_vm2, %v4336_v4 }
 0x5dc   :  { %v7967_v3 = vpop.eup %7966  ;;  %7653 = vmatmul.mubr.msk.f32.vlgmr.msra.gmra.mrb[60].mxu1 %vm284_vm2, %v4335_v53  ;;  %7666 = vmatpush3.msra.mxu0 %v9039_v1 }
 0x5dd   :  { %v7969_v29 = vpop.eup %7968  ;;  %v4338_v27 = vmul.f32 %v7967_v3, %v9086_v54  ;;  %7661 = vmatpush3.msra.mxu1 %v9037_v44  ;;  %v4310_v40 = vpop.xlane.xlu1 %4309  ;;  %7662 = vmatprep.mubr.msk.f32.mxu1 %vm8065_vm1, %v10017_v17 }
 0x5de   :  { %v4337_v19 = vmul.f32 %v7969_v29, %v9088_v62  ;;  %7978 = vrcp.f32 %v4310_v40  ;;  %v4307_v8 = vpop.xlane.xlu0 %4306  ;;  %7667 = vmatprep.mubr.msk.f32.mxu0 %vm8065_vm1, %v10017_v17  ;;  %7670 = vmatprep.subr.mxu1 %v10017_v17 }
 0x5df   :  { %7980 = vrcp.f32 %v4307_v8  ;;  %7675 = vmatprep.subr.mxu0 %v10017_v17  ;;  %7668 = vmatmul.mubr.msk.f32.vlgmr.msra.gmra.mrb[64].mxu0 %vm284_vm2, %v4338_v27 }
 0x5e0   :  { %v7971_v1 = vpop.eup %7970  ;;  %7663 = vmatmul.mubr.msk.f32.vlgmr.msra.gmra.mrb[62].mxu1 %vm284_vm2, %v4337_v19  ;;  %7676 = vmatpush3.msra.mxu0 %v9131_v20 }
 0x5e1   :  { %v7973_v44 = vpop.eup %7972  ;;  %v4340_v54 = vmul.f32 %v7971_v1, %v9095_v30  ;;  %7671 = vmatpush3.msra.mxu1 %v9042_v9  ;;  %7672 = vmatprep.mubr.msk.f32.mxu1 %vm8065_vm1, %v10017_v17  ;;  %v5487_v43 = vpop.permute.xlu1 %5486 }
 0x5e2   :  { %v4339_v62 = vmul.f32 %v7973_v44, %v9097_v57  ;;  %v4313_v21 = vpop.xlane.xlu0 %4312  ;;  %7677 = vmatprep.mubr.msk.f32.mxu0 %vm8065_vm1, %v10017_v17  ;;  %7680 = vmatprep.subr.mxu1 %v10017_v17 }
 0x5e3   :  { %7982 = vrcp.f32 %v4313_v21  ;;  %7685 = vmatprep.subr.mxu0 %v10017_v17  ;;  %7678 = vmatmul.mubr.msk.f32.vlgmr.msra.gmra.mrb[66].mxu0 %vm284_vm2, %v4340_v54 }
 0x5e4   :  { %v7975_v20 = vpop.eup %7974  ;;  %7673 = vmatmul.mubr.msk.f32.vlgmr.msra.gmra.mrb[64].mxu1 %vm284_vm2, %v4339_v62  ;;  %7686 = vmatpush3.msra.mxu0 %v9133_v45 }
 0x5e5   :  { %v7977_v9 = vpop.eup %7976  ;;  %v4342_v30 = vmul.f32 %v7975_v20, %v9103_v39  ;;  %7681 = vmatpush3.msra.mxu1 %v9127_v11  ;;  %7682 = vmatprep.mubr.msk.f32.mxu1 %vm8065_vm1, %v10017_v17 }
 0x5e6   :  { %v4341_v57 = vmul.f32 %v7977_v9, %v9105_v49  ;;  %v5411_v48 = vpop.permute.xlu0 %5410  ;;  %7687 = vmatprep.mubr.msk.f32.mxu0 %vm8065_vm1, %v10017_v17  ;;  %7690 = vmatprep.subr.mxu1 %v10017_v17 }
 0x5e7   :  { %7695 = vmatprep.subr.mxu0 %v10017_v17  ;;  %7688 = vmatmul.mubr.msk.f32.vlgmr.msra.gmra.mrb[68].mxu0 %vm284_vm2, %v4342_v30  ;;  %v8051_v30 = vld [vmem:[%s9985_s0 + $0x18] sm:$0xff] }
 0x5e8   :  { %v7979_v45 = vpop.eup %7978  ;;  %7683 = vmatmul.mubr.msk.f32.vlgmr.msra.gmra.mrb[66].mxu1 %vm284_vm2, %v4341_v57  ;;  %7696 = vmatpush3.msra.mxu0 %v5411_v48 }
 0x5e9   :  { %v7981_v39 = vpop.eup %7980  ;;  %v4344_v11 = vmul.f32 %v7979_v45, %v9111_v31  ;;  %7691 = vmatpush3.msra.mxu1 %v9129_v36  ;;  %7692 = vmatprep.mubr.msk.f32.mxu1 %vm8065_vm1, %v10017_v17  ;;  %v263_v36 = vld [vmem:[%s9987_s3] sm:$0xff] }
 0x5ea   :  { %v4343_v49 = vmul.f32 %v7981_v39, %v9113_v6  ;;  %7697 = vmatprep.mubr.msk.f32.mxu0 %vm8065_vm1, %v10017_v17  ;;  %7700 = vmatprep.subr.mxu1 %v10017_v17  ;;  %v264_v6 = vld [vmem:[%s9987_s3 + $0x8] sm:$0xff]  ;;  %v8052_v39 = vld [vmem:[%s9985_s0 + $0x20] sm:$0xff] }
 0x5eb   :  { %7698 = vmatmul.mubr.msk.f32.vlgmr.msra.gmra.mrb[70].mxu0 %vm284_vm2, %v4344_v11  ;;  %7705 = vmatprep.subr.mxu0 %v264_v6 }
 0x5ec   :  { %7693 = vmatmul.mubr.msk.f32.vlgmr.msra.gmra.mrb[68].mxu1 %vm284_vm2, %v4343_v49  ;;  %7706 = vmatpush3.msra.mxu0 %v264_v6 }
 0x5ed   :  { %v7983_v52 = vpop.eup %7982  ;;  %7701 = vmatpush3.msra.mxu1 %v5487_v43  ;;  %7702 = vmatprep.mubr.msk.f32.mxu1 %vm8065_vm1, %v10017_v17  ;;  %v8053_v43 = vld [vmem:[%s9985_s0 + $0x28] sm:$0xff] }
 0x5ee   :  { %v4345_v31 = vmul.f32 %v7983_v52, %v9119_v58  ;;  %7731 = vmatprep.subr.mxu0 %v263_v36 }
 0x5f0   :  { %7703 = vmatmul.mubr.msk.f32.vlgmr.msra.gmra.mrb[70].mxu1 %vm284_vm2, %v4345_v31 }
 0x6a0   :  { %v4418_v51 = vpop.f32.mrb[56].mxu0 }
 0x6a1   :  { %v7629_v47 = vpop.f32.mrb[57].mxu0  ;;  %7707 = vmatprep.mubr.msk.f32.mxu0 %vm284_vm2, %v4418_v51 }
 0x6a4   :  { %v4570_v17 = vpop.f32.mrb[58].mxu0 }
 0x6a5   :  { %v7639_v55 = vpop.f32.mrb[59].mxu0 }
 0x6a6   :  { %v4494_v58 = vpop.f32.mrb[56].mxu1 }
 0x6a7   :  { %v7634_v38 = vpop.f32.mrb[57].mxu1  ;;  %7708 = vmatmul.mubr.msk.f32.vlgmr.msra.gmra.mrb[72].mxu0 %vm284_vm2, %v4494_v58 }
 0x6a8   :  { %7710 = vmatprep.mubr.msk.f32.mxu0 %vm284_vm2, %v4570_v17  ;;  %7732 = vmatpush3.msra.mxu0 %v263_v36  ;;  %v8054_v17 = vld [vmem:[%s9985_s0 + $0x30] sm:$0xff] }
 0x6aa   :  { %v4722_v32 = vpop.f32.mrb[60].mxu0 }
 0x6ab   :  { %v4646_v7 = vpop.f32.mrb[58].mxu1  ;;  %v7649_v35 = vpop.f32.mrb[61].mxu0 }
 0x6ac   :  { %v7644_v46 = vpop.f32.mrb[59].mxu1  ;;  %7711 = vmatmul.mubr.msk.f32.gmra.mrb[74].mxu0 %vm284_vm2, %v4646_v7  ;;  %v8055_v7 = vld [vmem:[%s9985_s0 + $0x38] sm:$0xff] }
 0x6ad   :  { %7713 = vmatprep.mubr.msk.f32.mxu0 %vm284_vm2, %v4722_v32 }
 0x6ae   :  { %v4874_v59 = vpop.f32.mrb[62].mxu0 }
 0x6af   :  { %v4798_v22 = vpop.f32.mrb[60].mxu1  ;;  %v7659_v13 = vpop.f32.mrb[63].mxu0 }
 0x6b0   :  { %v7654_v24 = vpop.f32.mrb[61].mxu1  ;;  %7714 = vmatmul.mubr.msk.f32.gmra.mrb[76].mxu0 %vm284_vm2, %v4798_v22  ;;  %v8056_v13 = vld [vmem:[%s9985_s0 + $0x40] sm:$0xff] }
 0x6b1   :  { %7716 = vmatprep.mubr.msk.f32.mxu0 %vm284_vm2, %v4874_v59 }
 0x6b2   :  { %v5026_v60 = vpop.f32.mrb[64].mxu0 }
 0x6b3   :  { %v4950_v41 = vpop.f32.mrb[62].mxu1  ;;  %v7669_v33 = vpop.f32.mrb[65].mxu0 }
 0x6b4   :  { %v7664_v23 = vpop.f32.mrb[63].mxu1  ;;  %7717 = vmatmul.mubr.msk.f32.gmra.mrb[78].mxu0 %vm284_vm2, %v4950_v41 }
 0x6b5   :  { %7719 = vmatprep.mubr.msk.f32.mxu0 %vm284_vm2, %v5026_v60  ;;  %v8057_v23 = vld [vmem:[%s9985_s0 + $0x48] sm:$0xff] }
 0x6b6   :  { %v5178_v61 = vpop.f32.mrb[66].mxu0 }
 0x6b7   :  { %v5102_v4 = vpop.f32.mrb[64].mxu1  ;;  %v7679_v37 = vpop.f32.mrb[67].mxu0 }
 0x6b8   :  { %v7674_v53 = vpop.f32.mrb[65].mxu1  ;;  %7720 = vmatmul.mubr.msk.f32.gmra.mrb[80].mxu0 %vm284_vm2, %v5102_v4 }
 0x6b9   :  { %7722 = vmatprep.mubr.msk.f32.mxu0 %vm284_vm2, %v5178_v61 }
 0x6ba   :  { %v5330_v26 = vpop.f32.mrb[68].mxu0 }
 0x6bb   :  { %v5254_v3 = vpop.f32.mrb[66].mxu1  ;;  %v7689_v29 = vpop.f32.mrb[69].mxu0 }
 0x6bc   :  { %v7684_v27 = vpop.f32.mrb[67].mxu1  ;;  %7723 = vmatmul.mubr.msk.f32.gmra.mrb[82].mxu0 %vm284_vm2, %v5254_v3 }
 0x6bd   :  { %7725 = vmatprep.mubr.msk.f32.mxu0 %vm284_vm2, %v5330_v26  ;;  %v8058_v26 = vld [vmem:[%s9985_s0 + $0x50] sm:$0xff]  ;;  %v8059_v27 = vld [vmem:[%s9985_s0 + $0x58] sm:$0xff] }
 0x6be   :  { %v5482_v40 = vpop.f32.mrb[70].mxu0 }
 0x6bf   :  { %v5406_v19 = vpop.f32.mrb[68].mxu1  ;;  %v7699_v8 = vpop.f32.mrb[71].mxu0 }
 0x6c0   :  { %v7694_v1 = vpop.f32.mrb[69].mxu1  ;;  %7726 = vmatmul.mubr.msk.f32.gmra.mrb[84].mxu0 %vm284_vm2, %v5406_v19 }
 0x6c1   :  { %7728 = vmatprep.mubr.msk.f32.mxu0 %vm284_vm2, %v5482_v40 }
 0x6c3   :  { %v5558_v44 = vpop.f32.mrb[70].mxu1 }
 0x6c4   :  { %v7704_v54 = vpop.f32.mrb[71].mxu1  ;;  %7729 = vmatmul.mubr.msk.f32.gmra.mrb[86].mxu0 %vm284_vm2, %v5558_v44 }
 0x6c5   :  { %7733 = vmatprep.mubr.msk.f32.mxu0 %vm284_vm2, %v8923_v63  ;;  %v9276_v63 = vld [vmem:[%s9988_s4] ss:$0 sm:$0xff] }
 0x6c8   :  { %7734 = vmatmul.mubr.msk.f32.vlgmr.msra.gmra.mrb[72].mxu0 %vm284_vm2, %v8925_v5 }
 0x6c9   :  { %7736 = vmatprep.mubr.msk.f32.mxu0 %vm284_vm2, %v8927_v25 }
 0x6cc   :  { %7737 = vmatmul.mubr.msk.f32.gmra.mrb[74].mxu0 %vm284_vm2, %v8929_v12 }
 0x6cd   :  { %7739 = vmatprep.mubr.msk.f32.mxu0 %vm284_vm2, %v8931_v16 }
 0x6d0   :  { %7740 = vmatmul.mubr.msk.f32.gmra.mrb[76].mxu0 %vm284_vm2, %v8933_v50  ;;  %v8048_v50 = vld [vmem:[%s9985_s0 + $0x8] sm:$0xff] }
 0x6d1   :  { %7742 = vmatprep.mubr.msk.f32.mxu0 %vm284_vm2, %v8935_v56 }
 0x6d4   :  { %7743 = vmatmul.mubr.msk.f32.gmra.mrb[78].mxu0 %vm284_vm2, %v8937_v18  ;;  %v8049_v18 = vld [vmem:[%s9985_s0] sm:$0xff] }
 0x6d5   :  { %7745 = vmatprep.mubr.msk.f32.mxu0 %vm284_vm2, %v8939_v2 }
 0x6d8   :  { %7746 = vmatmul.mubr.msk.f32.gmra.mrb[80].mxu0 %vm284_vm2, %v8941_v34 }
 0x6d9   :  { %7748 = vmatprep.mubr.msk.f32.mxu0 %vm284_vm2, %v8943_v0 }
 0x6dc   :  { %7749 = vmatmul.mubr.msk.f32.gmra.mrb[82].mxu0 %vm284_vm2, %v8945_v42 }
 0x6dd   :  { %7751 = vmatprep.mubr.msk.f32.mxu0 %vm284_vm2, %v8949_v10 }
 0x6e0   :  { %7752 = vmatmul.mubr.msk.f32.gmra.mrb[84].mxu0 %vm284_vm2, %v8947_v15 }
 0x6e1   :  { %7754 = vmatprep.mubr.msk.f32.mxu0 %vm284_vm2, %v8951_v14 }
 0x6e4   :  { %7755 = vmatmul.mubr.msk.f32.gmra.mrb[86].mxu0 %vm284_vm2, %v8957_v28  ;;  %v8050_v28 = vld [vmem:[%s9985_s0 + $0x10] sm:$0xff] }
 0x79b   :  { %v7735_v5 = vpop.f32.mrb[72].mxu0 }
 0x79c   :  { %v5956_v25 = vadd.f32 %v7735_v5, %v9276_v63  ;;  %v5869_v12 = vpop.f32.mrb[73].mxu0  ;;  %v8060_v5 = vld [vmem:[%s9985_s0 + $0x60] sm:$0xff] }
 0x79d   :  { %v5955_v16 = vadd.f32 %v9276_v63, %v5869_v12 }
 0x79e   :  { %v9283_v56 = vadd.f32 %v8048_v50, %v5956_v25 }
 0x79f   :  { %v9288_v2 = vadd.f32 %v8049_v18, %v5955_v16  ;;  %v7738_v34 = vpop.f32.mrb[74].mxu0  ;;  %v8061_v18 = vld [vmem:[%s9985_s0 + $0x68] sm:$0xff] }
 0x7a0   :  { %v5879_v0 = vpop.f32.mrb[75].mxu0  ;;  %v5990_v42 = vsel %vm69_vm0, %v9283_v56, 0.0  ;;  %v5958_v15 = vadd.f32 %v7738_v34, %v9276_v63 }
 0x7a1   :  { %v5957_v10 = vadd.f32 %v9276_v63, %v5879_v0  ;;  %5991 = vadd.xlane.f32.xlu1 %v5990_v42  ;;  %v5987_v14 = vsel %vm69_vm0, %v9288_v2, 0.0 }
 0x7a2   :  { %5988 = vadd.xlane.f32.xlu0 %v5987_v14  ;;  %v9305_v57 = vadd.f32 %v8051_v30, %v5958_v15 }
 0x7a3   :  { %v9299_v62 = vadd.f32 %v8050_v28, %v5957_v10  ;;  %v7741_v21 = vpop.f32.mrb[76].mxu0  ;;  %v8062_v10 = vld [vmem:[%s9985_s0 + $0x70] sm:$0xff]  ;;  %v8063_v28 = vld [vmem:[%s9985_s0 + $0x78] sm:$0xff] }
 0x7a4   :  { %v5960_v20 = vadd.f32 %v7741_v21, %v9276_v63  ;;  %v5889_v9 = vpop.f32.mrb[77].mxu0  ;;  %v5996_v51 = vsel %vm69_vm0, %v9305_v57, 0.0 }
 0x7a5   :  { %v5959_v48 = vadd.f32 %v9276_v63, %v5889_v9  ;;  %v5993_v45 = vsel %vm69_vm0, %v9299_v62, 0.0 }
 0x7a6   :  { %5994 = vadd.xlane.f32.xlu0 %v5993_v45  ;;  %v9318_v52 = vadd.f32 %v8053_v43, %v5960_v20 }
 0x7a7   :  { %v9313_v11 = vadd.f32 %v8052_v39, %v5959_v48  ;;  %v7744_v49 = vpop.f32.mrb[78].mxu0 }
 0x7a8   :  { %v5899_v31 = vpop.f32.mrb[79].mxu0  ;;  %v5962_v6 = vadd.f32 %v7744_v49, %v9276_v63  ;;  %v6002_v32 = vsel %vm69_vm0, %v9318_v52, 0.0 }
 0x7a9   :  { %v5961_v36 = vadd.f32 %v9276_v63, %v5899_v31  ;;  %v5999_v47 = vsel %vm69_vm0, %v9313_v11, 0.0 }
 0x7aa   :  { %5997 = vadd.xlane.f32.xlu0 %v5996_v51  ;;  %6000 = vadd.xlane.f32.xlu1 %v5999_v47  ;;  %v9336_v35 = vadd.f32 %v8055_v7, %v5962_v6 }
 0x7ab   :  { %v9329_v55 = vadd.f32 %v8054_v17, %v5961_v36  ;;  %v7747_v58 = vpop.f32.mrb[80].mxu0 }
 0x7ac   :  { %v5909_v38 = vpop.f32.mrb[81].mxu0  ;;  %v5964_v46 = vadd.f32 %v7747_v58, %v9276_v63  ;;  %v6008_v37 = vsel %vm69_vm0, %v9336_v35, 0.0 }
 0x7ad   :  { %v5963_v59 = vadd.f32 %v9276_v63, %v5909_v38  ;;  %v6005_v22 = vsel %vm69_vm0, %v9329_v55, 0.0 }
 0x7ae   :  { %6003 = vadd.xlane.f32.xlu0 %v6002_v32  ;;  %6006 = vadd.xlane.f32.xlu1 %v6005_v22  ;;  %v9351_v61 = vadd.f32 %v8057_v23, %v5964_v46 }
 0x7af   :  { %v9345_v24 = vadd.f32 %v8056_v13, %v5963_v59  ;;  %v7750_v60 = vpop.f32.mrb[82].mxu0 }
 0x7b0   :  { %v5966_v41 = vadd.f32 %v7750_v60, %v9276_v63  ;;  %v5919_v33 = vpop.f32.mrb[83].mxu0  ;;  %v6014_v44 = vsel %vm69_vm0, %v9351_v61, 0.0 }
 0x7b1   :  { %v5965_v4 = vadd.f32 %v9276_v63, %v5919_v33  ;;  %v6011_v53 = vsel %vm69_vm0, %v9345_v24, 0.0 }
 0x7b2   :  { %6009 = vadd.xlane.f32.xlu0 %v6008_v37  ;;  %6012 = vadd.xlane.f32.xlu1 %v6011_v53  ;;  %v9366_v40 = vadd.f32 %v8059_v27, %v5966_v41 }
 0x7b3   :  { %v9361_v3 = vadd.f32 %v8058_v26, %v5965_v4  ;;  %v7753_v29 = vpop.f32.mrb[84].mxu0 }
 0x7b4   :  { %v5929_v19 = vpop.f32.mrb[85].mxu0  ;;  %v5968_v8 = vadd.f32 %v7753_v29, %v9276_v63  ;;  %v6020_v50 = vsel %vm69_vm0, %v9366_v40, 0.0 }
 0x7b5   :  { %v5967_v1 = vadd.f32 %v9276_v63, %v5929_v19  ;;  %v6017_v54 = vsel %vm69_vm0, %v9361_v3, 0.0 }
 0x7b6   :  { %6015 = vadd.xlane.f32.xlu0 %v6014_v44  ;;  %6018 = vadd.xlane.f32.xlu1 %v6017_v54  ;;  %v9384_v34 = vadd.f32 %v8061_v18, %v5968_v8 }
 0x7b7   :  { %v9377_v25 = vadd.f32 %v8060_v5, %v5967_v1  ;;  %v7756_v12 = vpop.f32.mrb[86].mxu0 }
 0x7b8   :  { %v5939_v16 = vpop.f32.mrb[87].mxu0  ;;  %v5970_v0 = vadd.f32 %v7756_v12, %v9276_v63 }
 0x7b9   :  { %v5969_v42 = vadd.f32 %v9276_v63, %v5939_v16  ;;  %v6023_v15 = vsel %vm69_vm0, %v9377_v25, 0.0  ;;  %v6026_v63 = vsel %vm69_vm0, %v9384_v34, 0.0 }
 0x7ba   :  { %6021 = vadd.xlane.f32.xlu0 %v6020_v50  ;;  %6024 = vadd.xlane.f32.xlu1 %v6023_v15  ;;  %v9398_v21 = vadd.f32 %v8063_v28, %v5970_v0 }
 0x7bb   :  { %v9393_v14 = vadd.f32 %v8062_v10, %v5969_v42 }
 0x7bc   :  { %v6032_v9 = vsel %vm69_vm0, %v9398_v21, 0.0 }
 0x7bd   :  { %v6029_v20 = vsel %vm69_vm0, %v9393_v14, 0.0 }
 0x7be   :  { %6027 = vadd.xlane.f32.xlu0 %v6026_v63  ;;  %6030 = vadd.xlane.f32.xlu1 %v6029_v20 }
 0x7c2   :  { %6033 = vadd.xlane.f32.xlu0 %v6032_v9 }
 0x82e   :  { %v5992_v30 = vpop.xlane.xlu1 %5991 }
 0x82f   :  { %v6037_v48 = vmul.f32 0.0625, %v5992_v30  ;;  %v5989_v45 = vpop.xlane.xlu0 %5988 }
 0x830   :  { %v6036_v39 = vmul.f32 0.0625, %v5989_v45 }
 0x831   :  { %v9407_v49 = vsub.f32 %v9283_v56, %v6037_v48 }
 0x832   :  { %v9410_v43 = vsub.f32 %v9288_v2, %v6036_v39 }
 0x833   :  { %v5995_v31 = vpop.xlane.xlu0 %5994  ;;  %v6069_v6 = vmul.f32 %v9407_v49, %v9407_v49 }
 0x834   :  { %v6038_v36 = vmul.f32 0.0625, %v5995_v31  ;;  %v6068_v51 = vmul.f32 %v9410_v43, %v9410_v43 }
 0x835   :  { %v6087_v47 = vsel %vm69_vm0, %v6069_v6, 0.0 }
 0x836   :  { %v9418_v17 = vsub.f32 %v9299_v62, %v6038_v36  ;;  %6088 = vadd.xlane.f32.xlu0 %v6087_v47  ;;  %v6084_v56 = vsel %vm69_vm0, %v6068_v51, 0.0 }
 0x837   :  { %v5998_v58 = vpop.xlane.xlu0 %5997  ;;  %v6001_v38 = vpop.xlane.xlu1 %6000  ;;  %6085 = vadd.xlane.f32.xlu1 %v6084_v56 }
 0x838   :  { %v6039_v2 = vmul.f32 0.0625, %v5998_v58  ;;  %v6040_v32 = vmul.f32 0.0625, %v6001_v38  ;;  %v6070_v7 = vmul.f32 %v9418_v17, %v9418_v17 }
 0x83a   :  { %v9424_v46 = vsub.f32 %v9305_v57, %v6039_v2  ;;  %v9427_v59 = vsub.f32 %v9313_v11, %v6040_v32  ;;  %v6090_v62 = vsel %vm69_vm0, %v6070_v7, 0.0 }
 0x83b   :  { %v6004_v22 = vpop.xlane.xlu0 %6003  ;;  %v6007_v13 = vpop.xlane.xlu1 %6006  ;;  %6091 = vadd.xlane.f32.xlu1 %v6090_v62 }
 0x83c   :  { %v6041_v60 = vmul.f32 0.0625, %v6004_v22  ;;  %v6042_v41 = vmul.f32 0.0625, %v6007_v13  ;;  %v6071_v33 = vmul.f32 %v9424_v46, %v9424_v46  ;;  %v6072_v23 = vmul.f32 %v9427_v59, %v9427_v59  ;;  %v6242_v22 = vld [vmem:[%s9989_s7] sm:$0xff]  ;;  %v6243_v13 = vld [vmem:[%s9989_s7 + $0x8] sm:$0xff] }
 0x83e   :  { %v9435_v4 = vsub.f32 %v9318_v52, %v6041_v60  ;;  %v9438_v57 = vsub.f32 %v9329_v55, %v6042_v41  ;;  %v6093_v11 = vsel %vm69_vm0, %v6071_v33, 0.0  ;;  %v6096_v37 = vsel %vm69_vm0, %v6072_v23, 0.0  ;;  %v6460_v41 = vld [vmem:[%s9990_s9] sm:$0xff]  ;;  %v6461_v33 = vld [vmem:[%s9990_s9 + $0x8] sm:$0xff] }
 0x83f   :  { %v6010_v53 = vpop.xlane.xlu0 %6009  ;;  %v6013_v26 = vpop.xlane.xlu1 %6012  ;;  %6094 = vadd.xlane.f32.xlu0 %v6093_v11  ;;  %6097 = vadd.xlane.f32.xlu1 %v6096_v37  ;;  %v7821_v60 = vpack.c.bf16 %v6243_v13, %v6242_v22  ;;  %v9514_v23 = vpack.c.bf16 %v6461_v33, %v6460_v41 }
 0x840   :  { %v6043_v29 = vmul.f32 0.0625, %v6010_v53  ;;  %v6044_v27 = vmul.f32 0.0625, %v6013_v26  ;;  %v6073_v19 = vmul.f32 %v9435_v4, %v9435_v4  ;;  %v6074_v52 = vmul.f32 %v9438_v57, %v9438_v57 }
 0x841   :  { %7822 = vmatprep.subr.bf16.mxu1 %v7821_v60 }
 0x842   :  { %v9447_v8 = vsub.f32 %v9336_v35, %v6043_v29  ;;  %v9450_v55 = vsub.f32 %v9345_v24, %v6044_v27  ;;  %v6099_v1 = vsel %vm69_vm0, %v6073_v19, 0.0  ;;  %v6102_v44 = vsel %vm69_vm0, %v6074_v52, 0.0  ;;  %7824 = vmatpush3.bf16.msra.mxu1 %v7821_v60 }
 0x843   :  { %v6016_v54 = vpop.xlane.xlu0 %6015  ;;  %v6019_v5 = vpop.xlane.xlu1 %6018  ;;  %6100 = vadd.xlane.f32.xlu0 %v6099_v1  ;;  %6103 = vadd.xlane.f32.xlu1 %v6102_v44 }
 0x844   :  { %v6045_v12 = vmul.f32 0.0625, %v6016_v54  ;;  %v6046_v16 = vmul.f32 0.0625, %v6019_v5  ;;  %v6075_v50 = vmul.f32 %v9447_v8, %v9447_v8  ;;  %v6076_v35 = vmul.f32 %v9450_v55, %v9450_v55  ;;  %7826 = vmatprep.subr.bf16.mxu1 %v9514_v23 }
 0x846   :  { %v9459_v18 = vsub.f32 %v9351_v61, %v6045_v12  ;;  %v9462_v24 = vsub.f32 %v9361_v3, %v6046_v16  ;;  %v6105_v0 = vsel %vm69_vm0, %v6075_v50, 0.0  ;;  %v6108_v42 = vsel %vm69_vm0, %v6076_v35, 0.0 }
 0x847   :  { %v6022_v15 = vpop.xlane.xlu0 %6021  ;;  %v6025_v10 = vpop.xlane.xlu1 %6024  ;;  %6106 = vadd.xlane.f32.xlu0 %v6105_v0  ;;  %6109 = vadd.xlane.f32.xlu1 %v6108_v42 }
 0x848   :  { %v6047_v28 = vmul.f32 0.0625, %v6022_v15  ;;  %v6048_v63 = vmul.f32 0.0625, %v6025_v10  ;;  %v6077_v20 = vmul.f32 %v9459_v18, %v9459_v18  ;;  %v6078_v61 = vmul.f32 %v9462_v24, %v9462_v24 }
 0x84a   :  { %v9471_v9 = vsub.f32 %v9366_v40, %v6047_v28  ;;  %v9474_v3 = vsub.f32 %v9377_v25, %v6048_v63  ;;  %v6111_v30 = vsel %vm69_vm0, %v6077_v20, 0.0  ;;  %v6114_v48 = vsel %vm69_vm0, %v6078_v61, 0.0  ;;  %v9520_v28 = vld [vmem:[%s9991_s5] ss:$0 sm:$0xff] }
 0x84b   :  { %v6028_v45 = vpop.xlane.xlu0 %6027  ;;  %6112 = vadd.xlane.f32.xlu0 %v6111_v30  ;;  %6115 = vadd.xlane.f32.xlu1 %v6114_v48  ;;  %v6031_v39 = vpop.xlane.xlu1 %6030 }
 0x84c   :  { %v6049_v31 = vmul.f32 0.0625, %v6028_v45  ;;  %v6050_v6 = vmul.f32 0.0625, %v6031_v39  ;;  %v6079_v36 = vmul.f32 %v9471_v9, %v9471_v9  ;;  %v6080_v40 = vmul.f32 %v9474_v3, %v9474_v3 }
 0x84e   :  { %v9483_v51 = vsub.f32 %v9384_v34, %v6049_v31  ;;  %v9486_v25 = vsub.f32 %v9393_v14, %v6050_v6  ;;  %v6117_v47 = vsel %vm69_vm0, %v6079_v36, 0.0  ;;  %v6120_v56 = vsel %vm69_vm0, %v6080_v40, 0.0  ;;  %v9527_v36 = vld [vmem:[%s9992_s6] ss:$0 sm:$0xff] }
 0x84f   :  { %6118 = vadd.xlane.f32.xlu0 %v6117_v47  ;;  %v6034_v58 = vpop.xlane.xlu0 %6033  ;;  %6121 = vadd.xlane.f32.xlu1 %v6120_v56 }
 0x850   :  { %v6051_v38 = vmul.f32 0.0625, %v6034_v58  ;;  %v6081_v2 = vmul.f32 %v9483_v51, %v9483_v51  ;;  %v6082_v32 = vmul.f32 %v9486_v25, %v9486_v25 }
 0x852   :  { %v9495_v34 = vsub.f32 %v9398_v21, %v6051_v38  ;;  %v6123_v14 = vsel %vm69_vm0, %v6081_v2, 0.0  ;;  %v6126_v7 = vsel %vm69_vm0, %v6082_v32, 0.0 }
 0x853   :  { %6124 = vadd.xlane.f32.xlu0 %v6123_v14  ;;  %6127 = vadd.xlane.f32.xlu1 %v6126_v7 }
 0x854   :  { %v6083_v62 = vmul.f32 %v9495_v34, %v9495_v34 }
 0x856   :  { %v6129_v21 = vsel %vm69_vm0, %v6083_v62, 0.0 }
 0x857   :  { %6130 = vadd.xlane.f32.xlu0 %v6129_v21 }
 0x8c3   :  { %v6089_v11 = vpop.xlane.xlu0 %6088 }
 0x8c4   :  { %v6133_v37 = vmul.f32 0.0625, %v6089_v11  ;;  %v6086_v53 = vpop.xlane.xlu1 %6085 }
 0x8c5   :  { %v6132_v26 = vmul.f32 0.0625, %v6086_v53 }
 0x8c6   :  { %v6149_v29 = vadd.f32 1e-05, %v6133_v37 }
 0x8c7   :  { %v6148_v27 = vadd.f32 1e-05, %v6132_v26 }
 0x8c8   :  { %7984 = vrsqrt.f32 %v6149_v29  ;;  %v6092_v19 = vpop.xlane.xlu1 %6091 }
 0x8c9   :  { %7986 = vrsqrt.f32 %v6148_v27  ;;  %v6134_v52 = vmul.f32 0.0625, %v6092_v19 }
 0x8cb   :  { %v6150_v1 = vadd.f32 1e-05, %v6134_v52 }
 0x8cc   :  { %v6095_v44 = vpop.xlane.xlu0 %6094  ;;  %v6098_v54 = vpop.xlane.xlu1 %6097 }
 0x8cd   :  { %7988 = vrsqrt.f32 %v6150_v1  ;;  %v6135_v5 = vmul.f32 0.0625, %v6095_v44  ;;  %v6136_v12 = vmul.f32 0.0625, %v6098_v54 }
 0x8cf   :  { %v6151_v16 = vadd.f32 1e-05, %v6135_v5  ;;  %v6152_v50 = vadd.f32 1e-05, %v6136_v12 }
 0x8d0   :  { %v6101_v35 = vpop.xlane.xlu0 %6100  ;;  %v6104_v0 = vpop.xlane.xlu1 %6103 }
 0x8d1   :  { %7990 = vrsqrt.f32 %v6151_v16  ;;  %v6137_v42 = vmul.f32 0.0625, %v6101_v35  ;;  %v6138_v15 = vmul.f32 0.0625, %v6104_v0 }
 0x8d2   :  { %v7985_v10 = vpop.eup %7984  ;;  %7992 = vrsqrt.f32 %v6152_v50 }
 0x8d3   :  { %v7987_v63 = vpop.eup %7986  ;;  %v6181_v20 = vmul.f32 %v7985_v10, %v9407_v49  ;;  %v6153_v61 = vadd.f32 1e-05, %v6137_v42  ;;  %v6154_v30 = vadd.f32 1e-05, %v6138_v15 }
 0x8d4   :  { %v6107_v48 = vpop.xlane.xlu0 %6106  ;;  %v6110_v45 = vpop.xlane.xlu1 %6109  ;;  %v6180_v39 = vmul.f32 %v7987_v63, %v9410_v43 }
 0x8d5   :  { %7994 = vrsqrt.f32 %v6153_v61  ;;  %v6139_v31 = vmul.f32 0.0625, %v6107_v48  ;;  %v6140_v6 = vmul.f32 0.0625, %v6110_v45  ;;  %v6204_v40 = vmul.f32 %v9520_v28, %v6181_v20 }
 0x8d6   :  { %7996 = vrsqrt.f32 %v6154_v30  ;;  %v6203_v47 = vmul.f32 %v9520_v28, %v6180_v39 }
 0x8d7   :  { %v7989_v49 = vpop.eup %7988  ;;  %v6155_v56 = vadd.f32 1e-05, %v6139_v31  ;;  %v6156_v58 = vadd.f32 1e-05, %v6140_v6  ;;  %v9536_v62 = vadd.f32 %v9527_v36, %v6204_v40 }
 0x8d8   :  { %v6113_v38 = vpop.xlane.xlu0 %6112  ;;  %v6116_v2 = vpop.xlane.xlu1 %6115  ;;  %v9532_v43 = vadd.f32 %v9527_v36, %v6203_v47  ;;  %v6182_v32 = vmul.f32 %v7989_v49, %v9418_v17 }
 0x8d9   :  { %7998 = vrsqrt.f32 %v6155_v56  ;;  %v6141_v14 = vmul.f32 0.0625, %v6113_v38  ;;  %v6142_v7 = vmul.f32 0.0625, %v6116_v2 }
 0x8da   :  { %8000 = vrsqrt.f32 %v6156_v58  ;;  %7761 = vmatprep.mubr.msk.f32.mxu1 %vm69_vm0, %v9532_v43  ;;  %v6205_v22 = vmul.f32 %v9520_v28, %v6182_v32 }
 0x8db   :  { %v7991_v13 = vpop.eup %7990  ;;  %v6157_v21 = vadd.f32 1e-05, %v6141_v14  ;;  %v6158_v60 = vadd.f32 1e-05, %v6142_v7  ;;  %7762 = vmatmul.mubr.msk.f32.vlgmr.msra.gmra.mrb[72].mxu1 %vm69_vm0, %v9536_v62 }
 0x8dc   :  { %v7993_v41 = vpop.eup %7992  ;;  %v6119_v17 = vpop.xlane.xlu0 %6118  ;;  %v9544_v11 = vadd.f32 %v9527_v36, %v6205_v22  ;;  %v6183_v37 = vmul.f32 %v7991_v13, %v9424_v46  ;;  %7828 = vmatpush3.bf16.msra.mxu1 %v9514_v23 }
 0x8dd   :  { %v6122_v33 = vpop.xlane.xlu1 %6121  ;;  %8002 = vrsqrt.f32 %v6157_v21  ;;  %v6143_v53 = vmul.f32 0.0625, %v6119_v17  ;;  %v6184_v29 = vmul.f32 %v7993_v41, %v9427_v59 }
 0x8de   :  { %v6144_v26 = vmul.f32 0.0625, %v6122_v33  ;;  %8004 = vrsqrt.f32 %v6158_v60  ;;  %7764 = vmatprep.mubr.msk.f32.mxu1 %vm69_vm0, %v9544_v11  ;;  %v6206_v27 = vmul.f32 %v9520_v28, %v6183_v37 }
 0x8df   :  { %v7995_v19 = vpop.eup %7994  ;;  %v6159_v52 = vadd.f32 1e-05, %v6143_v53  ;;  %v6207_v44 = vmul.f32 %v9520_v28, %v6184_v29 }
 0x8e0   :  { %v6160_v1 = vadd.f32 1e-05, %v6144_v26  ;;  %v7997_v54 = vpop.eup %7996  ;;  %v6125_v46 = vpop.xlane.xlu0 %6124  ;;  %v9554_v23 = vadd.f32 %v9527_v36, %v6206_v27  ;;  %v6185_v12 = vmul.f32 %v7995_v19, %v9435_v4  ;;  %v6463_v19 = vld [vmem:[%s9990_s9 + $0x18] sm:$0xff] }
 0x8e1   :  { %v6128_v5 = vpop.xlane.xlu1 %6127  ;;  %8006 = vrsqrt.f32 %v6159_v52  ;;  %v6145_v59 = vmul.f32 0.0625, %v6125_v46  ;;  %v9558_v50 = vadd.f32 %v9527_v36, %v6207_v44  ;;  %v6186_v0 = vmul.f32 %v7997_v54, %v9438_v57 }
 0x8e2   :  { %v6146_v16 = vmul.f32 0.0625, %v6128_v5  ;;  %8008 = vrsqrt.f32 %v6160_v1  ;;  %7765 = vmatmul.mubr.msk.f32.gmra.mrb[74].mxu1 %vm69_vm0, %v9554_v23  ;;  %v6208_v35 = vmul.f32 %v9520_v28, %v6185_v12 }
 0x8e3   :  { %v7999_v42 = vpop.eup %7998  ;;  %v6161_v15 = vadd.f32 1e-05, %v6145_v59  ;;  %7767 = vmatprep.mubr.msk.f32.mxu1 %vm69_vm0, %v9558_v50  ;;  %v6209_v61 = vmul.f32 %v9520_v28, %v6186_v0 }
 0x8e4   :  { %v6162_v10 = vadd.f32 1e-05, %v6146_v16  ;;  %v8001_v4 = vpop.eup %8000  ;;  %v6131_v63 = vpop.xlane.xlu0 %6130  ;;  %v9567_v20 = vadd.f32 %v9527_v36, %v6208_v35  ;;  %v6187_v30 = vmul.f32 %v7999_v42, %v9447_v8 }
 0x8e5   :  { %8010 = vrsqrt.f32 %v6161_v15  ;;  %v6147_v48 = vmul.f32 0.0625, %v6131_v63  ;;  %v6188_v45 = vmul.f32 %v8001_v4, %v9450_v55  ;;  %v9575_v57 = vadd.f32 %v9527_v36, %v6209_v61 }
 0x8e6   :  { %8012 = vrsqrt.f32 %v6162_v10  ;;  %7768 = vmatmul.mubr.msk.f32.gmra.mrb[76].mxu1 %vm69_vm0, %v9567_v20  ;;  %v6210_v39 = vmul.f32 %v9520_v28, %v6187_v30 }
 0x8e7   :  { %v8003_v31 = vpop.eup %8002  ;;  %v6163_v6 = vadd.f32 1e-05, %v6147_v48  ;;  %v6211_v40 = vmul.f32 %v9520_v28, %v6188_v45  ;;  %7770 = vmatprep.mubr.msk.f32.mxu1 %vm69_vm0, %v9575_v57 }
 0x8e8   :  { %v8005_v47 = vpop.eup %8004  ;;  %v9582_v8 = vadd.f32 %v9527_v36, %v6210_v39  ;;  %v6189_v55 = vmul.f32 %v8003_v31, %v9459_v18 }
 0x8e9   :  { %8014 = vrsqrt.f32 %v6163_v6  ;;  %v9586_v49 = vadd.f32 %v9527_v36, %v6211_v40  ;;  %v6190_v56 = vmul.f32 %v8005_v47, %v9462_v24 }
 0x8ea   :  { %7771 = vmatmul.mubr.msk.f32.gmra.mrb[78].mxu1 %vm69_vm0, %v9582_v8  ;;  %v6212_v58 = vmul.f32 %v9520_v28, %v6189_v55 }
 0x8eb   :  { %v8007_v38 = vpop.eup %8006  ;;  %7773 = vmatprep.mubr.msk.f32.mxu1 %vm69_vm0, %v9586_v49  ;;  %v6213_v2 = vmul.f32 %v9520_v28, %v6190_v56 }
 0x8ec   :  { %v8009_v32 = vpop.eup %8008  ;;  %v9596_v18 = vadd.f32 %v9527_v36, %v6212_v58  ;;  %v6191_v14 = vmul.f32 %v8007_v38, %v9471_v9 }
 0x8ed   :  { %v9600_v7 = vadd.f32 %v9527_v36, %v6213_v2  ;;  %v6192_v24 = vmul.f32 %v8009_v32, %v9474_v3 }
 0x8ee   :  { %7774 = vmatmul.mubr.msk.f32.gmra.mrb[80].mxu1 %vm69_vm0, %v9596_v18  ;;  %v6214_v22 = vmul.f32 %v9520_v28, %v6191_v14 }
 0x8ef   :  { %v8011_v13 = vpop.eup %8010  ;;  %7776 = vmatprep.mubr.msk.f32.mxu1 %vm69_vm0, %v9600_v7  ;;  %v6215_v21 = vmul.f32 %v9520_v28, %v6192_v24 }
 0x8f0   :  { %v8013_v60 = vpop.eup %8012  ;;  %v9610_v41 = vadd.f32 %v9527_v36, %v6214_v22  ;;  %v6193_v9 = vmul.f32 %v8011_v13, %v9483_v51 }
 0x8f1   :  { %v9614_v17 = vadd.f32 %v9527_v36, %v6215_v21  ;;  %v6194_v3 = vmul.f32 %v8013_v60, %v9486_v25 }
 0x8f2   :  { %7777 = vmatmul.mubr.msk.f32.gmra.mrb[82].mxu1 %vm69_vm0, %v9610_v41  ;;  %v6216_v33 = vmul.f32 %v9520_v28, %v6193_v9 }
 0x8f3   :  { %v8015_v37 = vpop.eup %8014  ;;  %7779 = vmatprep.mubr.msk.f32.mxu1 %vm69_vm0, %v9614_v17  ;;  %v6217_v53 = vmul.f32 %v9520_v28, %v6194_v3 }
 0x8f4   :  { %v9624_v26 = vadd.f32 %v9527_v36, %v6216_v33  ;;  %v6195_v51 = vmul.f32 %v8015_v37, %v9495_v34  ;;  %v6462_v34 = vld [vmem:[%s9990_s9 + $0x10] sm:$0xff] }
 0x8f5   :  { %v9628_v29 = vadd.f32 %v9527_v36, %v6217_v53  ;;  %v7829_v52 = vpack.c.bf16 %v6463_v19, %v6462_v34 }
 0x8f6   :  { %7780 = vmatmul.mubr.msk.f32.gmra.mrb[84].mxu1 %vm69_vm0, %v9624_v26  ;;  %v6218_v25 = vmul.f32 %v9520_v28, %v6195_v51  ;;  %v7103_v28 = vld [vmem:[%s9993_s8] ss:$0 sm:$0xff] }
 0x8f7   :  { %7782 = vmatprep.mubr.msk.f32.mxu1 %vm69_vm0, %v9628_v29  ;;  %7830 = vmatprep.subr.bf16.mxu1 %v7829_v52 }
 0x8f8   :  { %v9636_v27 = vadd.f32 %v9527_v36, %v6218_v25  ;;  %7832 = vmatpush3.bf16.msra.mxu1 %v7829_v52 }
 0x8fa   :  { %7783 = vmatmul.mubr.msk.f32.gmra.mrb[86].mxu1 %vm69_vm0, %v9636_v27 }
 0x9ae   :  { %v7763_v36 = vpop.f32.mrb[72].mxu1 }
 0x9af   :  { %v6371_v1 = vadd.f32 %v7763_v36, %v7103_v28  ;;  %v6365_v44 = vpop.f32.mrb[73].mxu1 }
 0x9b0   :  { %v6366_v54 = vadd.f32 %v7103_v28, %v6365_v44 }
 0x9b1   :  { %v6445_v5 = vmax.f32 %v6371_v1, 0.0  ;;  %v9668_v1 = vld [vmem:[%s9994_s10] ss:$0 sm:$0xff] }
 0x9b2   :  { %v6444_v46 = vmax.f32 %v6366_v54, 0.0 }
 0x9b4   :  { %7793 = vmatprep.mubr.msk.f32.mxu1 %vm6471_vm3, %v6444_v46 }
 0x9b5   :  { %v7766_v12 = vpop.f32.mrb[74].mxu1  ;;  %7794 = vmatmul.mubr.msk.f32.vlgmr.msra.gmra.mrb[88].mxu1 %vm6471_vm3, %v6445_v5 }
 0x9b6   :  { %v6381_v59 = vadd.f32 %v7766_v12, %v7103_v28  ;;  %v6375_v16 = vpop.f32.mrb[75].mxu1 }
 0x9b7   :  { %v6376_v35 = vadd.f32 %v7103_v28, %v6375_v16 }
 0x9b8   :  { %v6447_v15 = vmax.f32 %v6381_v59, 0.0 }
 0x9b9   :  { %v6446_v0 = vmax.f32 %v6376_v35, 0.0  ;;  %v7769_v42 = vpop.f32.mrb[76].mxu1 }
 0x9ba   :  { %v6391_v10 = vadd.f32 %v7769_v42, %v7103_v28  ;;  %v6385_v4 = vpop.f32.mrb[77].mxu1 }
 0x9bb   :  { %v6386_v63 = vadd.f32 %v7103_v28, %v6385_v4  ;;  %7796 = vmatprep.mubr.msk.f32.mxu1 %vm6471_vm3, %v6446_v0 }
 0x9bc   :  { %7797 = vmatmul.mubr.msk.f32.gmra.mrb[90].mxu1 %vm6471_vm3, %v6447_v15  ;;  %v6449_v48 = vmax.f32 %v6391_v10, 0.0 }
 0x9bd   :  { %v6448_v61 = vmax.f32 %v6386_v63, 0.0  ;;  %v7772_v30 = vpop.f32.mrb[78].mxu1 }
 0x9be   :  { %v6401_v45 = vadd.f32 %v7772_v30, %v7103_v28  ;;  %v6395_v39 = vpop.f32.mrb[79].mxu1 }
 0x9bf   :  { %v6396_v31 = vadd.f32 %v7103_v28, %v6395_v39  ;;  %7799 = vmatprep.mubr.msk.f32.mxu1 %vm6471_vm3, %v6448_v61 }
 0x9c0   :  { %7800 = vmatmul.mubr.msk.f32.gmra.mrb[92].mxu1 %vm6471_vm3, %v6449_v48  ;;  %v6451_v47 = vmax.f32 %v6401_v45, 0.0 }
 0x9c1   :  { %v6450_v6 = vmax.f32 %v6396_v31, 0.0  ;;  %v7775_v40 = vpop.f32.mrb[80].mxu1 }
 0x9c2   :  { %v6411_v55 = vadd.f32 %v7775_v40, %v7103_v28  ;;  %v6405_v56 = vpop.f32.mrb[81].mxu1 }
 0x9c3   :  { %v6406_v58 = vadd.f32 %v7103_v28, %v6405_v56  ;;  %7802 = vmatprep.mubr.msk.f32.mxu1 %vm6471_vm3, %v6450_v6 }
 0x9c4   :  { %7803 = vmatmul.mubr.msk.f32.gmra.mrb[94].mxu1 %vm6471_vm3, %v6451_v47  ;;  %v6453_v32 = vmax.f32 %v6411_v55, 0.0 }
 0x9c5   :  { %v6452_v38 = vmax.f32 %v6406_v58, 0.0  ;;  %v7778_v2 = vpop.f32.mrb[82].mxu1 }
 0x9c6   :  { %v6421_v14 = vadd.f32 %v7778_v2, %v7103_v28  ;;  %v6415_v24 = vpop.f32.mrb[83].mxu1 }
 0x9c7   :  { %v6416_v22 = vadd.f32 %v7103_v28, %v6415_v24  ;;  %7805 = vmatprep.mubr.msk.f32.mxu1 %vm6471_vm3, %v6452_v38 }
 0x9c8   :  { %7806 = vmatmul.mubr.msk.f32.gmra.mrb[96].mxu1 %vm6471_vm3, %v6453_v32  ;;  %v6455_v60 = vmax.f32 %v6421_v14, 0.0 }
 0x9c9   :  { %v6454_v13 = vmax.f32 %v6416_v22, 0.0  ;;  %v7781_v21 = vpop.f32.mrb[84].mxu1 }
 0x9ca   :  { %v6431_v9 = vadd.f32 %v7781_v21, %v7103_v28  ;;  %v6425_v3 = vpop.f32.mrb[85].mxu1 }
 0x9cb   :  { %v6426_v33 = vadd.f32 %v7103_v28, %v6425_v3  ;;  %7808 = vmatprep.mubr.msk.f32.mxu1 %vm6471_vm3, %v6454_v13 }
 0x9cc   :  { %7809 = vmatmul.mubr.msk.f32.gmra.mrb[98].mxu1 %vm6471_vm3, %v6455_v60  ;;  %v6457_v51 = vmax.f32 %v6431_v9, 0.0 }
 0x9cd   :  { %v6456_v37 = vmax.f32 %v6426_v33, 0.0  ;;  %v7784_v53 = vpop.f32.mrb[86].mxu1 }
 0x9ce   :  { %v6441_v25 = vadd.f32 %v7784_v53, %v7103_v28  ;;  %v6435_v34 = vpop.f32.mrb[87].mxu1 }
 0x9cf   :  { %v6436_v19 = vadd.f32 %v7103_v28, %v6435_v34  ;;  %7811 = vmatprep.mubr.msk.f32.mxu1 %vm6471_vm3, %v6456_v37 }
 0x9d0   :  { %7812 = vmatmul.mubr.msk.f32.gmra.mrb[100].mxu1 %vm6471_vm3, %v6457_v51  ;;  %v6459_v36 = vmax.f32 %v6441_v25, 0.0 }
 0x9d1   :  { %v6458_v52 = vmax.f32 %v6436_v19, 0.0 }
 0x9d3   :  { %7814 = vmatprep.mubr.msk.f32.mxu1 %vm6471_vm3, %v6458_v52 }
 0x9d4   :  { %7815 = vmatmul.mubr.msk.f32.gmra.mrb[102].mxu1 %vm6471_vm3, %v6459_v36 }
 0xa88   :  { %v7795_v44 = vpop.f32.mrb[88].mxu1 }
 0xa89   :  { %v6592_v54 = vadd.f32 %v7795_v44, %v9668_v1  ;;  %v6586_v46 = vpop.f32.mrb[89].mxu1 }
 0xa8a   :  { %v6587_v28 = vadd.f32 %v9668_v1, %v6586_v46 }
 0xa8b   :  { %v9673_v5 = vadd.f32 %v6592_v54, %v9536_v62 }
 0xa8c   :  { %v9676_v12 = vadd.f32 %v6587_v28, %v9532_v43 }
 0xa8d   :  { %v6684_v59 = vsel %vm69_vm0, %v9673_v5, 0.0 }
 0xa8e   :  { %6685 = vadd.xlane.f32.xlu0 %v6684_v59  ;;  %v6681_v16 = vsel %vm69_vm0, %v9676_v12, 0.0 }
 0xa8f   :  { %v7798_v35 = vpop.f32.mrb[90].mxu1  ;;  %6682 = vadd.xlane.f32.xlu1 %v6681_v16 }
 0xa90   :  { %v6602_v0 = vadd.f32 %v7798_v35, %v9668_v1  ;;  %v6596_v42 = vpop.f32.mrb[91].mxu1 }
 0xa91   :  { %v6597_v15 = vadd.f32 %v9668_v1, %v6596_v42 }
 0xa92   :  { %v9685_v62 = vadd.f32 %v6602_v0, %v9554_v23 }
 0xa93   :  { %v9688_v43 = vadd.f32 %v6597_v15, %v9544_v11  ;;  %v7801_v10 = vpop.f32.mrb[92].mxu1 }
 0xa94   :  { %v6612_v4 = vadd.f32 %v7801_v10, %v9668_v1  ;;  %v6606_v63 = vpop.f32.mrb[93].mxu1  ;;  %v6690_v61 = vsel %vm69_vm0, %v9685_v62, 0.0 }
 0xa95   :  { %v6607_v30 = vadd.f32 %v9668_v1, %v6606_v63  ;;  %6691 = vadd.xlane.f32.xlu0 %v6690_v61  ;;  %v6687_v48 = vsel %vm69_vm0, %v9688_v43, 0.0 }
 0xa96   :  { %v9697_v45 = vadd.f32 %v6612_v4, %v9567_v20  ;;  %6688 = vadd.xlane.f32.xlu1 %v6687_v48 }
 0xa97   :  { %v9700_v11 = vadd.f32 %v6607_v30, %v9558_v50  ;;  %v7804_v23 = vpop.f32.mrb[94].mxu1 }
 0xa98   :  { %v6622_v39 = vadd.f32 %v7804_v23, %v9668_v1  ;;  %v6616_v31 = vpop.f32.mrb[95].mxu1  ;;  %v6696_v6 = vsel %vm69_vm0, %v9697_v45, 0.0 }
 0xa99   :  { %v6617_v40 = vadd.f32 %v9668_v1, %v6616_v31  ;;  %6697 = vadd.xlane.f32.xlu0 %v6696_v6  ;;  %v6693_v47 = vsel %vm69_vm0, %v9700_v11, 0.0 }
 0xa9a   :  { %v9709_v20 = vadd.f32 %v6622_v39, %v9582_v8  ;;  %6694 = vadd.xlane.f32.xlu1 %v6693_v47 }
 0xa9b   :  { %v9712_v50 = vadd.f32 %v6617_v40, %v9575_v57  ;;  %v7807_v55 = vpop.f32.mrb[96].mxu1 }
 0xa9c   :  { %v6632_v56 = vadd.f32 %v7807_v55, %v9668_v1  ;;  %v6626_v58 = vpop.f32.mrb[97].mxu1  ;;  %v6702_v38 = vsel %vm69_vm0, %v9709_v20, 0.0 }
 0xa9d   :  { %v6627_v2 = vadd.f32 %v9668_v1, %v6626_v58  ;;  %6703 = vadd.xlane.f32.xlu0 %v6702_v38  ;;  %v6699_v32 = vsel %vm69_vm0, %v9712_v50, 0.0 }
 0xa9e   :  { %v9721_v8 = vadd.f32 %v6632_v56, %v9596_v18  ;;  %6700 = vadd.xlane.f32.xlu1 %v6699_v32 }
 0xa9f   :  { %v9724_v57 = vadd.f32 %v6627_v2, %v9586_v49  ;;  %v7810_v14 = vpop.f32.mrb[98].mxu1 }
 0xaa0   :  { %v6642_v24 = vadd.f32 %v7810_v14, %v9668_v1  ;;  %v6636_v22 = vpop.f32.mrb[99].mxu1  ;;  %v6708_v13 = vsel %vm69_vm0, %v9721_v8, 0.0 }
 0xaa1   :  { %v6637_v21 = vadd.f32 %v9668_v1, %v6636_v22  ;;  %6709 = vadd.xlane.f32.xlu0 %v6708_v13  ;;  %v6705_v60 = vsel %vm69_vm0, %v9724_v57, 0.0 }
 0xaa2   :  { %v9733_v18 = vadd.f32 %v6642_v24, %v9610_v41  ;;  %6706 = vadd.xlane.f32.xlu1 %v6705_v60 }
 0xaa3   :  { %v9736_v49 = vadd.f32 %v6637_v21, %v9600_v7  ;;  %v7813_v9 = vpop.f32.mrb[100].mxu1 }
 0xaa4   :  { %v6652_v3 = vadd.f32 %v7813_v9, %v9668_v1  ;;  %v6646_v33 = vpop.f32.mrb[101].mxu1  ;;  %v6714_v37 = vsel %vm69_vm0, %v9733_v18, 0.0 }
 0xaa5   :  { %v6647_v53 = vadd.f32 %v9668_v1, %v6646_v33  ;;  %6715 = vadd.xlane.f32.xlu0 %v6714_v37  ;;  %v6711_v51 = vsel %vm69_vm0, %v9736_v49, 0.0 }
 0xaa6   :  { %v9745_v41 = vadd.f32 %v6652_v3, %v9624_v26  ;;  %6712 = vadd.xlane.f32.xlu1 %v6711_v51 }
 0xaa7   :  { %v9748_v7 = vadd.f32 %v6647_v53, %v9614_v17  ;;  %v7816_v25 = vpop.f32.mrb[102].mxu1 }
 0xaa8   :  { %v6662_v34 = vadd.f32 %v7816_v25, %v9668_v1  ;;  %v6656_v19 = vpop.f32.mrb[103].mxu1  ;;  %v6720_v52 = vsel %vm69_vm0, %v9745_v41, 0.0 }
 0xaa9   :  { %v6657_v36 = vadd.f32 %v9668_v1, %v6656_v19  ;;  %6721 = vadd.xlane.f32.xlu0 %v6720_v52  ;;  %v6717_v44 = vsel %vm69_vm0, %v9748_v7, 0.0 }
 0xaaa   :  { %v9757_v26 = vadd.f32 %v6662_v34, %v9636_v27  ;;  %6718 = vadd.xlane.f32.xlu1 %v6717_v44 }
 0xaab   :  { %v9760_v17 = vadd.f32 %v6657_v36, %v9628_v29 }
 0xaac   :  { %v6726_v54 = vsel %vm69_vm0, %v9757_v26, 0.0 }
 0xaad   :  { %6727 = vadd.xlane.f32.xlu0 %v6726_v54  ;;  %v6723_v46 = vsel %vm69_vm0, %v9760_v17, 0.0 }
 0xaae   :  { %6724 = vadd.xlane.f32.xlu1 %v6723_v46 }
 0xb1b   :  { %v6686_v1 = vpop.xlane.xlu0 %6685 }
 0xb1c   :  { %v6730_v28 = vmul.f32 0.0625, %v6686_v1  ;;  %v6683_v59 = vpop.xlane.xlu1 %6682 }
 0xb1d   :  { %v6729_v16 = vmul.f32 0.0625, %v6683_v59 }
 0xb1e   :  { %v9767_v35 = vsub.f32 %v9673_v5, %v6730_v28 }
 0xb1f   :  { %v9770_v27 = vsub.f32 %v9676_v12, %v6729_v16 }
 0xb20   :  { %v6762_v29 = vmul.f32 %v9767_v35, %v9767_v35 }
 0xb21   :  { %v6761_v0 = vmul.f32 %v9770_v27, %v9770_v27 }
 0xb22   :  { %v6692_v42 = vpop.xlane.xlu0 %6691  ;;  %v6780_v15 = vsel %vm69_vm0, %v6762_v29, 0.0 }
 0xb23   :  { %v6732_v10 = vmul.f32 0.0625, %v6692_v42  ;;  %6781 = vadd.xlane.f32.xlu0 %v6780_v15  ;;  %v6689_v4 = vpop.xlane.xlu1 %6688  ;;  %v6777_v63 = vsel %vm69_vm0, %v6761_v0, 0.0 }
 0xb24   :  { %v6731_v61 = vmul.f32 0.0625, %v6689_v4  ;;  %6778 = vadd.xlane.f32.xlu1 %v6777_v63 }
 0xb25   :  { %v9779_v5 = vsub.f32 %v9685_v62, %v6732_v10 }
 0xb26   :  { %v9782_v12 = vsub.f32 %v9688_v43, %v6731_v61  ;;  %v6698_v30 = vpop.xlane.xlu0 %6697 }
 0xb27   :  { %v6734_v48 = vmul.f32 0.0625, %v6698_v30  ;;  %v6695_v23 = vpop.xlane.xlu1 %6694  ;;  %v6764_v39 = vmul.f32 %v9779_v5, %v9779_v5 }
 0xb28   :  { %v6733_v31 = vmul.f32 0.0625, %v6695_v23  ;;  %v6763_v6 = vmul.f32 %v9782_v12, %v9782_v12 }
 0xb29   :  { %v9789_v40 = vsub.f32 %v9697_v45, %v6734_v48  ;;  %v6786_v47 = vsel %vm69_vm0, %v6764_v39, 0.0 }
 0xb2a   :  { %v9793_v62 = vsub.f32 %v9700_v11, %v6733_v31  ;;  %v6704_v43 = vpop.xlane.xlu0 %6703  ;;  %6787 = vadd.xlane.f32.xlu0 %v6786_v47  ;;  %v6783_v55 = vsel %vm69_vm0, %v6763_v6, 0.0 }
 0xb2b   :  { %v6736_v56 = vmul.f32 0.0625, %v6704_v43  ;;  %6784 = vadd.xlane.f32.xlu1 %v6783_v55  ;;  %v6701_v58 = vpop.xlane.xlu1 %6700  ;;  %v6766_v38 = vmul.f32 %v9789_v40, %v9789_v40 }
 0xb2c   :  { %v6735_v2 = vmul.f32 0.0625, %v6701_v58  ;;  %v6765_v45 = vmul.f32 %v9793_v62, %v9793_v62 }
 0xb2d   :  { %v9801_v32 = vsub.f32 %v9709_v20, %v6736_v56  ;;  %v6792_v11 = vsel %vm69_vm0, %v6766_v38, 0.0 }
 0xb2e   :  { %v9805_v14 = vsub.f32 %v9712_v50, %v6735_v2  ;;  %v6710_v24 = vpop.xlane.xlu0 %6709  ;;  %6793 = vadd.xlane.f32.xlu0 %v6792_v11  ;;  %v6789_v22 = vsel %vm69_vm0, %v6765_v45, 0.0 }
 0xb2f   :  { %v6738_v13 = vmul.f32 0.0625, %v6710_v24  ;;  %6790 = vadd.xlane.f32.xlu1 %v6789_v22  ;;  %v6707_v21 = vpop.xlane.xlu1 %6706  ;;  %v6768_v60 = vmul.f32 %v9801_v32, %v9801_v32 }
 0xb30   :  { %v6737_v9 = vmul.f32 0.0625, %v6707_v21  ;;  %v6767_v20 = vmul.f32 %v9805_v14, %v9805_v14 }
 0xb31   :  { %v9813_v3 = vsub.f32 %v9721_v8, %v6738_v13  ;;  %v6798_v50 = vsel %vm69_vm0, %v6768_v60, 0.0 }
 0xb32   :  { %v9817_v33 = vsub.f32 %v9724_v57, %v6737_v9  ;;  %v6716_v37 = vpop.xlane.xlu0 %6715  ;;  %6799 = vadd.xlane.f32.xlu0 %v6798_v50  ;;  %v6795_v53 = vsel %vm69_vm0, %v6767_v20, 0.0  ;;  %v9865_v50 = vld [vmem:[%s9995_s11] ss:$0 sm:$0xff] }
 0xb33   :  { %v6740_v51 = vmul.f32 0.0625, %v6716_v37  ;;  %6796 = vadd.xlane.f32.xlu1 %v6795_v53  ;;  %v6713_v25 = vpop.xlane.xlu1 %6712  ;;  %v6770_v34 = vmul.f32 %v9813_v3, %v9813_v3 }
 0xb34   :  { %v6739_v19 = vmul.f32 0.0625, %v6713_v25  ;;  %v6769_v8 = vmul.f32 %v9817_v33, %v9817_v33 }
 0xb35   :  { %v9825_v52 = vsub.f32 %v9733_v18, %v6740_v51  ;;  %v6804_v57 = vsel %vm69_vm0, %v6770_v34, 0.0 }
 0xb36   :  { %v9829_v36 = vsub.f32 %v9736_v49, %v6739_v19  ;;  %v6722_v44 = vpop.xlane.xlu0 %6721  ;;  %6805 = vadd.xlane.f32.xlu0 %v6804_v57  ;;  %v6801_v54 = vsel %vm69_vm0, %v6769_v8, 0.0  ;;  %v9871_v8 = vld [vmem:[%s9996_s12] ss:$0 sm:$0xff] }
 0xb37   :  { %v6742_v46 = vmul.f32 0.0625, %v6722_v44  ;;  %6802 = vadd.xlane.f32.xlu1 %v6801_v54  ;;  %v6719_v1 = vpop.xlane.xlu1 %6718  ;;  %v6772_v28 = vmul.f32 %v9825_v52, %v9825_v52 }
 0xb38   :  { %v6741_v59 = vmul.f32 0.0625, %v6719_v1  ;;  %v6771_v18 = vmul.f32 %v9829_v36, %v9829_v36 }
 0xb39   :  { %v9837_v16 = vsub.f32 %v9745_v41, %v6742_v46  ;;  %v6810_v49 = vsel %vm69_vm0, %v6772_v28, 0.0 }
 0xb3a   :  { %v9841_v29 = vsub.f32 %v9748_v7, %v6741_v59  ;;  %6811 = vadd.xlane.f32.xlu0 %v6810_v49  ;;  %v6728_v0 = vpop.xlane.xlu0 %6727  ;;  %v6807_v42 = vsel %vm69_vm0, %v6771_v18, 0.0 }
 0xb3b   :  { %v6744_v15 = vmul.f32 0.0625, %v6728_v0  ;;  %6808 = vadd.xlane.f32.xlu1 %v6807_v42  ;;  %v6725_v10 = vpop.xlane.xlu1 %6724  ;;  %v6774_v4 = vmul.f32 %v9837_v16, %v9837_v16 }
 0xb3c   :  { %v6743_v63 = vmul.f32 0.0625, %v6725_v10  ;;  %v6773_v41 = vmul.f32 %v9841_v29, %v9841_v29 }
 0xb3d   :  { %v9849_v61 = vsub.f32 %v9757_v26, %v6744_v15  ;;  %v6816_v7 = vsel %vm69_vm0, %v6774_v4, 0.0 }
 0xb3e   :  { %v9853_v30 = vsub.f32 %v9760_v17, %v6743_v63  ;;  %6817 = vadd.xlane.f32.xlu0 %v6816_v7  ;;  %v6813_v48 = vsel %vm69_vm0, %v6773_v41, 0.0 }
 0xb3f   :  { %6814 = vadd.xlane.f32.xlu1 %v6813_v48  ;;  %v6776_v23 = vmul.f32 %v9849_v61, %v9849_v61 }
 0xb40   :  { %v6775_v39 = vmul.f32 %v9853_v30, %v9853_v30 }
 0xb41   :  { %v6822_v31 = vsel %vm69_vm0, %v6776_v23, 0.0 }
 0xb42   :  { %6823 = vadd.xlane.f32.xlu0 %v6822_v31  ;;  %v6819_v26 = vsel %vm69_vm0, %v6775_v39, 0.0 }
 0xb43   :  { %6820 = vadd.xlane.f32.xlu1 %v6819_v26 }
 0xbb0   :  { %v6782_v6 = vpop.xlane.xlu0 %6781 }
 0xbb1   :  { %v6826_v47 = vmul.f32 0.0625, %v6782_v6  ;;  %v6779_v17 = vpop.xlane.xlu1 %6778 }
 0xbb2   :  { %v6825_v43 = vmul.f32 0.0625, %v6779_v17 }
 0xbb3   :  { %v6842_v55 = vadd.f32 1e-05, %v6826_v47 }
 0xbb4   :  { %v6841_v56 = vadd.f32 1e-05, %v6825_v43 }
 0xbb5   :  { %8016 = vrsqrt.f32 %v6842_v55 }
 0xbb6   :  { %8018 = vrsqrt.f32 %v6841_v56 }
 0xbb7   :  { %v6788_v58 = vpop.xlane.xlu0 %6787 }
 0xbb8   :  { %v6828_v38 = vmul.f32 0.0625, %v6788_v58  ;;  %v6785_v2 = vpop.xlane.xlu1 %6784 }
 0xbb9   :  { %v6827_v45 = vmul.f32 0.0625, %v6785_v2 }
 0xbba   :  { %v6844_v11 = vadd.f32 1e-05, %v6828_v38 }
 0xbbb   :  { %v6843_v24 = vadd.f32 1e-05, %v6827_v45  ;;  %v6794_v22 = vpop.xlane.xlu0 %6793 }
 0xbbc   :  { %8020 = vrsqrt.f32 %v6844_v11  ;;  %v6830_v13 = vmul.f32 0.0625, %v6794_v22  ;;  %v6791_v21 = vpop.xlane.xlu1 %6790 }
 0xbbd   :  { %8022 = vrsqrt.f32 %v6843_v24  ;;  %v6829_v60 = vmul.f32 0.0625, %v6791_v21 }
 0xbbe   :  { %v6846_v9 = vadd.f32 1e-05, %v6830_v13 }
 0xbbf   :  { %v8017_v20 = vpop.eup %8016  ;;  %v6845_v37 = vadd.f32 1e-05, %v6829_v60  ;;  %v6800_v53 = vpop.xlane.xlu0 %6799 }
 0xbc0   :  { %v8019_v51 = vpop.eup %8018  ;;  %v6874_v25 = vmul.f32 %v8017_v20, %v9767_v35  ;;  %8024 = vrsqrt.f32 %v6846_v9  ;;  %v6832_v34 = vmul.f32 0.0625, %v6800_v53  ;;  %v6797_v19 = vpop.xlane.xlu1 %6796 }
 0xbc1   :  { %v6873_v57 = vmul.f32 %v8019_v51, %v9770_v27  ;;  %8026 = vrsqrt.f32 %v6845_v37  ;;  %v6831_v44 = vmul.f32 0.0625, %v6797_v19 }
 0xbc2   :  { %v6897_v54 = vmul.f32 %v9865_v50, %v6874_v25  ;;  %v6848_v46 = vadd.f32 1e-05, %v6832_v34 }
 0xbc3   :  { %v6896_v1 = vmul.f32 %v9865_v50, %v6873_v57  ;;  %v6847_v28 = vadd.f32 1e-05, %v6831_v44  ;;  %v6806_v59 = vpop.xlane.xlu0 %6805 }
 0xbc4   :  { %v6920_v35 = vadd.f32 %v9871_v8, %v6897_v54  ;;  %8028 = vrsqrt.f32 %v6848_v46  ;;  %v6834_v18 = vmul.f32 0.0625, %v6806_v59  ;;  %v6803_v49 = vpop.xlane.xlu1 %6802 }
 0xbc5   :  { %v6919_v0 = vadd.f32 %v9871_v8, %v6896_v1  ;;  %8030 = vrsqrt.f32 %v6847_v28  ;;  %v6833_v42 = vmul.f32 0.0625, %v6803_v49 }
 0xbc6   :  { %v8021_v15 = vpop.eup %8020  ;;  %6936 = vst.msk [vmem:[%s9997_s13 + $0x8] sm:$0xff] %vm69_vm0, %v6920_v35  ;;  %v6850_v27 = vadd.f32 1e-05, %v6834_v18 }
 0xbc7   :  { %v8023_v10 = vpop.eup %8022  ;;  %6935 = vst.msk [vmem:[%s9997_s13] sm:$0xff] %vm69_vm0, %v6919_v0  ;;  %v6876_v4 = vmul.f32 %v8021_v15, %v9779_v5  ;;  %v6849_v63 = vadd.f32 1e-05, %v6833_v42  ;;  %v6812_v41 = vpop.xlane.xlu0 %6811 }
 0xbc8   :  { %v6875_v7 = vmul.f32 %v8023_v10, %v9782_v12  ;;  %8032 = vrsqrt.f32 %v6850_v27  ;;  %v6836_v48 = vmul.f32 0.0625, %v6812_v41  ;;  %v6809_v23 = vpop.xlane.xlu1 %6808 }
 0xbc9   :  { %v6899_v39 = vmul.f32 %v9865_v50, %v6876_v4  ;;  %8034 = vrsqrt.f32 %v6849_v63  ;;  %v6835_v31 = vmul.f32 0.0625, %v6809_v23 }
 0xbca   :  { %v8025_v26 = vpop.eup %8024  ;;  %v6898_v6 = vmul.f32 %v9865_v50, %v6875_v7  ;;  %v6852_v47 = vadd.f32 1e-05, %v6836_v48 }
 0xbcb   :  { %v8027_v17 = vpop.eup %8026  ;;  %v6922_v43 = vadd.f32 %v9871_v8, %v6899_v39  ;;  %v6878_v5 = vmul.f32 %v8025_v26, %v9789_v40  ;;  %v6851_v55 = vadd.f32 1e-05, %v6835_v31  ;;  %v6818_v56 = vpop.xlane.xlu0 %6817 }
 0xbcc   :  { %v6921_v12 = vadd.f32 %v9871_v8, %v6898_v6  ;;  %v6877_v58 = vmul.f32 %v8027_v17, %v9793_v62  ;;  %8036 = vrsqrt.f32 %v6852_v47  ;;  %v6838_v38 = vmul.f32 0.0625, %v6818_v56  ;;  %v6815_v2 = vpop.xlane.xlu1 %6814 }
 0xbcd   :  { %6938 = vst.msk [vmem:[%s9997_s13 + $0x18] sm:$0xff] %vm69_vm0, %v6922_v43  ;;  %v6901_v45 = vmul.f32 %v9865_v50, %v6878_v5  ;;  %8038 = vrsqrt.f32 %v6851_v55  ;;  %v6837_v11 = vmul.f32 0.0625, %v6815_v2 }
 0xbce   :  { %v8029_v24 = vpop.eup %8028  ;;  %6937 = vst.msk [vmem:[%s9997_s13 + $0x10] sm:$0xff] %vm69_vm0, %v6921_v12  ;;  %v6900_v40 = vmul.f32 %v9865_v50, %v6877_v58  ;;  %v6854_v62 = vadd.f32 1e-05, %v6838_v38 }
 0xbcf   :  { %v8031_v22 = vpop.eup %8030  ;;  %v6924_v13 = vadd.f32 %v9871_v8, %v6901_v45  ;;  %v6880_v21 = vmul.f32 %v8029_v24, %v9801_v32  ;;  %v6853_v60 = vadd.f32 1e-05, %v6837_v11  ;;  %v6824_v9 = vpop.xlane.xlu0 %6823 }
 0xbd0   :  { %v6923_v20 = vadd.f32 %v9871_v8, %v6900_v40  ;;  %v6879_v37 = vmul.f32 %v8031_v22, %v9805_v14  ;;  %8040 = vrsqrt.f32 %v6854_v62  ;;  %v6840_v53 = vmul.f32 0.0625, %v6824_v9  ;;  %v6821_v51 = vpop.xlane.xlu1 %6820 }
 0xbd1   :  { %6940 = vst.msk [vmem:[%s9997_s13 + $0x28] sm:$0xff] %vm69_vm0, %v6924_v13  ;;  %v6903_v25 = vmul.f32 %v9865_v50, %v6880_v21  ;;  %8042 = vrsqrt.f32 %v6853_v60  ;;  %v6839_v34 = vmul.f32 0.0625, %v6821_v51 }
 0xbd2   :  { %v8033_v19 = vpop.eup %8032  ;;  %6939 = vst.msk [vmem:[%s9997_s13 + $0x20] sm:$0xff] %vm69_vm0, %v6923_v20  ;;  %v6902_v32 = vmul.f32 %v9865_v50, %v6879_v37  ;;  %v6856_v14 = vadd.f32 1e-05, %v6840_v53 }
 0xbd3   :  { %v8035_v57 = vpop.eup %8034  ;;  %v6926_v44 = vadd.f32 %v9871_v8, %v6903_v25  ;;  %v6882_v54 = vmul.f32 %v8033_v19, %v9813_v3  ;;  %v6855_v46 = vadd.f32 1e-05, %v6839_v34 }
 0xbd4   :  { %v6925_v1 = vadd.f32 %v9871_v8, %v6902_v32  ;;  %v6881_v28 = vmul.f32 %v8035_v57, %v9817_v33  ;;  %8044 = vrsqrt.f32 %v6856_v14 }
 0xbd5   :  { %6942 = vst.msk [vmem:[%s9997_s13 + $0x38] sm:$0xff] %vm69_vm0, %v6926_v44  ;;  %v6905_v59 = vmul.f32 %v9865_v50, %v6882_v54  ;;  %8046 = vrsqrt.f32 %v6855_v46 }
 0xbd6   :  { %v8037_v35 = vpop.eup %8036  ;;  %6941 = vst.msk [vmem:[%s9997_s13 + $0x30] sm:$0xff] %vm69_vm0, %v6925_v1  ;;  %v6904_v3 = vmul.f32 %v9865_v50, %v6881_v28 }
 0xbd7   :  { %v8039_v18 = vpop.eup %8038  ;;  %v6928_v33 = vadd.f32 %v9871_v8, %v6905_v59  ;;  %v6884_v49 = vmul.f32 %v8037_v35, %v9825_v52 }
 0xbd8   :  { %v6927_v0 = vadd.f32 %v9871_v8, %v6904_v3  ;;  %v6883_v42 = vmul.f32 %v8039_v18, %v9829_v36 }
 0xbd9   :  { %6944 = vst.msk [vmem:[%s9997_s13 + $0x48] sm:$0xff] %vm69_vm0, %v6928_v33  ;;  %v6907_v15 = vmul.f32 %v9865_v50, %v6884_v49 }
 0xbda   :  { %v8041_v27 = vpop.eup %8040  ;;  %6943 = vst.msk [vmem:[%s9997_s13 + $0x40] sm:$0xff] %vm69_vm0, %v6927_v0  ;;  %v6906_v10 = vmul.f32 %v9865_v50, %v6883_v42 }
 0xbdb   :  { %v8043_v52 = vpop.eup %8042  ;;  %v6930_v4 = vadd.f32 %v9871_v8, %v6907_v15  ;;  %v6886_v36 = vmul.f32 %v8041_v27, %v9837_v16 }
 0xbdc   :  { %v6929_v63 = vadd.f32 %v9871_v8, %v6906_v10  ;;  %v6885_v41 = vmul.f32 %v8043_v52, %v9841_v29 }
 0xbdd   :  { %6946 = vst.msk [vmem:[%s9997_s13 + $0x58] sm:$0xff] %vm69_vm0, %v6930_v4  ;;  %v6909_v7 = vmul.f32 %v9865_v50, %v6886_v36 }
 0xbde   :  { %v8045_v48 = vpop.eup %8044  ;;  %6945 = vst.msk [vmem:[%s9997_s13 + $0x50] sm:$0xff] %vm69_vm0, %v6929_v63  ;;  %v6908_v23 = vmul.f32 %v9865_v50, %v6885_v41 }
 0xbdf   :  { %v8047_v16 = vpop.eup %8046  ;;  %v6932_v39 = vadd.f32 %v9871_v8, %v6909_v7  ;;  %v6888_v29 = vmul.f32 %v8045_v48, %v9849_v61 }
 0xbe0   :  { %v6931_v31 = vadd.f32 %v9871_v8, %v6908_v23  ;;  %v6887_v26 = vmul.f32 %v8047_v16, %v9853_v30 }
 0xbe1   :  { %6948 = vst.msk [vmem:[%s9997_s13 + $0x68] sm:$0xff] %vm69_vm0, %v6932_v39  ;;  %v6911_v6 = vmul.f32 %v9865_v50, %v6888_v29 }
 0xbe2   :  { %6947 = vst.msk [vmem:[%s9997_s13 + $0x60] sm:$0xff] %vm69_vm0, %v6931_v31  ;;  %v6910_v47 = vmul.f32 %v9865_v50, %v6887_v26 }
 0xbe3   :  { %v6934_v61 = vadd.f32 %v9871_v8, %v6911_v6 }
 0xbe4   :  { %v6933_v17 = vadd.f32 %v9871_v8, %v6910_v47 }
 0xbe5   :  { %6950 = vst.msk [vmem:[%s9997_s13 + $0x78] sm:$0xff] %vm69_vm0, %v6934_v61 }
 0xbe6   :  { %6949 = vst.msk [vmem:[%s9997_s13 + $0x70] sm:$0xff] %vm69_vm0, %v6933_v17 }

</bundles_post_ra>
